<compile_context>
chip_gen: v7x
topology: tpu7x:2x2x1
jax: 0.10.0
libtpu: 0.0.40
codegen_flags: <defaults>
</compile_context>

<pallas_src>
import jax
import jax.numpy as jnp
from jax.experimental import pallas as pl
from jax.experimental.pallas import tpu as pltpu


def _upsample2x_kernel(x_ref, o_ref):
    # x_ref: (TB, H, W)
    # o_ref: (TB, H, 4W)   -- output viewed with the output-row pair folded
    #                         into the lane dim:
    #                           o_view[p, i, 0:2W]  == out[p, 2i,   :]
    #                           o_view[p, i, 2W:4W] == out[p, 2i+1, :]
    x = x_ref[...]
    tb, h, w = x.shape

    # Lane (W) interleave only: y[..., 2j + d] = x[..., j]   (d in {0, 1})
    y = jnp.broadcast_to(x[:, :, :, None], (tb, h, w, 2)).reshape(tb, h, 2 * w)

    # Row (H) duplication = two contiguous stores into the folded lane dim.
    o_ref[:, :, 0:2 * w] = y
    o_ref[:, :, 2 * w:4 * w] = y


def upsample2x_nearest(x, target_out_block_bytes=4 * 1024 * 1024):
    """x: (N, C, H, W) -> (N, C, 2H, 2W), nearest-neighbour (PyTorch semantics)."""
    N, C, H, W = x.shape
    P = N * C
    itemsize = jnp.dtype(x.dtype).itemsize

    # Pick TB so the OUTPUT block (the dominant traffic: 4x input bytes) is
    # ~target_out_block_bytes, and TB divides P (avoids ragged last block).
    out_plane_bytes = 4 * H * W * itemsize
    tb = int(max(1, min(P, target_out_block_bytes // max(out_plane_bytes, 1))))
    while P % tb != 0:
        tb -= 1
    num_blocks = P // tb

    x_flat = x.reshape(P, H, W)

    out_flat = pl.pallas_call(
        _upsample2x_kernel,
        out_shape=jax.ShapeDtypeStruct((P, H, 4 * W), x.dtype),
        grid_spec=pltpu.PrefetchScalarGridSpec(
            num_scalar_prefetch=0,
            grid=(num_blocks,),
            in_specs=[pl.BlockSpec((tb, H, W), lambda b: (b, 0, 0))],
            out_specs=pl.BlockSpec((tb, H, 4 * W), lambda b: (b, 0, 0)),
        ),
        compiler_params=pltpu.CompilerParams(
            dimension_semantics=("parallel",),
            vmem_limit_bytes=48 * 1024 * 1024,
        ),
    )(x_flat)

    # (P, H, 4W) is exactly the contiguous layout of (N, C, 2H, 2W): free view.
    return out_flat.reshape(N, C, 2 * H, 2 * W)


class UpsamplingLayer:
    """Mirror of the PyTorch module; nn.Upsample(scale_factor=2) is parameter-free."""

    def __init__(self, channels):
        self.channels = channels  # unused, matches torch __init__ signature

    def __call__(self, x):
        return upsample2x_nearest(x)


if __name__ == "__main__":
    key = jax.random.PRNGKey(0)
    N, C, H, W = 2, 4, 16, 16
    x = jax.random.normal(key, (N, C, H, W), dtype=jnp.float32)

    layer = UpsamplingLayer(channels=C)
    out = jax.block_until_ready(layer(x))

    # Reference (pure JAX) nearest-neighbour upsample, same semantics as torch.
    ref = jnp.repeat(jnp.repeat(x, 2, axis=2), 2, axis=3)

    assert out.shape == (N, C, 2 * H, 2 * W), out.shape
    assert out.dtype == x.dtype
    assert jnp.allclose(out, ref), "mismatch vs reference upsample"

    print("KERNEL_OK")
</pallas_src>

<mosaic_0001>
module attributes {stable_mosaic.version = 11 : i64} {
  func.func @_upsample2x_kernel(%arg0: i32, %arg1: memref<8x16x16xf32, #tpu.memory_space<vmem>>, %arg2: memref<8x16x64xf32, #tpu.memory_space<vmem>>) attributes {dimension_semantics = [#tpu.dimension_semantics<parallel>], iteration_bounds = array<i64: 1>, scalar_prefetch = 0 : i64, scratch_operands = 0 : i64, tpu.core_type = #tpu.core_type<tc>, window_params = [{transform_indices = @transform_0, window_bounds = array<i64: 8, 16, 16>}, {transform_indices = @transform_1, window_bounds = array<i64: 8, 16, 64>}]} {
    %c0 = arith.constant 0 : index
    %c0_0 = arith.constant 0 : index
    %c0_1 = arith.constant 0 : index
    %0 = vector.load %arg1[%c0, %c0_0, %c0_1] : memref<8x16x16xf32, #tpu.memory_space<vmem>>, vector<8x16x16xf32>
    %1 = vector.shape_cast %0 : vector<8x16x16xf32> to vector<8x16x16x1xf32>
    %2 = vector.shape_cast %1 : vector<8x16x16x1xf32> to vector<8x16x16x1xf32>
    %3 = vector.broadcast %2 : vector<8x16x16x1xf32> to vector<8x16x16x2xf32>
    %4 = vector.shape_cast %3 : vector<8x16x16x2xf32> to vector<8x16x32xf32>
    %c0_2 = arith.constant 0 : index
    %c0_3 = arith.constant 0 : index
    %c0_4 = arith.constant 0 : index
    %5 = vector.load %arg2[%c0_2, %c0_3, %c0_4] : memref<8x16x64xf32, #tpu.memory_space<vmem>>, vector<8x16x32xf32>
    tpu.vector_store %arg2[%c0_2, %c0_3, %c0_4], %4 {strides = array<i32>} : memref<8x16x64xf32, #tpu.memory_space<vmem>>, vector<8x16x32xf32>,
    %c0_5 = arith.constant 0 : index
    %c0_6 = arith.constant 0 : index
    %c32 = arith.constant 32 : index
    %6 = vector.load %arg2[%c0_5, %c0_6, %c32] : memref<8x16x64xf32, #tpu.memory_space<vmem>>, vector<8x16x32xf32>
    tpu.vector_store %arg2[%c0_5, %c0_6, %c32], %4 {strides = array<i32>} : memref<8x16x64xf32, #tpu.memory_space<vmem>>, vector<8x16x32xf32>,
    return
  }
  func.func @transform_0(%arg0: i32) -> (i32, i32, i32) {
    %c0_i32 = arith.constant 0 : i32
    %c0_i32_0 = arith.constant 0 : i32
    %c0_i32_1 = arith.constant 0 : i32
    return %arg0, %c0_i32, %c0_i32_0 : i32, i32, i32
  }
  func.func @transform_1(%arg0: i32) -> (i32, i32, i32) {
    %c0_i32 = arith.constant 0 : i32
    %c0_i32_0 = arith.constant 0 : i32
    %c0_i32_1 = arith.constant 0 : i32
    return %arg0, %c0_i32, %c0_i32_0 : i32, i32, i32
  }
}

</mosaic_0001>

<bundles_post_ra>
// kernel: tpu_custom_call.1
= control target key start
LH: loop header
LB: loop body
LE: loop exit
PB: predicated region body
PF: predicated region fallthrough
CT: control target
= control target key end

     0   :  { %6 = vsyncpa [#allocation3], 0  ;;  %s11380_s0 = inlined_call_operand.hbm [shape: f32[8,16,16], index: 0, kind: input, shape index: {}]   ;;  %s11381_s1 = inlined_call_operand.hbm [shape: f32[8,16,64], index: 1, kind: output, shape index: {}]  }
   0x1   :  { %7 = vsyncpa [#allocation4], 0  ;;  %s7198_s6 = smov [#allocation2]   ;;  %s7150_s10 = scalar_lea.hbm %s11380_s0, 2048 }
   0x2   :  { %s13_s7 = sshll.u32 %s7198_s6, 4  ;;  %p7151_p0 = scmp.ne.s32.totalorder %s11380_s0, %s7150_s10  ;;  %s14_s7 = int_to_ptr.vmem [resolvable:$true] %s13_s7 }
   0x3   :  { %p7154_p1 = scmp.lt.u32.totalorder %s7150_s10, %s11380_s0 }
   0x5   :  { %p7156_p2 = pnand %p7154_p1, %p7151_p0 }
   0x7   :  { %7159 = shalt.err (!%p7156_p2)
}
   0x8   :  { %s7160_s15 = scalar_lea.vmem %s14_s7, 2048  ;;  %p7165_p4 = scmp.lt.s32.totalorder %s14_s7, %s14_s7 }
   0x9   :  { %p7161_p3 = scmp.ne.s32.totalorder %s14_s7, %s7160_s15  ;;  %p7166_p5 = scmp.lt.s32.totalorder %s7160_s15, %s7160_s15 }
   0xb   :  { %p7167_p6 = por %p7166_p5, %p7165_p4 }
   0xd   :  { %p7168_p7 = pnand %p7167_p6, %p7161_p3 }
   0xf   :  { %7171 = shalt.err (!%p7168_p7)
}
  0x10   :  { %s7199_s16 = smov 128   ;;  %s7200_s17 = smov 8  }
  0x11   :  { %19 = dma.hbm_to_vmem [thread:$0]  %s11380_s0, 2048, %s14_s7, [#allocation3], %s7199_s16, %s7199_s16, %s7200_s17  }
  0x12   :  { %7194 = dma.done.wait [#allocation3], 2048  }
  0x13   :  { %7195 = vsyncadd [#allocation3], 4294965248  ;;  %v39_v0 = vlaneseq  ;;  %v23_v4 = vld [vmem:[#allocation2] sm:$0xff]  ;;  %v24_v19 = vld [vmem:[#allocation2 + $0x8] sm:$0xff]  ;;  %v7201_v46 = vmov 1983009808  }
  0x14   :  { %v25_v28 = vld [vmem:[#allocation2 + $0x10] sm:$0xff]  ;;  %v26_v37 = vld [vmem:[#allocation2 + $0x18] sm:$0xff]  ;;  %v1450_v47 = vunpack.c.l.s4 %v7201_v46  ;;  %v7302_v53 = vld [vmem:[#allocation2 + $0x20] sm:$0xff]  ;;  %s7203_s0 = smov 2   ;;  %s7204_s20 = smov 4   ;;  %vm6759_vm0 = vcmask 15360  }
  0x15   :  { %v7244_v1 = vshrl.u32 %v39_v0, 7  ;;  %s7205_s21 = smov 6   ;;  %s7206_s22 = smov 10   ;;  %vm6776_vm1 = vcmask 31744   ;;  %vm6793_vm2 = vcmask 48128   ;;  %vm6810_vm3 = vcmask 64512  }
  0x16   :  { %v1451_v51 = vunpack.c.0.s8 %v1450_v47  ;;  %s7207_s23 = smov 12   ;;  %s7208_s24 = smov 14   ;;  %vm6827_vm4 = vcmask 80896   ;;  %vm6844_vm5 = vcmask 97280   ;;  %vm6861_vm6 = vcmask 113664  }
  0x17   :  { %v7247_v2 = vsub.s32 1, %v7244_v1  ;;  %v7250_v3 = vsub.s32 0, %v7244_v1  ;;  %v7255_v7 = vsub.s32 2, %v7244_v1  ;;  %v7259_v9 = vsub.s32 3, %v7244_v1  ;;  %s7209_s25 = smov 16   ;;  %s7210_s26 = smov 18  }
  0x18   :  { %v7263_v11 = vsub.s32 4, %v7244_v1  ;;  %v7267_v13 = vsub.s32 5, %v7244_v1  ;;  %v7271_v15 = vsub.s32 6, %v7244_v1  ;;  %v7275_v17 = vsub.s32 7, %v7244_v1  ;;  %s7211_s27 = smov 20   ;;  %s7212_s28 = smov 22  }
  0x19   :  { %v53_v5 = vrot.slane %v23_v4, %v7247_v2  ;;  %v42_v6 = vrot.slane %v23_v4, %v7250_v3  ;;  %v64_v8 = vrot.slane %v23_v4, %v7255_v7  ;;  %v75_v10 = vrot.slane %v23_v4, %v7259_v9  ;;  %s7213_s29 = smov 24   ;;  %s7214_s30 = smov 26  }
  0x1a   :  { %v86_v12 = vrot.slane %v23_v4, %v7263_v11  ;;  %v97_v14 = vrot.slane %v23_v4, %v7267_v13  ;;  %v108_v16 = vrot.slane %v23_v4, %v7271_v15  ;;  %v119_v18 = vrot.slane %v23_v4, %v7275_v17  ;;  %s7215_s2 = smov 28   ;;  %s7216_s3 = smov 30  }
  0x1b   :  { %55 = vbcast.lane.b32.xlu1 %v53_v5, 256  ;;  %44 = vbcast.lane.b32.xlu0 %v42_v6, 256  ;;  %v130_v20 = vrot.slane %v24_v19, %v7250_v3  ;;  %v141_v21 = vrot.slane %v24_v19, %v7247_v2  ;;  %v152_v22 = vrot.slane %v24_v19, %v7255_v7  ;;  %vm6878_vm7 = vcmask 130048   ;;  %s7217_s4 = smov 32   ;;  %s7218_s5 = smov [#allocation5]  }
  0x1c   :  { %v163_v23 = vrot.slane %v24_v19, %v7259_v9  ;;  %v174_v24 = vrot.slane %v24_v19, %v7263_v11  ;;  %v185_v25 = vrot.slane %v24_v19, %v7267_v13  ;;  %v196_v26 = vrot.slane %v24_v19, %v7271_v15  ;;  %s7117_s6 = sshll.u32 %s7218_s5, 4  ;;  %s7118_s6 = int_to_ptr.vmem [resolvable:$true] %s7117_s6 }
  0x1d   :  { %v207_v27 = vrot.slane %v24_v19, %v7275_v17  ;;  %v218_v29 = vrot.slane %v25_v28, %v7250_v3  ;;  %v229_v30 = vrot.slane %v25_v28, %v7247_v2  ;;  %v240_v31 = vrot.slane %v25_v28, %v7255_v7  ;;  %s7172_s7 = scalar_lea.vmem %s7118_s6, 2048  ;;  %p7177_p9 = scmp.lt.s32.totalorder %s7118_s6, %s7118_s6 }
  0x1e   :  { %v251_v32 = vrot.slane %v25_v28, %v7259_v9  ;;  %v262_v33 = vrot.slane %v25_v28, %v7263_v11  ;;  %v273_v34 = vrot.slane %v25_v28, %v7267_v13  ;;  %v284_v35 = vrot.slane %v25_v28, %v7271_v15  ;;  %p7173_p8 = scmp.ne.s32.totalorder %s7118_s6, %s7172_s7  ;;  %p7178_p10 = scmp.lt.s32.totalorder %s7172_s7, %s7172_s7 }
  0x1f   :  { %59 = vbcast.lane.b32.xlu1 %v53_v5, 264  ;;  %48 = vbcast.lane.b32.xlu0 %v42_v6, 264  ;;  %v295_v36 = vrot.slane %v25_v28, %v7275_v17  ;;  %v306_v38 = vrot.slane %v26_v37, %v7250_v3  ;;  %v317_v39 = vrot.slane %v26_v37, %v7247_v2  ;;  %vm6895_vm8 = vcmask 146432  }
  0x20   :  { %v328_v40 = vrot.slane %v26_v37, %v7255_v7  ;;  %v339_v41 = vrot.slane %v26_v37, %v7259_v9  ;;  %v350_v42 = vrot.slane %v26_v37, %v7263_v11  ;;  %v361_v43 = vrot.slane %v26_v37, %v7267_v13  ;;  %p7179_p11 = por %p7178_p10, %p7177_p9 }
  0x21   :  { %v372_v48 = vrot.slane %v26_v37, %v7271_v15  ;;  %v383_v52 = vrot.slane %v26_v37, %v7275_v17  ;;  %v7305_v56 = vsub.s32 %v1451_v51, %v7244_v1  ;;  %v394_v59 = vrot.slane %v7302_v53, %v7250_v3 }
  0x22   :  { %v416_v28 = vrot.slane %v7302_v53, %v7255_v7  ;;  %vm6912_vm9 = vcmask 162816   ;;  %vm6929_vm10 = vcmask 179200   ;;  %vm6946_vm11 = vcmask 195584   ;;  %p7180_p12 = pnand %p7179_p11, %p7173_p8 }
  0x23   :  { %70 = vbcast.lane.b32.xlu1 %v64_v8, 264  ;;  %66 = vbcast.lane.b32.xlu0 %v64_v8, 256  ;;  %vm6963_vm12 = vcmask 211968   ;;  %vm6980_vm13 = vcmask 228352   ;;  %vm6997_vm14 = vcmask 244736   ;;  %vm7014_vm15 = vcmask 261120  }
  0x27   :  { %81 = vbcast.lane.b32.xlu1 %v75_v10, 264  ;;  %77 = vbcast.lane.b32.xlu0 %v75_v10, 256 }
  0x2b   :  { %92 = vbcast.lane.b32.xlu1 %v86_v12, 264  ;;  %88 = vbcast.lane.b32.xlu0 %v86_v12, 256  ;;  %v405_v12 = vrot.slane %v7302_v53, %v7247_v2 }
  0x2f   :  { %103 = vbcast.lane.b32.xlu1 %v97_v14, 264  ;;  %99 = vbcast.lane.b32.xlu0 %v97_v14, 256 }
  0x33   :  { %114 = vbcast.lane.b32.xlu1 %v108_v16, 264  ;;  %110 = vbcast.lane.b32.xlu0 %v108_v16, 256 }
  0x37   :  { %125 = vbcast.lane.b32.xlu1 %v119_v18, 264  ;;  %121 = vbcast.lane.b32.xlu0 %v119_v18, 256 }
  0x3b   :  { %136 = vbcast.lane.b32.xlu1 %v130_v20, 264  ;;  %132 = vbcast.lane.b32.xlu0 %v130_v20, 256 }
  0x3f   :  { %147 = vbcast.lane.b32.xlu1 %v141_v21, 264  ;;  %143 = vbcast.lane.b32.xlu0 %v141_v21, 256 }
  0x43   :  { %158 = vbcast.lane.b32.xlu1 %v152_v22, 264  ;;  %154 = vbcast.lane.b32.xlu0 %v152_v22, 256 }
  0x47   :  { %169 = vbcast.lane.b32.xlu1 %v163_v23, 264  ;;  %165 = vbcast.lane.b32.xlu0 %v163_v23, 256 }
  0x4b   :  { %180 = vbcast.lane.b32.xlu1 %v174_v24, 264  ;;  %176 = vbcast.lane.b32.xlu0 %v174_v24, 256 }
  0x4f   :  { %191 = vbcast.lane.b32.xlu1 %v185_v25, 264  ;;  %187 = vbcast.lane.b32.xlu0 %v185_v25, 256 }
  0x53   :  { %202 = vbcast.lane.b32.xlu1 %v196_v26, 264  ;;  %198 = vbcast.lane.b32.xlu0 %v196_v26, 256 }
  0x57   :  { %213 = vbcast.lane.b32.xlu1 %v207_v27, 264  ;;  %209 = vbcast.lane.b32.xlu0 %v207_v27, 256 }
  0x5b   :  { %224 = vbcast.lane.b32.xlu1 %v218_v29, 264  ;;  %220 = vbcast.lane.b32.xlu0 %v218_v29, 256 }
  0x5f   :  { %235 = vbcast.lane.b32.xlu1 %v229_v30, 264  ;;  %231 = vbcast.lane.b32.xlu0 %v229_v30, 256 }
  0x63   :  { %246 = vbcast.lane.b32.xlu1 %v240_v31, 264  ;;  %242 = vbcast.lane.b32.xlu0 %v240_v31, 256  ;;  %v7202_v31 = vmov 1934713408  }
  0x67   :  { %257 = vbcast.lane.b32.xlu1 %v251_v32, 264  ;;  %253 = vbcast.lane.b32.xlu0 %v251_v32, 256  ;;  %v1514_v32 = vunpack.c.l.s4 %v7202_v31 }
  0x6b   :  { %268 = vbcast.lane.b32.xlu1 %v262_v33, 264  ;;  %264 = vbcast.lane.b32.xlu0 %v262_v33, 256  ;;  %v427_v33 = vrot.slane %v7302_v53, %v7259_v9 }
  0x6f   :  { %279 = vbcast.lane.b32.xlu1 %v273_v34, 264  ;;  %275 = vbcast.lane.b32.xlu0 %v273_v34, 256 }
  0x73   :  { %290 = vbcast.lane.b32.xlu1 %v284_v35, 264  ;;  %286 = vbcast.lane.b32.xlu0 %v284_v35, 256 }
  0x77   :  { %301 = vbcast.lane.b32.xlu1 %v295_v36, 264  ;;  %297 = vbcast.lane.b32.xlu0 %v295_v36, 256 }
  0x7b   :  { %312 = vbcast.lane.b32.xlu1 %v306_v38, 264  ;;  %308 = vbcast.lane.b32.xlu0 %v306_v38, 256  ;;  %v1515_v38 = vunpack.c.0.s8 %v1514_v32 }
  0x7f   :  { %323 = vbcast.lane.b32.xlu1 %v317_v39, 264  ;;  %319 = vbcast.lane.b32.xlu0 %v317_v39, 256  ;;  %v438_v39 = vrot.slane %v7302_v53, %v7263_v11 }
  0x83   :  { %334 = vbcast.lane.b32.xlu1 %v328_v40, 264  ;;  %330 = vbcast.lane.b32.xlu0 %v328_v40, 256 }
  0x87   :  { %345 = vbcast.lane.b32.xlu1 %v339_v41, 264  ;;  %341 = vbcast.lane.b32.xlu0 %v339_v41, 256 }
  0x8b   :  { %356 = vbcast.lane.b32.xlu1 %v350_v42, 264  ;;  %352 = vbcast.lane.b32.xlu0 %v350_v42, 256 }
  0x8d   :  { %v56_v44 = vpop.permute.xlu1 %55  ;;  %v45_v45 = vpop.permute.xlu0 %44 }
  0x8f   :  { %367 = vbcast.lane.b32.xlu1 %v361_v43, 264  ;;  %363 = vbcast.lane.b32.xlu0 %v361_v43, 256 }
  0x91   :  { %v60_v49 = vpop.permute.xlu1 %59  ;;  %v49_v50 = vpop.permute.xlu0 %48 }
  0x93   :  { %378 = vbcast.lane.b32.xlu1 %v372_v48, 264  ;;  %374 = vbcast.lane.b32.xlu0 %v372_v48, 256 }
  0x95   :  { %v71_v54 = vpop.permute.xlu1 %70  ;;  %v67_v55 = vpop.permute.xlu0 %66 }
  0x96   :  { %v1719_v57 = vcombine.low %v49_v50, %v71_v54  ;;  %v1720_v58 = vcombine.high %v49_v50, %v71_v54  ;;  %v1447_v60 = vcombine.low %v45_v45, %v67_v55  ;;  %v1448_v61 = vcombine.high %v45_v45, %v67_v55 }
  0x97   :  { %389 = vbcast.lane.b32.xlu1 %v383_v52, 264  ;;  %385 = vbcast.lane.b32.xlu0 %v383_v52, 256  ;;  %v7356_v50 = vsub.s32 %v1515_v38, %v7244_v1  ;;  %v449_v52 = vrot.slane %v7302_v53, %v7267_v13 }
  0x98   :  { %v7310_v8 = vrot.slane %v1719_v57, %v7305_v56  ;;  %v7313_v10 = vrot.slane %v1720_v58, %v7305_v56  ;;  %v7330_v20 = vrot.slane %v1447_v60, %v7305_v56  ;;  %v7333_v21 = vrot.slane %v1448_v61, %v7305_v56 }
  0x99   :  { %v82_v62 = vpop.permute.xlu1 %81  ;;  %v78_v63 = vpop.permute.xlu0 %77 }
  0x9a   :  { %v1735_v0 = vcombine.low %v60_v49, %v82_v62  ;;  %v1736_v4 = vcombine.high %v60_v49, %v82_v62  ;;  %v1463_v5 = vcombine.low %v56_v44, %v78_v63  ;;  %v1464_v6 = vcombine.high %v56_v44, %v78_v63  ;;  %11791 = vst [vmem:[#allocation8_spill] sm:$0xff] %v7310_v8 }
  0x9b   :  { %11792 = vst [vmem:[#allocation9_spill] sm:$0xff] %v7313_v10  ;;  %400 = vbcast.lane.b32.xlu1 %v394_v59, 264  ;;  %396 = vbcast.lane.b32.xlu0 %v394_v59, 256  ;;  %11796 = vst [vmem:[#allocation13_spill] sm:$0xff] %v7333_v21 }
  0x9c   :  { %v7318_v14 = vrot.slane %v1735_v0, %v7305_v56  ;;  %v7321_v16 = vrot.slane %v1736_v4, %v7305_v56  ;;  %v7324_v18 = vrot.slane %v1463_v5, %v7305_v56  ;;  %v7327_v19 = vrot.slane %v1464_v6, %v7305_v56 }
  0x9d   :  { %v93_v22 = vpop.permute.xlu1 %92  ;;  %v89_v23 = vpop.permute.xlu0 %88  ;;  %v460_v6 = vrot.slane %v7302_v53, %v7271_v15 }
  0x9e   :  { %11793 = vst [vmem:[#allocation10_spill] sm:$0xff] %v7318_v14  ;;  %11794 = vst [vmem:[#allocation11_spill] sm:$0xff] %v7321_v16  ;;  %v1784_v24 = vcombine.high %v7310_v8, %v7318_v14  ;;  %v1800_v25 = vcombine.high %v7313_v10, %v7321_v16  ;;  %v1512_v26 = vcombine.high %v7330_v20, %v7324_v18 }
  0x9f   :  { %11795 = vst [vmem:[#allocation12_spill] sm:$0xff] %v7327_v19  ;;  %v1528_v27 = vcombine.high %v7333_v21, %v7327_v19  ;;  %411 = vbcast.lane.b32.xlu1 %v405_v12, 264  ;;  %407 = vbcast.lane.b32.xlu0 %v405_v12, 256  ;;  %v1511_v51 = vcombine.low %v7330_v20, %v7324_v18 }
  0xa0   :  { %v7388_v18 = vrot.slane %v1784_v24, %v7356_v50 }
  0xa1   :  { %v104_v29 = vpop.permute.xlu1 %103  ;;  %v100_v30 = vpop.permute.xlu0 %99  ;;  %v7385_v12 = vrot.slane %v1511_v51, %v7356_v50  ;;  %v7406_v24 = vrot.slane %v1528_v27, %v7356_v50 }
  0xa2   :  { %11804 = vst [vmem:[#allocation21_spill] sm:$0xff] %v7388_v18 }
  0xa3   :  { %422 = vbcast.lane.b32.xlu1 %v416_v28, 264  ;;  %418 = vbcast.lane.b32.xlu0 %v416_v28, 256  ;;  %11803 = vst [vmem:[#allocation20_spill] sm:$0xff] %v7385_v12  ;;  %11808 = vst [vmem:[#allocation25_spill] sm:$0xff] %v7406_v24 }
  0xa5   :  { %v115_v34 = vpop.permute.xlu1 %114  ;;  %v111_v35 = vpop.permute.xlu0 %110 }
  0xa6   :  { %v1751_v36 = vcombine.low %v93_v22, %v115_v34  ;;  %v1752_v37 = vcombine.high %v93_v22, %v115_v34  ;;  %v1479_v42 = vcombine.low %v89_v23, %v111_v35  ;;  %v1480_v43 = vcombine.high %v89_v23, %v111_v35 }
  0xa7   :  { %433 = vbcast.lane.b32.xlu1 %v427_v33, 264  ;;  %429 = vbcast.lane.b32.xlu0 %v427_v33, 256  ;;  %v471_v33 = vrot.slane %v7302_v53, %v7275_v17 }
  0xa8   :  { %v7350_v40 = vrot.slane %v1751_v36, %v7305_v56  ;;  %v7353_v41 = vrot.slane %v1752_v37, %v7305_v56  ;;  %v1487_v1 = vrot.slane %v1479_v42, %v7305_v56  ;;  %v7374_v59 = vrot.slane %v1480_v43, %v7305_v56  ;;  %v7418_v36 = vld [vmem:[#allocation2 + $0x28] sm:$0xff] }
  0xa9   :  { %v126_v44 = vpop.permute.xlu1 %125  ;;  %v122_v45 = vpop.permute.xlu0 %121  ;;  %v7430_v42 = vrot.slane %v1800_v25, %v7356_v50  ;;  %v526_v34 = vrot.slane %v7418_v36, %v7263_v11 }
  0xaa   :  { %11797 = vst [vmem:[#allocation14_spill] sm:$0xff] %v7350_v40  ;;  %11798 = vst [vmem:[#allocation15_spill] sm:$0xff] %v7353_v41  ;;  %v1767_v46 = vcombine.low %v104_v29, %v126_v44  ;;  %v1768_v47 = vcombine.high %v104_v29, %v126_v44  ;;  %v1495_v48 = vcombine.low %v100_v30, %v122_v45 }
  0xab   :  { %v1496_v49 = vcombine.high %v100_v30, %v122_v45  ;;  %444 = vbcast.lane.b32.xlu1 %v438_v39, 264  ;;  %440 = vbcast.lane.b32.xlu0 %v438_v39, 256  ;;  %11802 = vst [vmem:[#allocation19_spill] sm:$0xff] %v7374_v59  ;;  %v7397_v29 = vrot.slane %v1512_v26, %v7356_v50  ;;  %11809 = vst [vmem:[#allocation26_spill] sm:$0xff] %v7430_v42 }
  0xac   :  { %v7363_v54 = vrot.slane %v1767_v46, %v7305_v56  ;;  %v7366_v55 = vrot.slane %v1768_v47, %v7305_v56  ;;  %v1503_v57 = vrot.slane %v1495_v48, %v7305_v56  ;;  %v482_v46 = vrot.slane %v7418_v36, %v7250_v3 }
  0xad   :  { %v7370_v58 = vrot.slane %v1496_v49, %v7305_v56  ;;  %v137_v60 = vpop.permute.xlu1 %136  ;;  %v133_v61 = vpop.permute.xlu0 %132 }
  0xae   :  { %11799 = vst [vmem:[#allocation16_spill] sm:$0xff] %v7363_v54  ;;  %11800 = vst [vmem:[#allocation17_spill] sm:$0xff] %v7366_v55  ;;  %v1816_v62 = vcombine.high %v7350_v40, %v7363_v54  ;;  %v1832_v63 = vcombine.high %v7353_v41, %v7366_v55  ;;  %v1543_v0 = vcombine.low %v1487_v1, %v1503_v57 }
  0xaf   :  { %11801 = vst [vmem:[#allocation18_spill] sm:$0xff] %v7370_v58  ;;  %v1544_v4 = vcombine.high %v1487_v1, %v1503_v57  ;;  %v1560_v5 = vcombine.high %v7374_v59, %v7370_v58  ;;  %455 = vbcast.lane.b32.xlu1 %v449_v52, 264  ;;  %451 = vbcast.lane.b32.xlu0 %v449_v52, 256 }
  0xb0   :  { %v7391_v20 = vrot.slane %v1816_v62, %v7356_v50  ;;  %v7394_v28 = vrot.slane %v1543_v0, %v7356_v50  ;;  %v7433_v43 = vrot.slane %v1832_v63, %v7356_v50 }
  0xb1   :  { %v148_v22 = vpop.permute.xlu1 %147  ;;  %v144_v23 = vpop.permute.xlu0 %143  ;;  %v7400_v30 = vrot.slane %v1544_v4, %v7356_v50  ;;  %v7403_v31 = vrot.slane %v1560_v5, %v7356_v50  ;;  %v493_v4 = vrot.slane %v7418_v36, %v7247_v2 }
  0xb2   :  { %11805 = vst [vmem:[#allocation22_spill] sm:$0xff] %v7391_v20  ;;  %11806 = vst [vmem:[#allocation23_spill] sm:$0xff] %v7394_v28 }
  0xb3   :  { %11807 = vst [vmem:[#allocation24_spill] sm:$0xff] %v7403_v31  ;;  %466 = vbcast.lane.b32.xlu1 %v460_v6, 264  ;;  %462 = vbcast.lane.b32.xlu0 %v460_v6, 256  ;;  %11810 = vst [vmem:[#allocation27_spill] sm:$0xff] %v7433_v43 }
  0xb5   :  { %v159_v38 = vpop.permute.xlu1 %158  ;;  %v155_v53 = vpop.permute.xlu0 %154 }
  0xb6   :  { %v1855_v44 = vcombine.low %v137_v60, %v159_v38  ;;  %v1856_v45 = vcombine.high %v137_v60, %v159_v38  ;;  %v1583_v51 = vcombine.low %v133_v61, %v155_v53  ;;  %v1584_v52 = vcombine.high %v133_v61, %v155_v53 }
  0xb7   :  { %477 = vbcast.lane.b32.xlu1 %v471_v33, 264  ;;  %473 = vbcast.lane.b32.xlu0 %v471_v33, 256 }
  0xb8   :  { %v7442_v49 = vrot.slane %v1855_v44, %v7305_v56  ;;  %v7445_v25 = vrot.slane %v1856_v45, %v7305_v56 }
  0xb9   :  { %v170_v57 = vpop.permute.xlu1 %169  ;;  %v166_v1 = vpop.permute.xlu0 %165 }
  0xba   :  { %11811 = vst [vmem:[#allocation28_spill] sm:$0xff] %v7442_v49  ;;  %11812 = vst [vmem:[#allocation29_spill] sm:$0xff] %v7445_v25  ;;  %v1871_v60 = vcombine.low %v148_v22, %v170_v57  ;;  %v1872_v62 = vcombine.high %v148_v22, %v170_v57  ;;  %v1599_v63 = vcombine.low %v144_v23, %v166_v1 }
  0xbb   :  { %v1600_v0 = vcombine.high %v144_v23, %v166_v1  ;;  %488 = vbcast.lane.b32.xlu1 %v482_v46, 264  ;;  %484 = vbcast.lane.b32.xlu0 %v482_v46, 256  ;;  %v1591_v22 = vrot.slane %v1583_v51, %v7305_v56  ;;  %v7463_v23 = vrot.slane %v1584_v52, %v7305_v56 }
  0xbc   :  { %v7450_v5 = vrot.slane %v1871_v60, %v7305_v56  ;;  %v7453_v6 = vrot.slane %v1872_v62, %v7305_v56  ;;  %v7456_v33 = vrot.slane %v1599_v63, %v7305_v56  ;;  %v504_v46 = vrot.slane %v7418_v36, %v7255_v7 }
  0xbd   :  { %v7459_v61 = vrot.slane %v1600_v0, %v7305_v56  ;;  %11816 = vst [vmem:[#allocation33_spill] sm:$0xff] %v7463_v23  ;;  %v181_v38 = vpop.permute.xlu1 %180  ;;  %v177_v53 = vpop.permute.xlu0 %176  ;;  %v515_v60 = vrot.slane %v7418_v36, %v7259_v9 }
  0xbe   :  { %11813 = vst [vmem:[#allocation30_spill] sm:$0xff] %v7450_v5  ;;  %11814 = vst [vmem:[#allocation31_spill] sm:$0xff] %v7453_v6  ;;  %v1920_v44 = vcombine.high %v7442_v49, %v7450_v5  ;;  %v1648_v57 = vcombine.high %v1591_v22, %v7456_v33 }
  0xbf   :  { %11815 = vst [vmem:[#allocation32_spill] sm:$0xff] %v7459_v61  ;;  %v1664_v1 = vcombine.high %v7463_v23, %v7459_v61  ;;  %499 = vbcast.lane.b32.xlu1 %v493_v4, 264  ;;  %495 = vbcast.lane.b32.xlu0 %v493_v4, 256 }
  0xc1   :  { %v192_v51 = vpop.permute.xlu1 %191  ;;  %v188_v52 = vpop.permute.xlu0 %187 }
  0xc3   :  { %510 = vbcast.lane.b32.xlu1 %v504_v46, 264  ;;  %506 = vbcast.lane.b32.xlu0 %v504_v46, 256 }
  0xc5   :  { %v203_v62 = vpop.permute.xlu1 %202  ;;  %v199_v63 = vpop.permute.xlu0 %198 }
  0xc6   :  { %v1887_v0 = vcombine.low %v181_v38, %v203_v62  ;;  %v1888_v48 = vcombine.high %v181_v38, %v203_v62  ;;  %v1615_v39 = vcombine.low %v177_v53, %v199_v63  ;;  %v1616_v32 = vcombine.high %v177_v53, %v199_v63 }
  0xc7   :  { %521 = vbcast.lane.b32.xlu1 %v515_v60, 264  ;;  %517 = vbcast.lane.b32.xlu0 %v515_v60, 256  ;;  %v1647_v38 = vcombine.low %v1591_v22, %v7456_v33  ;;  %v537_v60 = vrot.slane %v7418_v36, %v7267_v13 }
  0xc8   :  { %v7479_v47 = vrot.slane %v1887_v0, %v7305_v56  ;;  %v7482_v4 = vrot.slane %v1888_v48, %v7305_v56 }
  0xc9   :  { %v214_v37 = vpop.permute.xlu1 %213  ;;  %v210_v27 = vpop.permute.xlu0 %209 }
  0xca   :  { %11817 = vst [vmem:[#allocation34_spill] sm:$0xff] %v7479_v47  ;;  %11818 = vst [vmem:[#allocation35_spill] sm:$0xff] %v7482_v4  ;;  %v1903_v46 = vcombine.low %v192_v51, %v214_v37  ;;  %v1904_v35 = vcombine.high %v192_v51, %v214_v37  ;;  %v1631_v26 = vcombine.low %v188_v52, %v210_v27 }
  0xcb   :  { %v1632_v45 = vcombine.high %v188_v52, %v210_v27  ;;  %532 = vbcast.lane.b32.xlu1 %v526_v34, 264  ;;  %528 = vbcast.lane.b32.xlu0 %v526_v34, 256  ;;  %v1623_v27 = vrot.slane %v1615_v39, %v7305_v56  ;;  %v7499_v37 = vrot.slane %v1616_v32, %v7305_v56 }
  0xcc   :  { %v7488_v62 = vrot.slane %v1903_v46, %v7305_v56  ;;  %v7491_v48 = vrot.slane %v1904_v35, %v7305_v56  ;;  %v1639_v53 = vrot.slane %v1631_v26, %v7305_v56  ;;  %v7506_v52 = vrot.slane %v1920_v44, %v7356_v50 }
  0xcd   :  { %v7495_v63 = vrot.slane %v1632_v45, %v7305_v56  ;;  %11822 = vst [vmem:[#allocation39_spill] sm:$0xff] %v7499_v37  ;;  %v225_v33 = vpop.permute.xlu1 %224  ;;  %v221_v22 = vpop.permute.xlu0 %220  ;;  %v548_v32 = vrot.slane %v7418_v36, %v7271_v15  ;;  %v7513_v39 = vrot.slane %v1647_v38, %v7356_v50  ;;  %v559_v38 = vrot.slane %v7418_v36, %v7275_v17 }
  0xce   :  { %11819 = vst [vmem:[#allocation36_spill] sm:$0xff] %v7488_v62  ;;  %11820 = vst [vmem:[#allocation37_spill] sm:$0xff] %v7491_v48  ;;  %v1952_v51 = vcombine.high %v7479_v47, %v7488_v62  ;;  %v1968_v35 = vcombine.high %v7482_v4, %v7491_v48  ;;  %v1679_v26 = vcombine.low %v1623_v27, %v1639_v53 }
  0xcf   :  { %11821 = vst [vmem:[#allocation38_spill] sm:$0xff] %v7495_v63  ;;  %11823 = vst [vmem:[#allocation40_spill] sm:$0xff] %v7506_v52  ;;  %v1680_v45 = vcombine.high %v1623_v27, %v1639_v53  ;;  %v1696_v34 = vcombine.high %v7499_v37, %v7495_v63  ;;  %543 = vbcast.lane.b32.xlu1 %v537_v60, 264  ;;  %539 = vbcast.lane.b32.xlu0 %v537_v60, 256 }
  0xd0   :  { %11824 = vst [vmem:[#allocation41_spill] sm:$0xff] %v7513_v39  ;;  %v7516_v0 = vrot.slane %v1952_v51, %v7356_v50  ;;  %v7519_v44 = vrot.slane %v1679_v26, %v7356_v50  ;;  %v7522_v53 = vrot.slane %v1648_v57, %v7356_v50  ;;  %v7533_v60 = vrot.slane %v1664_v1, %v7356_v50  ;;  %v7549_v1 = vld [vmem:[#allocation2 + $0x30] sm:$0xff] }
  0xd1   :  { %v236_v46 = vpop.permute.xlu1 %235  ;;  %v232_v43 = vpop.permute.xlu0 %231  ;;  %v7525_v27 = vrot.slane %v1680_v45, %v7356_v50  ;;  %v7528_v42 = vrot.slane %v1696_v34, %v7356_v50  ;;  %v11831_v36 = vcombine.high %v7445_v25, %v7453_v6  ;;  %v7558_v48 = vrot.slane %v1968_v35, %v7356_v50 }
  0xd2   :  { %11825 = vst [vmem:[#allocation42_spill] sm:$0xff] %v7516_v0  ;;  %11826 = vst [vmem:[#allocation43_spill] sm:$0xff] %v7519_v44  ;;  %v581_v51 = vrot.slane %v7549_v1, %v7247_v2  ;;  %v614_v52 = vrot.slane %v7549_v1, %v7263_v11 }
  0xd3   :  { %11827 = vst [vmem:[#allocation44_spill] sm:$0xff] %v7522_v53  ;;  %11828 = vst [vmem:[#allocation45_spill] sm:$0xff] %v7525_v27  ;;  %554 = vbcast.lane.b32.xlu1 %v548_v32, 264  ;;  %v7547_v34 = vrot.slane %v11831_v36, %v7356_v50  ;;  %550 = vbcast.lane.b32.xlu0 %v548_v32, 256  ;;  %v570_v32 = vrot.slane %v7549_v1, %v7250_v3 }
  0xd4   :  { %11829 = vst [vmem:[#allocation46_spill] sm:$0xff] %v7528_v42  ;;  %11830 = vst [vmem:[#allocation47_spill] sm:$0xff] %v7533_v60 }
  0xd5   :  { %11832 = vst [vmem:[#allocation48_spill] sm:$0xff] %v7547_v34  ;;  %v247_v4 = vpop.permute.xlu1 %246  ;;  %v243_v26 = vpop.permute.xlu0 %242  ;;  %11833 = vst [vmem:[#allocation49_spill] sm:$0xff] %v7558_v48 }
  0xd6   :  { %v2263_v25 = vcombine.low %v225_v33, %v247_v4  ;;  %v2264_v36 = vcombine.high %v225_v33, %v247_v4  ;;  %v1991_v35 = vcombine.low %v221_v22, %v243_v26  ;;  %v1992_v10 = vcombine.high %v221_v22, %v243_v26 }
  0xd7   :  { %565 = vbcast.lane.b32.xlu1 %v559_v38, 264  ;;  %561 = vbcast.lane.b32.xlu0 %v559_v38, 256 }
  0xd8   :  { %v7567_v6 = vrot.slane %v2263_v25, %v7305_v56  ;;  %v7570_v45 = vrot.slane %v2264_v36, %v7305_v56 }
  0xd9   :  { %v258_v4 = vpop.permute.xlu1 %257  ;;  %v254_v33 = vpop.permute.xlu0 %253 }
  0xda   :  { %11834 = vst [vmem:[#allocation50_spill] sm:$0xff] %v7567_v6  ;;  %11835 = vst [vmem:[#allocation51_spill] sm:$0xff] %v7570_v45  ;;  %v2279_v16 = vcombine.low %v236_v46, %v258_v4  ;;  %v2280_v41 = vcombine.high %v236_v46, %v258_v4  ;;  %v2007_v55 = vcombine.low %v232_v43, %v254_v33 }
  0xdb   :  { %v2008_v0 = vcombine.high %v232_v43, %v254_v33  ;;  %576 = vbcast.lane.b32.xlu1 %v570_v32, 264  ;;  %572 = vbcast.lane.b32.xlu0 %v570_v32, 256  ;;  %v1999_v46 = vrot.slane %v1991_v35, %v7305_v56  ;;  %v7588_v43 = vrot.slane %v1992_v10, %v7305_v56 }
  0xdc   :  { %v7575_v38 = vrot.slane %v2279_v16, %v7305_v56  ;;  %v7578_v25 = vrot.slane %v2280_v41, %v7305_v56  ;;  %v7581_v36 = vrot.slane %v2007_v55, %v7305_v56  ;;  %v592_v32 = vrot.slane %v7549_v1, %v7255_v7 }
  0xdd   :  { %v7584_v22 = vrot.slane %v2008_v0, %v7305_v56  ;;  %11839 = vst [vmem:[#allocation55_spill] sm:$0xff] %v7588_v43  ;;  %v269_v26 = vpop.permute.xlu1 %268  ;;  %v265_v4 = vpop.permute.xlu0 %264  ;;  %v603_v33 = vrot.slane %v7549_v1, %v7259_v9 }
  0xde   :  { %11836 = vst [vmem:[#allocation52_spill] sm:$0xff] %v7575_v38  ;;  %11837 = vst [vmem:[#allocation53_spill] sm:$0xff] %v7578_v25  ;;  %v2328_v16 = vcombine.high %v7567_v6, %v7575_v38  ;;  %v2056_v55 = vcombine.high %v1999_v46, %v7581_v36 }
  0xdf   :  { %11838 = vst [vmem:[#allocation54_spill] sm:$0xff] %v7584_v22  ;;  %v2072_v0 = vcombine.high %v7588_v43, %v7584_v22  ;;  %587 = vbcast.lane.b32.xlu1 %v581_v51, 264  ;;  %583 = vbcast.lane.b32.xlu0 %v581_v51, 256 }
  0xe1   :  { %v280_v10 = vpop.permute.xlu1 %279  ;;  %v276_v35 = vpop.permute.xlu0 %275 }
  0xe3   :  { %598 = vbcast.lane.b32.xlu1 %v592_v32, 264  ;;  %594 = vbcast.lane.b32.xlu0 %v592_v32, 256 }
  0xe5   :  { %v291_v57 = vpop.permute.xlu1 %290  ;;  %v287_v48 = vpop.permute.xlu0 %286 }
  0xe6   :  { %v2295_v41 = vcombine.low %v269_v26, %v291_v57  ;;  %v2296_v34 = vcombine.high %v269_v26, %v291_v57  ;;  %v2023_v18 = vcombine.low %v265_v4, %v287_v48  ;;  %v2024_v47 = vcombine.high %v265_v4, %v287_v48 }
  0xe7   :  { %609 = vbcast.lane.b32.xlu1 %v603_v33, 264  ;;  %605 = vbcast.lane.b32.xlu0 %v603_v33, 256  ;;  %v2055_v57 = vcombine.low %v1999_v46, %v7581_v36  ;;  %v625_v26 = vrot.slane %v7549_v1, %v7267_v13 }
  0xe8   :  { %v7604_v20 = vrot.slane %v2295_v41, %v7305_v56  ;;  %v7607_v51 = vrot.slane %v2296_v34, %v7305_v56 }
  0xe9   :  { %v302_v62 = vpop.permute.xlu1 %301  ;;  %v298_v49 = vpop.permute.xlu0 %297 }
  0xea   :  { %11840 = vst [vmem:[#allocation56_spill] sm:$0xff] %v7604_v20  ;;  %11841 = vst [vmem:[#allocation57_spill] sm:$0xff] %v7607_v51  ;;  %v2311_v32 = vcombine.low %v280_v10, %v302_v62  ;;  %v2312_v5 = vcombine.high %v280_v10, %v302_v62  ;;  %v2039_v6 = vcombine.low %v276_v35, %v298_v49 }
  0xeb   :  { %v2040_v38 = vcombine.high %v276_v35, %v298_v49  ;;  %620 = vbcast.lane.b32.xlu1 %v614_v52, 264  ;;  %616 = vbcast.lane.b32.xlu0 %v614_v52, 256  ;;  %v2031_v49 = vrot.slane %v2023_v18, %v7305_v56  ;;  %v7624_v62 = vrot.slane %v2024_v47, %v7305_v56 }
  0xec   :  { %v7613_v41 = vrot.slane %v2311_v32, %v7305_v56  ;;  %v7616_v34 = vrot.slane %v2312_v5, %v7305_v56  ;;  %v2047_v48 = vrot.slane %v2039_v6, %v7305_v56  ;;  %v7631_v35 = vrot.slane %v2328_v16, %v7356_v50 }
  0xed   :  { %v7620_v4 = vrot.slane %v2040_v38, %v7305_v56  ;;  %11845 = vst [vmem:[#allocation61_spill] sm:$0xff] %v7624_v62  ;;  %v313_v36 = vpop.permute.xlu1 %312  ;;  %v309_v46 = vpop.permute.xlu0 %308  ;;  %v636_v18 = vrot.slane %v7549_v1, %v7271_v15  ;;  %v7638_v47 = vrot.slane %v2055_v57, %v7356_v50  ;;  %v647_v57 = vrot.slane %v7549_v1, %v7275_v17 }
  0xee   :  { %11842 = vst [vmem:[#allocation58_spill] sm:$0xff] %v7613_v41  ;;  %11843 = vst [vmem:[#allocation59_spill] sm:$0xff] %v7616_v34  ;;  %v2360_v10 = vcombine.high %v7604_v20, %v7613_v41  ;;  %v2376_v5 = vcombine.high %v7607_v51, %v7616_v34  ;;  %v2087_v6 = vcombine.low %v2031_v49, %v2047_v48 }
  0xef   :  { %11844 = vst [vmem:[#allocation60_spill] sm:$0xff] %v7620_v4  ;;  %11846 = vst [vmem:[#allocation62_spill] sm:$0xff] %v7631_v35  ;;  %v2088_v38 = vcombine.high %v2031_v49, %v2047_v48  ;;  %v2104_v52 = vcombine.high %v7624_v62, %v7620_v4  ;;  %631 = vbcast.lane.b32.xlu1 %v625_v26, 264  ;;  %627 = vbcast.lane.b32.xlu0 %v625_v26, 256 }
  0xf0   :  { %11847 = vst [vmem:[#allocation63_spill] sm:$0xff] %v7638_v47  ;;  %v7641_v33 = vrot.slane %v2360_v10, %v7356_v50  ;;  %v7644_v16 = vrot.slane %v2087_v6, %v7356_v50  ;;  %v7647_v48 = vrot.slane %v2056_v55, %v7356_v50  ;;  %v7658_v26 = vrot.slane %v2072_v0, %v7356_v50  ;;  %v7674_v0 = vld [vmem:[#allocation2 + $0x38] sm:$0xff] }
  0xf1   :  { %v324_v32 = vpop.permute.xlu1 %323  ;;  %v320_v51 = vpop.permute.xlu0 %319  ;;  %v7650_v49 = vrot.slane %v2088_v38, %v7356_v50  ;;  %v7653_v34 = vrot.slane %v2104_v52, %v7356_v50  ;;  %v11852_v1 = vcombine.high %v7570_v45, %v7578_v25  ;;  %v7683_v41 = vrot.slane %v2376_v5, %v7356_v50 }
  0xf2   :  { %11848 = vst [vmem:[#allocation64_spill] sm:$0xff] %v7641_v33  ;;  %11849 = vst [vmem:[#allocation65_spill] sm:$0xff] %v7644_v16  ;;  %v669_v10 = vrot.slane %v7674_v0, %v7247_v2 }
  0xf3   :  { %11850 = vst [vmem:[#allocation66_spill] sm:$0xff] %v7653_v34  ;;  %11851 = vst [vmem:[#allocation67_spill] sm:$0xff] %v7658_v26  ;;  %642 = vbcast.lane.b32.xlu1 %v636_v18, 264  ;;  %v7672_v52 = vrot.slane %v11852_v1, %v7356_v50  ;;  %638 = vbcast.lane.b32.xlu0 %v636_v18, 256  ;;  %v658_v18 = vrot.slane %v7674_v0, %v7250_v3 }
  0xf4   :  { %11854 = vst [vmem:[#allocation69_spill] sm:$0xff] %v7683_v41 }
  0xf5   :  { %11853 = vst [vmem:[#allocation68_spill] sm:$0xff] %v7672_v52  ;;  %v335_v20 = vpop.permute.xlu1 %334  ;;  %v331_v6 = vpop.permute.xlu0 %330 }
  0xf6   :  { %v2399_v45 = vcombine.low %v313_v36, %v335_v20  ;;  %v2400_v1 = vcombine.high %v313_v36, %v335_v20  ;;  %v2127_v5 = vcombine.low %v309_v46, %v331_v6  ;;  %v2128_v33 = vcombine.high %v309_v46, %v331_v6 }
  0xf7   :  { %653 = vbcast.lane.b32.xlu1 %v647_v57, 264  ;;  %649 = vbcast.lane.b32.xlu0 %v647_v57, 256 }
  0xf8   :  { %v7692_v25 = vrot.slane %v2399_v45, %v7305_v56  ;;  %v7695_v38 = vrot.slane %v2400_v1, %v7305_v56 }
  0xf9   :  { %v346_v20 = vpop.permute.xlu1 %345  ;;  %v342_v36 = vpop.permute.xlu0 %341 }
  0xfa   :  { %11855 = vst [vmem:[#allocation70_spill] sm:$0xff] %v7692_v25  ;;  %11856 = vst [vmem:[#allocation71_spill] sm:$0xff] %v7695_v38  ;;  %v2415_v35 = vcombine.low %v324_v32, %v346_v20  ;;  %v2416_v8 = vcombine.high %v324_v32, %v346_v20  ;;  %v2143_v14 = vcombine.low %v320_v51, %v342_v36 }
  0xfb   :  { %v2144_v40 = vcombine.high %v320_v51, %v342_v36  ;;  %664 = vbcast.lane.b32.xlu1 %v658_v18, 264  ;;  %660 = vbcast.lane.b32.xlu0 %v658_v18, 256  ;;  %v2135_v32 = vrot.slane %v2127_v5, %v7305_v56  ;;  %v7711_v51 = vrot.slane %v2128_v33, %v7305_v56 }
  0xfc   :  { %v7700_v57 = vrot.slane %v2415_v35, %v7305_v56  ;;  %v7703_v45 = vrot.slane %v2416_v8, %v7305_v56  ;;  %v2151_v1 = vrot.slane %v2143_v14, %v7305_v56  ;;  %v691_v5 = vrot.slane %v7674_v0, %v7259_v9 }
  0xfd   :  { %v7707_v46 = vrot.slane %v2144_v40, %v7305_v56  ;;  %11860 = vst [vmem:[#allocation75_spill] sm:$0xff] %v7711_v51  ;;  %v357_v6 = vpop.permute.xlu1 %356  ;;  %v353_v20 = vpop.permute.xlu0 %352  ;;  %v680_v40 = vrot.slane %v7674_v0, %v7255_v7 }
  0xfe   :  { %11857 = vst [vmem:[#allocation72_spill] sm:$0xff] %v7700_v57  ;;  %11858 = vst [vmem:[#allocation73_spill] sm:$0xff] %v7703_v45  ;;  %v2464_v35 = vcombine.high %v7692_v25, %v7700_v57  ;;  %v2192_v36 = vcombine.high %v2135_v32, %v2151_v1  ;;  %v702_v25 = vrot.slane %v7674_v0, %v7263_v11 }
  0xff   :  { %11859 = vst [vmem:[#allocation74_spill] sm:$0xff] %v7707_v46  ;;  %v2208_v14 = vcombine.high %v7711_v51, %v7707_v46  ;;  %675 = vbcast.lane.b32.xlu1 %v669_v10, 264  ;;  %671 = vbcast.lane.b32.xlu0 %v669_v10, 256 }
 0x101   :  { %v368_v18 = vpop.permute.xlu1 %367  ;;  %v364_v33 = vpop.permute.xlu0 %363 }
 0x103   :  { %686 = vbcast.lane.b32.xlu1 %v680_v40, 264  ;;  %682 = vbcast.lane.b32.xlu0 %v680_v40, 256 }
 0x105   :  { %v379_v55 = vpop.permute.xlu1 %378  ;;  %v375_v41 = vpop.permute.xlu0 %374 }
 0x106   :  { %v2431_v52 = vcombine.low %v357_v6, %v379_v55  ;;  %v2432_v8 = vcombine.high %v357_v6, %v379_v55  ;;  %v2159_v54 = vcombine.low %v353_v20, %v375_v41  ;;  %v2160_v42 = vcombine.high %v353_v20, %v375_v41 }
 0x107   :  { %697 = vbcast.lane.b32.xlu1 %v691_v5, 264  ;;  %693 = vbcast.lane.b32.xlu0 %v691_v5, 256  ;;  %v2191_v55 = vcombine.low %v2135_v32, %v2151_v1  ;;  %v713_v6 = vrot.slane %v7674_v0, %v7267_v13 }
 0x108   :  { %v7726_v57 = vrot.slane %v2431_v52, %v7305_v56  ;;  %v7729_v10 = vrot.slane %v2432_v8, %v7305_v56 }
 0x109   :  { %v390_v60 = vpop.permute.xlu1 %389  ;;  %v386_v34 = vpop.permute.xlu0 %385 }
 0x10a   :  { %11861 = vst [vmem:[#allocation76_spill] sm:$0xff] %v7726_v57  ;;  %11862 = vst [vmem:[#allocation77_spill] sm:$0xff] %v7729_v10  ;;  %v2447_v40 = vcombine.low %v368_v18, %v390_v60  ;;  %v2448_v26 = vcombine.high %v368_v18, %v390_v60  ;;  %v2175_v31 = vcombine.low %v364_v33, %v386_v34 }
 0x10b   :  { %v2176_v24 = vcombine.high %v364_v33, %v386_v34  ;;  %708 = vbcast.lane.b32.xlu1 %v702_v25, 264  ;;  %704 = vbcast.lane.b32.xlu0 %v702_v25, 256  ;;  %v2167_v60 = vrot.slane %v2159_v54, %v7305_v56  ;;  %v7745_v34 = vrot.slane %v2160_v42, %v7305_v56 }
 0x10c   :  { %v7734_v5 = vrot.slane %v2447_v40, %v7305_v56  ;;  %v7737_v52 = vrot.slane %v2448_v26, %v7305_v56  ;;  %v2183_v8 = vrot.slane %v2175_v31, %v7305_v56  ;;  %v7752_v18 = vrot.slane %v2464_v35, %v7356_v50 }
 0x10d   :  { %v7741_v41 = vrot.slane %v2176_v24, %v7305_v56  ;;  %11866 = vst [vmem:[#allocation81_spill] sm:$0xff] %v7745_v34  ;;  %v401_v1 = vpop.permute.xlu1 %400  ;;  %v397_v32 = vpop.permute.xlu0 %396  ;;  %v724_v54 = vrot.slane %v7674_v0, %v7271_v15  ;;  %v7759_v42 = vrot.slane %v2191_v55, %v7356_v50  ;;  %v735_v55 = vrot.slane %v7674_v0, %v7275_v17 }
 0x10e   :  { %11863 = vst [vmem:[#allocation78_spill] sm:$0xff] %v7734_v5  ;;  %11864 = vst [vmem:[#allocation79_spill] sm:$0xff] %v7737_v52  ;;  %v2496_v20 = vcombine.high %v7726_v57, %v7734_v5  ;;  %v2512_v26 = vcombine.high %v7729_v10, %v7737_v52  ;;  %v2223_v31 = vcombine.low %v2167_v60, %v2183_v8 }
 0x10f   :  { %11865 = vst [vmem:[#allocation80_spill] sm:$0xff] %v7741_v41  ;;  %11867 = vst [vmem:[#allocation82_spill] sm:$0xff] %v7752_v18  ;;  %v2224_v24 = vcombine.high %v2167_v60, %v2183_v8  ;;  %v2240_v25 = vcombine.high %v7745_v34, %v7741_v41  ;;  %719 = vbcast.lane.b32.xlu1 %v713_v6, 264  ;;  %715 = vbcast.lane.b32.xlu0 %v713_v6, 256 }
 0x110   :  { %11868 = vst [vmem:[#allocation83_spill] sm:$0xff] %v7759_v42  ;;  %v7762_v33 = vrot.slane %v2496_v20, %v7356_v50  ;;  %v7765_v35 = vrot.slane %v2223_v31, %v7356_v50  ;;  %v7768_v8 = vrot.slane %v2192_v36, %v7356_v50  ;;  %v7779_v20 = vrot.slane %v2208_v14, %v7356_v50  ;;  %v7795_v14 = vld [vmem:[#allocation2 + $0x40] sm:$0xff] }
 0x111   :  { %v412_v40 = vpop.permute.xlu1 %411  ;;  %v7771_v60 = vrot.slane %v2224_v24, %v7356_v50  ;;  %v7774_v10 = vrot.slane %v2240_v25, %v7356_v50  ;;  %v408_v6 = vpop.permute.xlu0 %407  ;;  %v11875_v0 = vcombine.high %v7695_v38, %v7703_v45  ;;  %v7804_v25 = vrot.slane %v2512_v26, %v7356_v50 }
 0x112   :  { %11869 = vst [vmem:[#allocation84_spill] sm:$0xff] %v7762_v33  ;;  %11870 = vst [vmem:[#allocation85_spill] sm:$0xff] %v7765_v35  ;;  %v757_v31 = vrot.slane %v7795_v14, %v7247_v2 }
 0x113   :  { %11871 = vst [vmem:[#allocation86_spill] sm:$0xff] %v7768_v8  ;;  %11872 = vst [vmem:[#allocation87_spill] sm:$0xff] %v7771_v60  ;;  %730 = vbcast.lane.b32.xlu1 %v724_v54, 264  ;;  %v7793_v52 = vrot.slane %v11875_v0, %v7356_v50  ;;  %726 = vbcast.lane.b32.xlu0 %v724_v54, 256  ;;  %v746_v54 = vrot.slane %v7795_v14, %v7250_v3 }
 0x114   :  { %11873 = vst [vmem:[#allocation88_spill] sm:$0xff] %v7774_v10  ;;  %11874 = vst [vmem:[#allocation89_spill] sm:$0xff] %v7779_v20 }
 0x115   :  { %11876 = vst [vmem:[#allocation90_spill] sm:$0xff] %v7793_v52  ;;  %v423_v57 = vpop.permute.xlu1 %422  ;;  %11877 = vst [vmem:[#allocation91_spill] sm:$0xff] %v7804_v25  ;;  %v419_v0 = vpop.permute.xlu0 %418 }
 0x116   :  { %v2807_v5 = vcombine.low %v401_v1, %v423_v57  ;;  %v2808_v38 = vcombine.high %v401_v1, %v423_v57  ;;  %v2535_v45 = vcombine.low %v397_v32, %v419_v0  ;;  %v2536_v10 = vcombine.high %v397_v32, %v419_v0 }
 0x117   :  { %741 = vbcast.lane.b32.xlu1 %v735_v55, 264  ;;  %737 = vbcast.lane.b32.xlu0 %v735_v55, 256 }
 0x118   :  { %v7813_v26 = vrot.slane %v2807_v5, %v7305_v56  ;;  %v7816_v57 = vrot.slane %v2808_v38, %v7305_v56  ;;  %v2543_v5 = vrot.slane %v2535_v45, %v7305_v56  ;;  %v7828_v38 = vrot.slane %v2536_v10, %v7305_v56 }
 0x119   :  { %v434_v24 = vpop.permute.xlu1 %433  ;;  %v430_v18 = vpop.permute.xlu0 %429  ;;  %v768_v10 = vrot.slane %v7795_v14, %v7255_v7 }
 0x11a   :  { %11878 = vst [vmem:[#allocation92_spill] sm:$0xff] %v7813_v26  ;;  %11879 = vst [vmem:[#allocation93_spill] sm:$0xff] %v7816_v57  ;;  %v2823_v1 = vcombine.low %v412_v40, %v434_v24  ;;  %v2824_v33 = vcombine.high %v412_v40, %v434_v24  ;;  %v2551_v20 = vcombine.low %v408_v6, %v430_v18 }
 0x11b   :  { %v2552_v51 = vcombine.high %v408_v6, %v430_v18  ;;  %752 = vbcast.lane.b32.xlu1 %v746_v54, 264  ;;  %748 = vbcast.lane.b32.xlu0 %v746_v54, 256  ;;  %11882 = vst [vmem:[#allocation96_spill] sm:$0xff] %v7828_v38  ;;  %v779_v54 = vrot.slane %v7795_v14, %v7259_v9 }
 0x11c   :  { %v7821_v55 = vrot.slane %v2823_v1, %v7305_v56  ;;  %v7824_v32 = vrot.slane %v2824_v33, %v7305_v56  ;;  %v2559_v40 = vrot.slane %v2551_v20, %v7305_v56 }
 0x11d   :  { %v7832_v18 = vrot.slane %v2552_v51, %v7305_v56  ;;  %v445_v6 = vpop.permute.xlu1 %444  ;;  %v441_v33 = vpop.permute.xlu0 %440 }
 0x11e   :  { %11880 = vst [vmem:[#allocation94_spill] sm:$0xff] %v7821_v55  ;;  %11881 = vst [vmem:[#allocation95_spill] sm:$0xff] %v7824_v32  ;;  %v2872_v24 = vcombine.high %v7813_v26, %v7821_v55  ;;  %v2600_v1 = vcombine.high %v2543_v5, %v2559_v40  ;;  %v790_v26 = vrot.slane %v7795_v14, %v7263_v11 }
 0x11f   :  { %11883 = vst [vmem:[#allocation97_spill] sm:$0xff] %v7832_v18  ;;  %v2616_v45 = vcombine.high %v7828_v38, %v7832_v18  ;;  %763 = vbcast.lane.b32.xlu1 %v757_v31, 264  ;;  %759 = vbcast.lane.b32.xlu0 %v757_v31, 256  ;;  %v2599_v63 = vcombine.low %v2543_v5, %v2559_v40 }
 0x121   :  { %v456_v20 = vpop.permute.xlu1 %455  ;;  %v452_v51 = vpop.permute.xlu0 %451 }
 0x123   :  { %774 = vbcast.lane.b32.xlu1 %v768_v10, 264  ;;  %770 = vbcast.lane.b32.xlu0 %v768_v10, 256 }
 0x125   :  { %v467_v36 = vpop.permute.xlu1 %466  ;;  %v463_v52 = vpop.permute.xlu0 %462 }
 0x126   :  { %v2839_v25 = vcombine.low %v445_v6, %v467_v36  ;;  %v2840_v0 = vcombine.high %v445_v6, %v467_v36  ;;  %v2567_v55 = vcombine.low %v441_v33, %v463_v52  ;;  %v2568_v46 = vcombine.high %v441_v33, %v463_v52 }
 0x127   :  { %785 = vbcast.lane.b32.xlu1 %v779_v54, 264  ;;  %781 = vbcast.lane.b32.xlu0 %v779_v54, 256  ;;  %v801_v6 = vrot.slane %v7795_v14, %v7267_v13 }
 0x128   :  { %v7847_v31 = vrot.slane %v2839_v25, %v7305_v56  ;;  %v7850_v41 = vrot.slane %v2840_v0, %v7305_v56  ;;  %v2575_v25 = vrot.slane %v2567_v55, %v7305_v56  ;;  %v7862_v0 = vrot.slane %v2568_v46, %v7305_v56 }
 0x129   :  { %v478_v34 = vpop.permute.xlu1 %477  ;;  %v474_v61 = vpop.permute.xlu0 %473 }
 0x12a   :  { %11884 = vst [vmem:[#allocation98_spill] sm:$0xff] %v7847_v31  ;;  %11885 = vst [vmem:[#allocation99_spill] sm:$0xff] %v7850_v41  ;;  %v2855_v23 = vcombine.low %v456_v20, %v478_v34  ;;  %v2856_v10 = vcombine.high %v456_v20, %v478_v34  ;;  %v2583_v37 = vcombine.low %v452_v51, %v474_v61 }
 0x12b   :  { %v2584_v36 = vcombine.high %v452_v51, %v474_v61  ;;  %796 = vbcast.lane.b32.xlu1 %v790_v26, 264  ;;  %792 = vbcast.lane.b32.xlu0 %v790_v26, 256  ;;  %11888 = vst [vmem:[#allocation102_spill] sm:$0xff] %v7862_v0  ;;  %v7873_v26 = vrot.slane %v2872_v24, %v7356_v50 }
 0x12c   :  { %v7855_v54 = vrot.slane %v2855_v23, %v7305_v56  ;;  %v7858_v52 = vrot.slane %v2856_v10, %v7305_v56  ;;  %v2591_v34 = vrot.slane %v2583_v37, %v7305_v56  ;;  %v812_v37 = vrot.slane %v7795_v14, %v7271_v15 }
 0x12d   :  { %v7866_v61 = vrot.slane %v2584_v36, %v7305_v56  ;;  %v489_v33 = vpop.permute.xlu1 %488  ;;  %v485_v40 = vpop.permute.xlu0 %484  ;;  %11890 = vst [vmem:[#allocation104_spill] sm:$0xff] %v7873_v26  ;;  %v7880_v51 = vrot.slane %v2599_v63, %v7356_v50  ;;  %v823_v63 = vrot.slane %v7795_v14, %v7275_v17  ;;  %v11896_v14 = vcombine.high %v7816_v57, %v7824_v32 }
 0x12e   :  { %11886 = vst [vmem:[#allocation100_spill] sm:$0xff] %v7855_v54  ;;  %11887 = vst [vmem:[#allocation101_spill] sm:$0xff] %v7858_v52  ;;  %v2904_v5 = vcombine.high %v7847_v31, %v7855_v54  ;;  %v2920_v23 = vcombine.high %v7850_v41, %v7858_v52  ;;  %v2631_v55 = vcombine.low %v2575_v25, %v2591_v34 }
 0x12f   :  { %11889 = vst [vmem:[#allocation103_spill] sm:$0xff] %v7866_v61  ;;  %v2632_v20 = vcombine.high %v2575_v25, %v2591_v34  ;;  %v2648_v46 = vcombine.high %v7862_v0, %v7866_v61  ;;  %807 = vbcast.lane.b32.xlu1 %v801_v6, 264  ;;  %803 = vbcast.lane.b32.xlu0 %v801_v6, 256  ;;  %11891 = vst [vmem:[#allocation105_spill] sm:$0xff] %v7880_v51 }
 0x130   :  { %v7883_v10 = vrot.slane %v2904_v5, %v7356_v50  ;;  %v7886_v24 = vrot.slane %v2631_v55, %v7356_v50  ;;  %v7889_v25 = vrot.slane %v2600_v1, %v7356_v50  ;;  %v7900_v5 = vrot.slane %v2616_v45, %v7356_v50  ;;  %v7916_v45 = vld [vmem:[#allocation2 + $0x48] sm:$0xff] }
 0x131   :  { %v500_v36 = vpop.permute.xlu1 %499  ;;  %v7892_v34 = vrot.slane %v2632_v20, %v7356_v50  ;;  %v7895_v41 = vrot.slane %v2648_v46, %v7356_v50  ;;  %v496_v6 = vpop.permute.xlu0 %495  ;;  %v7914_v52 = vrot.slane %v11896_v14, %v7356_v50  ;;  %v7925_v46 = vrot.slane %v2920_v23, %v7356_v50 }
 0x132   :  { %11892 = vst [vmem:[#allocation106_spill] sm:$0xff] %v7883_v10  ;;  %11893 = vst [vmem:[#allocation107_spill] sm:$0xff] %v7886_v24  ;;  %v845_v55 = vrot.slane %v7916_v45, %v7247_v2 }
 0x133   :  { %11894 = vst [vmem:[#allocation108_spill] sm:$0xff] %v7895_v41  ;;  %11895 = vst [vmem:[#allocation109_spill] sm:$0xff] %v7900_v5  ;;  %818 = vbcast.lane.b32.xlu1 %v812_v37, 264  ;;  %814 = vbcast.lane.b32.xlu0 %v812_v37, 256  ;;  %v834_v37 = vrot.slane %v7916_v45, %v7250_v3 }
 0x134   :  { %11897 = vst [vmem:[#allocation110_spill] sm:$0xff] %v7914_v52  ;;  %11898 = vst [vmem:[#allocation111_spill] sm:$0xff] %v7925_v46 }
 0x135   :  { %v511_v31 = vpop.permute.xlu1 %510  ;;  %v507_v14 = vpop.permute.xlu0 %506 }
 0x136   :  { %v2943_v54 = vcombine.low %v489_v33, %v511_v31  ;;  %v2944_v57 = vcombine.high %v489_v33, %v511_v31  ;;  %v2671_v32 = vcombine.low %v485_v40, %v507_v14  ;;  %v2672_v41 = vcombine.high %v485_v40, %v507_v14 }
 0x137   :  { %829 = vbcast.lane.b32.xlu1 %v823_v63, 264  ;;  %825 = vbcast.lane.b32.xlu0 %v823_v63, 256 }
 0x138   :  { %v7934_v23 = vrot.slane %v2943_v54, %v7305_v56  ;;  %v7937_v31 = vrot.slane %v2944_v57, %v7305_v56  ;;  %v2679_v54 = vrot.slane %v2671_v32, %v7305_v56  ;;  %v7949_v57 = vrot.slane %v2672_v41, %v7305_v56 }
 0x139   :  { %v522_v20 = vpop.permute.xlu1 %521  ;;  %v518_v26 = vpop.permute.xlu0 %517  ;;  %v856_v41 = vrot.slane %v7916_v45, %v7255_v7 }
 0x13a   :  { %11899 = vst [vmem:[#allocation112_spill] sm:$0xff] %v7934_v23  ;;  %11900 = vst [vmem:[#allocation113_spill] sm:$0xff] %v7937_v31  ;;  %v2959_v33 = vcombine.low %v500_v36, %v522_v20  ;;  %v2960_v10 = vcombine.high %v500_v36, %v522_v20  ;;  %v2687_v5 = vcombine.low %v496_v6, %v518_v26 }
 0x13b   :  { %v2688_v38 = vcombine.high %v496_v6, %v518_v26  ;;  %840 = vbcast.lane.b32.xlu1 %v834_v37, 264  ;;  %836 = vbcast.lane.b32.xlu0 %v834_v37, 256  ;;  %11903 = vst [vmem:[#allocation116_spill] sm:$0xff] %v7949_v57  ;;  %v867_v37 = vrot.slane %v7916_v45, %v7259_v9 }
 0x13c   :  { %v7942_v63 = vrot.slane %v2959_v33, %v7305_v56  ;;  %v7945_v40 = vrot.slane %v2960_v10, %v7305_v56  ;;  %v2695_v36 = vrot.slane %v2687_v5, %v7305_v56 }
 0x13d   :  { %v7953_v26 = vrot.slane %v2688_v38, %v7305_v56  ;;  %v533_v6 = vpop.permute.xlu1 %532  ;;  %v529_v10 = vpop.permute.xlu0 %528 }
 0x13e   :  { %11901 = vst [vmem:[#allocation114_spill] sm:$0xff] %v7942_v63  ;;  %11902 = vst [vmem:[#allocation115_spill] sm:$0xff] %v7945_v40  ;;  %v3008_v20 = vcombine.high %v7934_v23, %v7942_v63  ;;  %v2736_v33 = vcombine.high %v2679_v54, %v2695_v36  ;;  %v878_v23 = vrot.slane %v7916_v45, %v7263_v11 }
 0x13f   :  { %11904 = vst [vmem:[#allocation117_spill] sm:$0xff] %v7953_v26  ;;  %v2752_v32 = vcombine.high %v7949_v57, %v7953_v26  ;;  %851 = vbcast.lane.b32.xlu1 %v845_v55, 264  ;;  %847 = vbcast.lane.b32.xlu0 %v845_v55, 256  ;;  %v2735_v22 = vcombine.low %v2679_v54, %v2695_v36 }
 0x141   :  { %v544_v5 = vpop.permute.xlu1 %543  ;;  %v540_v38 = vpop.permute.xlu0 %539 }
 0x143   :  { %862 = vbcast.lane.b32.xlu1 %v856_v41, 264  ;;  %858 = vbcast.lane.b32.xlu0 %v856_v41, 256 }
 0x145   :  { %v555_v1 = vpop.permute.xlu1 %554  ;;  %v551_v52 = vpop.permute.xlu0 %550 }
 0x146   :  { %v2975_v46 = vcombine.low %v533_v6, %v555_v1  ;;  %v2976_v14 = vcombine.high %v533_v6, %v555_v1  ;;  %v2703_v63 = vcombine.low %v529_v10, %v551_v52  ;;  %v2704_v57 = vcombine.high %v529_v10, %v551_v52 }
 0x147   :  { %873 = vbcast.lane.b32.xlu1 %v867_v37, 264  ;;  %869 = vbcast.lane.b32.xlu0 %v867_v37, 256  ;;  %v889_v6 = vrot.slane %v7916_v45, %v7267_v13 }
 0x148   :  { %v7968_v55 = vrot.slane %v2975_v46, %v7305_v56  ;;  %v7971_v18 = vrot.slane %v2976_v14, %v7305_v56  ;;  %v2711_v46 = vrot.slane %v2703_v63, %v7305_v56  ;;  %v7983_v14 = vrot.slane %v2704_v57, %v7305_v56 }
 0x149   :  { %v566_v26 = vpop.permute.xlu1 %565  ;;  %v562_v61 = vpop.permute.xlu0 %561 }
 0x14a   :  { %11905 = vst [vmem:[#allocation118_spill] sm:$0xff] %v7968_v55  ;;  %11906 = vst [vmem:[#allocation119_spill] sm:$0xff] %v7971_v18  ;;  %v2991_v0 = vcombine.low %v544_v5, %v566_v26  ;;  %v2992_v41 = vcombine.high %v544_v5, %v566_v26  ;;  %v2719_v43 = vcombine.low %v540_v38, %v562_v61 }
 0x14b   :  { %v2720_v1 = vcombine.high %v540_v38, %v562_v61  ;;  %884 = vbcast.lane.b32.xlu1 %v878_v23, 264  ;;  %880 = vbcast.lane.b32.xlu0 %v878_v23, 256  ;;  %11909 = vst [vmem:[#allocation122_spill] sm:$0xff] %v7983_v14  ;;  %v7994_v23 = vrot.slane %v3008_v20, %v7356_v50 }
 0x14c   :  { %v7976_v37 = vrot.slane %v2991_v0, %v7305_v56  ;;  %v7979_v52 = vrot.slane %v2992_v41, %v7305_v56  ;;  %v2727_v26 = vrot.slane %v2719_v43, %v7305_v56  ;;  %v900_v43 = vrot.slane %v7916_v45, %v7271_v15 }
 0x14d   :  { %v7987_v61 = vrot.slane %v2720_v1, %v7305_v56  ;;  %v577_v10 = vpop.permute.xlu1 %576  ;;  %v573_v36 = vpop.permute.xlu0 %572  ;;  %11911 = vst [vmem:[#allocation124_spill] sm:$0xff] %v7994_v23  ;;  %v8001_v38 = vrot.slane %v2735_v22, %v7356_v50  ;;  %v911_v22 = vrot.slane %v7916_v45, %v7275_v17  ;;  %v11919_v45 = vcombine.high %v7937_v31, %v7945_v40 }
 0x14e   :  { %11907 = vst [vmem:[#allocation120_spill] sm:$0xff] %v7976_v37  ;;  %11908 = vst [vmem:[#allocation121_spill] sm:$0xff] %v7979_v52  ;;  %v3040_v54 = vcombine.high %v7968_v55, %v7976_v37  ;;  %v3056_v0 = vcombine.high %v7971_v18, %v7979_v52  ;;  %v2767_v63 = vcombine.low %v2711_v46, %v2727_v26 }
 0x14f   :  { %11910 = vst [vmem:[#allocation123_spill] sm:$0xff] %v7987_v61  ;;  %v2768_v5 = vcombine.high %v2711_v46, %v2727_v26  ;;  %v2784_v57 = vcombine.high %v7983_v14, %v7987_v61  ;;  %895 = vbcast.lane.b32.xlu1 %v889_v6, 264  ;;  %891 = vbcast.lane.b32.xlu0 %v889_v6, 256  ;;  %11912 = vst [vmem:[#allocation125_spill] sm:$0xff] %v8001_v38 }
 0x150   :  { %v8004_v41 = vrot.slane %v3040_v54, %v7356_v50  ;;  %v8007_v20 = vrot.slane %v2767_v63, %v7356_v50  ;;  %v8010_v46 = vrot.slane %v2736_v33, %v7356_v50  ;;  %v8021_v54 = vrot.slane %v2752_v32, %v7356_v50  ;;  %v8037_v32 = vld [vmem:[#allocation2 + $0x50] sm:$0xff] }
 0x151   :  { %v588_v1 = vpop.permute.xlu1 %587  ;;  %v8013_v26 = vrot.slane %v2768_v5, %v7356_v50  ;;  %v8016_v18 = vrot.slane %v2784_v57, %v7356_v50  ;;  %v584_v6 = vpop.permute.xlu0 %583  ;;  %v8035_v52 = vrot.slane %v11919_v45, %v7356_v50  ;;  %v8046_v57 = vrot.slane %v3056_v0, %v7356_v50 }
 0x152   :  { %11913 = vst [vmem:[#allocation126_spill] sm:$0xff] %v8004_v41  ;;  %11914 = vst [vmem:[#allocation127_spill] sm:$0xff] %v8007_v20  ;;  %v933_v63 = vrot.slane %v8037_v32, %v7247_v2 }
 0x153   :  { %11915 = vst [vmem:[#allocation128_spill] sm:$0xff] %v8010_v46  ;;  %11916 = vst [vmem:[#allocation129_spill] sm:$0xff] %v8013_v26  ;;  %906 = vbcast.lane.b32.xlu1 %v900_v43, 264  ;;  %902 = vbcast.lane.b32.xlu0 %v900_v43, 256  ;;  %v922_v43 = vrot.slane %v8037_v32, %v7250_v3 }
 0x154   :  { %11917 = vst [vmem:[#allocation130_spill] sm:$0xff] %v8016_v18  ;;  %11918 = vst [vmem:[#allocation131_spill] sm:$0xff] %v8021_v54 }
 0x155   :  { %11920 = vst [vmem:[#allocation132_spill] sm:$0xff] %v8035_v52  ;;  %v599_v55 = vpop.permute.xlu1 %598  ;;  %11921 = vst [vmem:[#allocation133_spill] sm:$0xff] %v8046_v57  ;;  %v595_v45 = vpop.permute.xlu0 %594 }
 0x156   :  { %v3351_v37 = vcombine.low %v577_v10, %v599_v55  ;;  %v3352_v31 = vcombine.high %v577_v10, %v599_v55  ;;  %v3079_v40 = vcombine.low %v573_v36, %v595_v45  ;;  %v3080_v18 = vcombine.high %v573_v36, %v595_v45 }
 0x157   :  { %917 = vbcast.lane.b32.xlu1 %v911_v22, 264  ;;  %913 = vbcast.lane.b32.xlu0 %v911_v22, 256 }
 0x158   :  { %v8055_v0 = vrot.slane %v3351_v37, %v7305_v56  ;;  %v8058_v55 = vrot.slane %v3352_v31, %v7305_v56  ;;  %v3087_v37 = vrot.slane %v3079_v40, %v7305_v56  ;;  %v8070_v31 = vrot.slane %v3080_v18, %v7305_v56 }
 0x159   :  { %v610_v5 = vpop.permute.xlu1 %609  ;;  %v606_v23 = vpop.permute.xlu0 %605  ;;  %v944_v18 = vrot.slane %v8037_v32, %v7255_v7 }
 0x15a   :  { %11922 = vst [vmem:[#allocation134_spill] sm:$0xff] %v8055_v0  ;;  %11923 = vst [vmem:[#allocation135_spill] sm:$0xff] %v8058_v55  ;;  %v3367_v10 = vcombine.low %v588_v1, %v610_v5  ;;  %v3368_v41 = vcombine.high %v588_v1, %v610_v5  ;;  %v3095_v54 = vcombine.low %v584_v6, %v606_v23 }
 0x15b   :  { %v3096_v14 = vcombine.high %v584_v6, %v606_v23  ;;  %928 = vbcast.lane.b32.xlu1 %v922_v43, 264  ;;  %924 = vbcast.lane.b32.xlu0 %v922_v43, 256  ;;  %11926 = vst [vmem:[#allocation138_spill] sm:$0xff] %v8070_v31  ;;  %v955_v43 = vrot.slane %v8037_v32, %v7259_v9 }
 0x15c   :  { %v8063_v22 = vrot.slane %v3367_v10, %v7305_v56  ;;  %v8066_v36 = vrot.slane %v3368_v41, %v7305_v56  ;;  %v3103_v1 = vrot.slane %v3095_v54, %v7305_v56 }
 0x15d   :  { %v8074_v23 = vrot.slane %v3096_v14, %v7305_v56  ;;  %v621_v6 = vpop.permute.xlu1 %620  ;;  %v617_v41 = vpop.permute.xlu0 %616 }
 0x15e   :  { %11924 = vst [vmem:[#allocation136_spill] sm:$0xff] %v8063_v22  ;;  %11925 = vst [vmem:[#allocation137_spill] sm:$0xff] %v8066_v36  ;;  %v3416_v5 = vcombine.high %v8055_v0, %v8063_v22  ;;  %v3144_v10 = vcombine.high %v3087_v37, %v3103_v1  ;;  %v966_v0 = vrot.slane %v8037_v32, %v7263_v11 }
 0x15f   :  { %11927 = vst [vmem:[#allocation139_spill] sm:$0xff] %v8074_v23  ;;  %v3160_v40 = vcombine.high %v8070_v31, %v8074_v23  ;;  %939 = vbcast.lane.b32.xlu1 %v933_v63, 264  ;;  %935 = vbcast.lane.b32.xlu0 %v933_v63, 256  ;;  %v3143_v19 = vcombine.low %v3087_v37, %v3103_v1 }
 0x161   :  { %v632_v54 = vpop.permute.xlu1 %631  ;;  %v628_v14 = vpop.permute.xlu0 %627 }
 0x163   :  { %950 = vbcast.lane.b32.xlu1 %v944_v18, 264  ;;  %946 = vbcast.lane.b32.xlu0 %v944_v18, 256 }
 0x165   :  { %v643_v33 = vpop.permute.xlu1 %642  ;;  %v639_v52 = vpop.permute.xlu0 %638 }
 0x166   :  { %v3383_v57 = vcombine.low %v621_v6, %v643_v33  ;;  %v3384_v45 = vcombine.high %v621_v6, %v643_v33  ;;  %v3111_v22 = vcombine.low %v617_v41, %v639_v52  ;;  %v3112_v61 = vcombine.high %v617_v41, %v639_v52 }
 0x167   :  { %961 = vbcast.lane.b32.xlu1 %v955_v43, 264  ;;  %957 = vbcast.lane.b32.xlu0 %v955_v43, 256  ;;  %v977_v6 = vrot.slane %v8037_v32, %v7267_v13 }
 0x168   :  { %v8089_v63 = vrot.slane %v3383_v57, %v7305_v56  ;;  %v8092_v23 = vrot.slane %v3384_v45, %v7305_v56  ;;  %v3119_v57 = vrot.slane %v3111_v22, %v7305_v56  ;;  %v8104_v45 = vrot.slane %v3112_v61, %v7305_v56 }
 0x169   :  { %v654_v31 = vpop.permute.xlu1 %653  ;;  %v650_v4 = vpop.permute.xlu0 %649 }
 0x16a   :  { %11928 = vst [vmem:[#allocation140_spill] sm:$0xff] %v8089_v63  ;;  %11929 = vst [vmem:[#allocation141_spill] sm:$0xff] %v8092_v23  ;;  %v3399_v62 = vcombine.low %v632_v54, %v654_v31  ;;  %v3400_v18 = vcombine.high %v632_v54, %v654_v31  ;;  %v3127_v21 = vcombine.low %v628_v14, %v650_v4 }
 0x16b   :  { %v3128_v33 = vcombine.high %v628_v14, %v650_v4  ;;  %972 = vbcast.lane.b32.xlu1 %v966_v0, 264  ;;  %968 = vbcast.lane.b32.xlu0 %v966_v0, 256  ;;  %11932 = vst [vmem:[#allocation144_spill] sm:$0xff] %v8104_v45  ;;  %v8115_v0 = vrot.slane %v3416_v5, %v7356_v50 }
 0x16c   :  { %v8097_v43 = vrot.slane %v3399_v62, %v7305_v56  ;;  %v8100_v52 = vrot.slane %v3400_v18, %v7305_v56  ;;  %v3135_v31 = vrot.slane %v3127_v21, %v7305_v56  ;;  %v988_v21 = vrot.slane %v8037_v32, %v7271_v15 }
 0x16d   :  { %v8108_v4 = vrot.slane %v3128_v33, %v7305_v56  ;;  %v665_v41 = vpop.permute.xlu1 %664  ;;  %v661_v1 = vpop.permute.xlu0 %660  ;;  %11934 = vst [vmem:[#allocation146_spill] sm:$0xff] %v8115_v0  ;;  %v8122_v14 = vrot.slane %v3143_v19, %v7356_v50  ;;  %v999_v19 = vrot.slane %v8037_v32, %v7275_v17  ;;  %v11941_v32 = vcombine.high %v8058_v55, %v8066_v36 }
 0x16e   :  { %11930 = vst [vmem:[#allocation142_spill] sm:$0xff] %v8097_v43  ;;  %11931 = vst [vmem:[#allocation143_spill] sm:$0xff] %v8100_v52  ;;  %v3448_v37 = vcombine.high %v8089_v63, %v8097_v43  ;;  %v3464_v62 = vcombine.high %v8092_v23, %v8100_v52  ;;  %v3175_v22 = vcombine.low %v3119_v57, %v3135_v31 }
 0x16f   :  { %11933 = vst [vmem:[#allocation145_spill] sm:$0xff] %v8108_v4  ;;  %v3176_v54 = vcombine.high %v3119_v57, %v3135_v31  ;;  %v3192_v61 = vcombine.high %v8104_v45, %v8108_v4  ;;  %983 = vbcast.lane.b32.xlu1 %v977_v6, 264  ;;  %979 = vbcast.lane.b32.xlu0 %v977_v6, 256  ;;  %11935 = vst [vmem:[#allocation147_spill] sm:$0xff] %v8122_v14 }
 0x170   :  { %v8125_v18 = vrot.slane %v3448_v37, %v7356_v50  ;;  %v8128_v5 = vrot.slane %v3175_v22, %v7356_v50  ;;  %v8131_v57 = vrot.slane %v3144_v10, %v7356_v50  ;;  %v8142_v37 = vrot.slane %v3160_v40, %v7356_v50  ;;  %v8158_v40 = vld [vmem:[#allocation2 + $0x58] sm:$0xff] }
 0x171   :  { %v676_v33 = vpop.permute.xlu1 %675  ;;  %v8134_v31 = vrot.slane %v3176_v54, %v7356_v50  ;;  %v8137_v23 = vrot.slane %v3192_v61, %v7356_v50  ;;  %v672_v6 = vpop.permute.xlu0 %671  ;;  %v8156_v52 = vrot.slane %v11941_v32, %v7356_v50  ;;  %v8167_v61 = vrot.slane %v3464_v62, %v7356_v50 }
 0x172   :  { %11936 = vst [vmem:[#allocation148_spill] sm:$0xff] %v8125_v18  ;;  %11937 = vst [vmem:[#allocation149_spill] sm:$0xff] %v8128_v5  ;;  %v1021_v22 = vrot.slane %v8158_v40, %v7247_v2 }
 0x173   :  { %11938 = vst [vmem:[#allocation150_spill] sm:$0xff] %v8134_v31  ;;  %11939 = vst [vmem:[#allocation151_spill] sm:$0xff] %v8137_v23  ;;  %994 = vbcast.lane.b32.xlu1 %v988_v21, 264  ;;  %990 = vbcast.lane.b32.xlu0 %v988_v21, 256  ;;  %v1010_v21 = vrot.slane %v8158_v40, %v7250_v3 }
 0x174   :  { %11940 = vst [vmem:[#allocation152_spill] sm:$0xff] %v8142_v37  ;;  %11942 = vst [vmem:[#allocation153_spill] sm:$0xff] %v8156_v52 }
 0x175   :  { %v687_v63 = vpop.permute.xlu1 %686  ;;  %11943 = vst [vmem:[#allocation154_spill] sm:$0xff] %v8167_v61  ;;  %v683_v32 = vpop.permute.xlu0 %682 }
 0x176   :  { %v3487_v43 = vcombine.low %v665_v41, %v687_v63  ;;  %v3488_v55 = vcombine.high %v665_v41, %v687_v63  ;;  %v3215_v36 = vcombine.low %v661_v1, %v683_v32  ;;  %v3216_v23 = vcombine.high %v661_v1, %v683_v32 }
 0x177   :  { %1005 = vbcast.lane.b32.xlu1 %v999_v19, 264  ;;  %1001 = vbcast.lane.b32.xlu0 %v999_v19, 256 }
 0x178   :  { %v8176_v62 = vrot.slane %v3487_v43, %v7305_v56  ;;  %v8179_v63 = vrot.slane %v3488_v55, %v7305_v56  ;;  %v3223_v43 = vrot.slane %v3215_v36, %v7305_v56  ;;  %v8191_v55 = vrot.slane %v3216_v23, %v7305_v56 }
 0x179   :  { %v698_v54 = vpop.permute.xlu1 %697  ;;  %v694_v0 = vpop.permute.xlu0 %693  ;;  %v1032_v23 = vrot.slane %v8158_v40, %v7255_v7 }
 0x17a   :  { %11944 = vst [vmem:[#allocation155_spill] sm:$0xff] %v8176_v62  ;;  %11945 = vst [vmem:[#allocation156_spill] sm:$0xff] %v8179_v63  ;;  %v3503_v41 = vcombine.low %v676_v33, %v698_v54  ;;  %v3504_v18 = vcombine.high %v676_v33, %v698_v54  ;;  %v3231_v37 = vcombine.low %v672_v6, %v694_v0 }
 0x17b   :  { %v3232_v45 = vcombine.high %v672_v6, %v694_v0  ;;  %1016 = vbcast.lane.b32.xlu1 %v1010_v21, 264  ;;  %1012 = vbcast.lane.b32.xlu0 %v1010_v21, 256  ;;  %11948 = vst [vmem:[#allocation159_spill] sm:$0xff] %v8191_v55  ;;  %v1043_v21 = vrot.slane %v8158_v40, %v7259_v9 }
 0x17c   :  { %v8184_v19 = vrot.slane %v3503_v41, %v7305_v56  ;;  %v8187_v1 = vrot.slane %v3504_v18, %v7305_v56  ;;  %v3239_v33 = vrot.slane %v3231_v37, %v7305_v56 }
 0x17d   :  { %v8195_v0 = vrot.slane %v3232_v45, %v7305_v56  ;;  %v709_v6 = vpop.permute.xlu1 %708  ;;  %v705_v18 = vpop.permute.xlu0 %704 }
 0x17e   :  { %11946 = vst [vmem:[#allocation157_spill] sm:$0xff] %v8184_v19  ;;  %11947 = vst [vmem:[#allocation158_spill] sm:$0xff] %v8187_v1  ;;  %v3552_v54 = vcombine.high %v8176_v62, %v8184_v19  ;;  %v3280_v41 = vcombine.high %v3223_v43, %v3239_v33  ;;  %v1054_v62 = vrot.slane %v8158_v40, %v7263_v11 }
 0x17f   :  { %11949 = vst [vmem:[#allocation160_spill] sm:$0xff] %v8195_v0  ;;  %v3296_v36 = vcombine.high %v8191_v55, %v8195_v0  ;;  %1027 = vbcast.lane.b32.xlu1 %v1021_v22, 264  ;;  %1023 = vbcast.lane.b32.xlu0 %v1021_v22, 256  ;;  %v3279_v46 = vcombine.low %v3223_v43, %v3239_v33 }
 0x181   :  { %v720_v37 = vpop.permute.xlu1 %719  ;;  %v716_v45 = vpop.permute.xlu0 %715 }
 0x183   :  { %1038 = vbcast.lane.b32.xlu1 %v1032_v23, 264  ;;  %1034 = vbcast.lane.b32.xlu0 %v1032_v23, 256 }
 0x185   :  { %v731_v10 = vpop.permute.xlu1 %730  ;;  %v727_v52 = vpop.permute.xlu0 %726 }
 0x186   :  { %v3519_v61 = vcombine.low %v709_v6, %v731_v10  ;;  %v3520_v32 = vcombine.high %v709_v6, %v731_v10  ;;  %v3247_v19 = vcombine.low %v705_v18, %v727_v52  ;;  %v3248_v55 = vcombine.high %v705_v18, %v727_v52 }
 0x187   :  { %1049 = vbcast.lane.b32.xlu1 %v1043_v21, 264  ;;  %1045 = vbcast.lane.b32.xlu0 %v1043_v21, 256  ;;  %v1065_v6 = vrot.slane %v8158_v40, %v7267_v13 }
 0x188   :  { %v8210_v22 = vrot.slane %v3519_v61, %v7305_v56  ;;  %v8213_v4 = vrot.slane %v3520_v32, %v7305_v56  ;;  %v3255_v61 = vrot.slane %v3247_v19, %v7305_v56  ;;  %v8225_v32 = vrot.slane %v3248_v55, %v7305_v56 }
 0x189   :  { %v742_v0 = vpop.permute.xlu1 %741  ;;  %v738_v58 = vpop.permute.xlu0 %737 }
 0x18a   :  { %11950 = vst [vmem:[#allocation161_spill] sm:$0xff] %v8210_v22  ;;  %11951 = vst [vmem:[#allocation162_spill] sm:$0xff] %v8213_v4  ;;  %v3535_v59 = vcombine.low %v720_v37, %v742_v0  ;;  %v3536_v23 = vcombine.high %v720_v37, %v742_v0  ;;  %v3263_v26 = vcombine.low %v716_v45, %v738_v58 }
 0x18b   :  { %v3264_v10 = vcombine.high %v716_v45, %v738_v58  ;;  %1060 = vbcast.lane.b32.xlu1 %v1054_v62, 264  ;;  %1056 = vbcast.lane.b32.xlu0 %v1054_v62, 256  ;;  %11954 = vst [vmem:[#allocation165_spill] sm:$0xff] %v8225_v32  ;;  %v8236_v62 = vrot.slane %v3552_v54, %v7356_v50 }
 0x18c   :  { %v8218_v21 = vrot.slane %v3535_v59, %v7305_v56  ;;  %v8221_v52 = vrot.slane %v3536_v23, %v7305_v56  ;;  %v3271_v0 = vrot.slane %v3263_v26, %v7305_v56  ;;  %v1076_v26 = vrot.slane %v8158_v40, %v7271_v15 }
 0x18d   :  { %v8229_v58 = vrot.slane %v3264_v10, %v7305_v56  ;;  %v753_v18 = vpop.permute.xlu1 %752  ;;  %v749_v33 = vpop.permute.xlu0 %748  ;;  %11956 = vst [vmem:[#allocation167_spill] sm:$0xff] %v8236_v62  ;;  %v8243_v45 = vrot.slane %v3279_v46, %v7356_v50  ;;  %v1087_v46 = vrot.slane %v8158_v40, %v7275_v17  ;;  %v11964_v40 = vcombine.high %v8179_v63, %v8187_v1 }
 0x18e   :  { %11952 = vst [vmem:[#allocation163_spill] sm:$0xff] %v8218_v21  ;;  %11953 = vst [vmem:[#allocation164_spill] sm:$0xff] %v8221_v52  ;;  %v3584_v43 = vcombine.high %v8210_v22, %v8218_v21  ;;  %v3600_v59 = vcombine.high %v8213_v4, %v8221_v52  ;;  %v3311_v19 = vcombine.low %v3255_v61, %v3271_v0 }
 0x18f   :  { %11955 = vst [vmem:[#allocation166_spill] sm:$0xff] %v8229_v58  ;;  %v3312_v37 = vcombine.high %v3255_v61, %v3271_v0  ;;  %v3328_v55 = vcombine.high %v8225_v32, %v8229_v58  ;;  %1071 = vbcast.lane.b32.xlu1 %v1065_v6, 264  ;;  %1067 = vbcast.lane.b32.xlu0 %v1065_v6, 256  ;;  %11957 = vst [vmem:[#allocation168_spill] sm:$0xff] %v8243_v45 }
 0x190   :  { %v8246_v23 = vrot.slane %v3584_v43, %v7356_v50  ;;  %v8249_v54 = vrot.slane %v3311_v19, %v7356_v50  ;;  %v8252_v61 = vrot.slane %v3280_v41, %v7356_v50  ;;  %v8263_v43 = vrot.slane %v3296_v36, %v7356_v50  ;;  %v8279_v36 = vld [vmem:[#allocation2 + $0x60] sm:$0xff] }
 0x191   :  { %v764_v10 = vpop.permute.xlu1 %763  ;;  %v8255_v0 = vrot.slane %v3312_v37, %v7356_v50  ;;  %v8258_v4 = vrot.slane %v3328_v55, %v7356_v50  ;;  %v760_v6 = vpop.permute.xlu0 %759  ;;  %v8277_v52 = vrot.slane %v11964_v40, %v7356_v50  ;;  %v8288_v55 = vrot.slane %v3600_v59, %v7356_v50 }
 0x192   :  { %11958 = vst [vmem:[#allocation169_spill] sm:$0xff] %v8246_v23  ;;  %11959 = vst [vmem:[#allocation170_spill] sm:$0xff] %v8249_v54  ;;  %v1109_v19 = vrot.slane %v8279_v36, %v7247_v2 }
 0x193   :  { %11960 = vst [vmem:[#allocation171_spill] sm:$0xff] %v8252_v61  ;;  %11961 = vst [vmem:[#allocation172_spill] sm:$0xff] %v8255_v0  ;;  %1082 = vbcast.lane.b32.xlu1 %v1076_v26, 264  ;;  %1078 = vbcast.lane.b32.xlu0 %v1076_v26, 256  ;;  %v1098_v26 = vrot.slane %v8279_v36, %v7250_v3 }
 0x194   :  { %11962 = vst [vmem:[#allocation173_spill] sm:$0xff] %v8258_v4  ;;  %11963 = vst [vmem:[#allocation174_spill] sm:$0xff] %v8263_v43 }
 0x195   :  { %11965 = vst [vmem:[#allocation175_spill] sm:$0xff] %v8277_v52  ;;  %v775_v22 = vpop.permute.xlu1 %774  ;;  %11966 = vst [vmem:[#allocation176_spill] sm:$0xff] %v8288_v55  ;;  %v771_v40 = vpop.permute.xlu0 %770 }
 0x196   :  { %v3895_v21 = vcombine.low %v753_v18, %v775_v22  ;;  %v3896_v63 = vcombine.high %v753_v18, %v775_v22  ;;  %v3623_v1 = vcombine.low %v749_v33, %v771_v40  ;;  %v3624_v4 = vcombine.high %v749_v33, %v771_v40 }
 0x197   :  { %1093 = vbcast.lane.b32.xlu1 %v1087_v46, 264  ;;  %1089 = vbcast.lane.b32.xlu0 %v1087_v46, 256 }
 0x198   :  { %v8297_v59 = vrot.slane %v3895_v21, %v7305_v56  ;;  %v8300_v22 = vrot.slane %v3896_v63, %v7305_v56  ;;  %v3631_v21 = vrot.slane %v3623_v1, %v7305_v56  ;;  %v8312_v63 = vrot.slane %v3624_v4, %v7305_v56 }
 0x199   :  { %v786_v37 = vpop.permute.xlu1 %785  ;;  %v782_v62 = vpop.permute.xlu0 %781  ;;  %v1120_v4 = vrot.slane %v8279_v36, %v7255_v7 }
 0x19a   :  { %11967 = vst [vmem:[#allocation177_spill] sm:$0xff] %v8297_v59  ;;  %11968 = vst [vmem:[#allocation178_spill] sm:$0xff] %v8300_v22  ;;  %v3911_v18 = vcombine.low %v764_v10, %v786_v37  ;;  %v3912_v23 = vcombine.high %v764_v10, %v786_v37  ;;  %v3639_v43 = vcombine.low %v760_v6, %v782_v62 }
 0x19b   :  { %v3640_v32 = vcombine.high %v760_v6, %v782_v62  ;;  %1104 = vbcast.lane.b32.xlu1 %v1098_v26, 264  ;;  %1100 = vbcast.lane.b32.xlu0 %v1098_v26, 256  ;;  %11971 = vst [vmem:[#allocation181_spill] sm:$0xff] %v8312_v63  ;;  %v1131_v26 = vrot.slane %v8279_v36, %v7259_v9 }
 0x19c   :  { %v8305_v46 = vrot.slane %v3911_v18, %v7305_v56  ;;  %v8308_v33 = vrot.slane %v3912_v23, %v7305_v56  ;;  %v3647_v10 = vrot.slane %v3639_v43, %v7305_v56 }
 0x19d   :  { %v8316_v62 = vrot.slane %v3640_v32, %v7305_v56  ;;  %v797_v6 = vpop.permute.xlu1 %796  ;;  %v793_v23 = vpop.permute.xlu0 %792 }
 0x19e   :  { %11969 = vst [vmem:[#allocation179_spill] sm:$0xff] %v8305_v46  ;;  %11970 = vst [vmem:[#allocation180_spill] sm:$0xff] %v8308_v33  ;;  %v3960_v37 = vcombine.high %v8297_v59, %v8305_v46  ;;  %v3976_v40 = vcombine.high %v8300_v22, %v8308_v33  ;;  %v3688_v18 = vcombine.high %v3631_v21, %v3647_v10 }
 0x19f   :  { %11972 = vst [vmem:[#allocation182_spill] sm:$0xff] %v8316_v62  ;;  %v3704_v1 = vcombine.high %v8312_v63, %v8316_v62  ;;  %1115 = vbcast.lane.b32.xlu1 %v1109_v19, 264  ;;  %1111 = vbcast.lane.b32.xlu0 %v1109_v19, 256  ;;  %v1142_v33 = vrot.slane %v8279_v36, %v7263_v11 }
 0x1a0   :  { %v3687_v60 = vcombine.low %v3631_v21, %v3647_v10 }
 0x1a1   :  { %v808_v43 = vpop.permute.xlu1 %807  ;;  %v804_v32 = vpop.permute.xlu0 %803 }
 0x1a3   :  { %1126 = vbcast.lane.b32.xlu1 %v1120_v4, 264  ;;  %1122 = vbcast.lane.b32.xlu0 %v1120_v4, 256 }
 0x1a5   :  { %v819_v41 = vpop.permute.xlu1 %818  ;;  %v815_v22 = vpop.permute.xlu0 %814 }
 0x1a6   :  { %v3927_v55 = vcombine.low %v797_v6, %v819_v41  ;;  %v3928_v52 = vcombine.high %v797_v6, %v819_v41  ;;  %v3655_v59 = vcombine.low %v793_v23, %v815_v22  ;;  %v3656_v46 = vcombine.high %v793_v23, %v815_v22 }
 0x1a7   :  { %1137 = vbcast.lane.b32.xlu1 %v1131_v26, 264  ;;  %1133 = vbcast.lane.b32.xlu0 %v1131_v26, 256  ;;  %v1153_v6 = vrot.slane %v8279_v36, %v7267_v13 }
 0x1a8   :  { %v8331_v19 = vrot.slane %v3927_v55, %v7305_v56  ;;  %v8334_v63 = vrot.slane %v3928_v52, %v7305_v56  ;;  %v3663_v52 = vrot.slane %v3655_v59, %v7305_v56  ;;  %v8346_v55 = vrot.slane %v3656_v46, %v7305_v56 }
 0x1a9   :  { %v830_v58 = vpop.permute.xlu1 %829  ;;  %v826_v0 = vpop.permute.xlu0 %825 }
 0x1aa   :  { %11973 = vst [vmem:[#allocation183_spill] sm:$0xff] %v8331_v19  ;;  %11974 = vst [vmem:[#allocation184_spill] sm:$0xff] %v8334_v63  ;;  %v3943_v62 = vcombine.low %v808_v43, %v830_v58  ;;  %v3944_v4 = vcombine.high %v808_v43, %v830_v58  ;;  %v3671_v61 = vcombine.low %v804_v32, %v826_v0 }
 0x1ab   :  { %v3672_v41 = vcombine.high %v804_v32, %v826_v0  ;;  %1148 = vbcast.lane.b32.xlu1 %v1142_v33, 264  ;;  %1144 = vbcast.lane.b32.xlu0 %v1142_v33, 256  ;;  %11977 = vst [vmem:[#allocation187_spill] sm:$0xff] %v8346_v55  ;;  %v8357_v33 = vrot.slane %v3960_v37, %v7356_v50 }
 0x1ac   :  { %v8339_v26 = vrot.slane %v3943_v62, %v7305_v56  ;;  %v8342_v22 = vrot.slane %v3944_v4, %v7305_v56  ;;  %v3679_v58 = vrot.slane %v3671_v61, %v7305_v56  ;;  %v1164_v61 = vrot.slane %v8279_v36, %v7271_v15 }
 0x1ad   :  { %v8350_v0 = vrot.slane %v3672_v41, %v7305_v56  ;;  %v841_v23 = vpop.permute.xlu1 %840  ;;  %v837_v62 = vpop.permute.xlu0 %836  ;;  %11979 = vst [vmem:[#allocation189_spill] sm:$0xff] %v8357_v33  ;;  %v8364_v32 = vrot.slane %v3687_v60, %v7356_v50  ;;  %v8367_v4 = vrot.slane %v3688_v18, %v7356_v50  ;;  %v8373_v37 = vrot.slane %v3976_v40, %v7356_v50 }
 0x1ae   :  { %11975 = vst [vmem:[#allocation185_spill] sm:$0xff] %v8339_v26  ;;  %11976 = vst [vmem:[#allocation186_spill] sm:$0xff] %v8342_v22  ;;  %v3992_v21 = vcombine.high %v8331_v19, %v8339_v26  ;;  %v4008_v10 = vcombine.high %v8334_v63, %v8342_v22  ;;  %v3719_v59 = vcombine.low %v3663_v52, %v3679_v58  ;;  %v8402_v22 = vld [vmem:[#allocation2 + $0x68] sm:$0xff] }
 0x1af   :  { %11978 = vst [vmem:[#allocation188_spill] sm:$0xff] %v8350_v0  ;;  %v3720_v43 = vcombine.high %v3663_v52, %v3679_v58  ;;  %v3736_v46 = vcombine.high %v8346_v55, %v8350_v0  ;;  %1159 = vbcast.lane.b32.xlu1 %v1153_v6, 264  ;;  %1155 = vbcast.lane.b32.xlu0 %v1153_v6, 256  ;;  %11980 = vst [vmem:[#allocation190_spill] sm:$0xff] %v8364_v32 }
 0x1b0   :  { %11981 = vst [vmem:[#allocation191_spill] sm:$0xff] %v8367_v4  ;;  %v8370_v41 = vrot.slane %v3992_v21, %v7356_v50  ;;  %11983 = vst [vmem:[#allocation193_spill] sm:$0xff] %v8373_v37  ;;  %v8376_v58 = vrot.slane %v3719_v59, %v7356_v50  ;;  %v8385_v60 = vrot.slane %v4008_v10, %v7356_v50 }
 0x1b1   :  { %v852_v52 = vpop.permute.xlu1 %851  ;;  %v8379_v63 = vrot.slane %v3720_v43, %v7356_v50  ;;  %v8382_v6 = vrot.slane %v3736_v46, %v7356_v50  ;;  %v848_v18 = vpop.permute.xlu0 %847  ;;  %v8388_v21 = vrot.slane %v3704_v1, %v7356_v50  ;;  %v1175_v43 = vrot.slane %v8279_v36, %v7275_v17 }
 0x1b2   :  { %11982 = vst [vmem:[#allocation192_spill] sm:$0xff] %v8370_v41  ;;  %11984 = vst [vmem:[#allocation194_spill] sm:$0xff] %v8376_v58 }
 0x1b3   :  { %11985 = vst [vmem:[#allocation195_spill] sm:$0xff] %v8379_v63  ;;  %11986 = vst [vmem:[#allocation196_spill] sm:$0xff] %v8382_v6  ;;  %1170 = vbcast.lane.b32.xlu1 %v1164_v61, 264  ;;  %1166 = vbcast.lane.b32.xlu0 %v1164_v61, 256  ;;  %v1186_v61 = vrot.slane %v8402_v22, %v7250_v3 }
 0x1b4   :  { %11987 = vst [vmem:[#allocation197_spill] sm:$0xff] %v8385_v60  ;;  %11988 = vst [vmem:[#allocation198_spill] sm:$0xff] %v8388_v21 }
 0x1b5   :  { %v863_v41 = vpop.permute.xlu1 %862  ;;  %v859_v19 = vpop.permute.xlu0 %858 }
 0x1b6   :  { %v4031_v10 = vcombine.low %v841_v23, %v863_v41  ;;  %v4032_v33 = vcombine.high %v841_v23, %v863_v41  ;;  %v3759_v1 = vcombine.low %v837_v62, %v859_v19  ;;  %v3760_v40 = vcombine.high %v837_v62, %v859_v19 }
 0x1b7   :  { %1181 = vbcast.lane.b32.xlu1 %v1175_v43, 264  ;;  %1177 = vbcast.lane.b32.xlu0 %v1175_v43, 256  ;;  %v1197_v41 = vrot.slane %v8402_v22, %v7247_v2 }
 0x1b8   :  { %v8415_v59 = vrot.slane %v4031_v10, %v7305_v56  ;;  %v8418_v6 = vrot.slane %v4032_v33, %v7305_v56  ;;  %v3767_v62 = vrot.slane %v3759_v1, %v7305_v56  ;;  %v8430_v33 = vrot.slane %v3760_v40, %v7305_v56 }
 0x1b9   :  { %v874_v26 = vpop.permute.xlu1 %873  ;;  %v870_v46 = vpop.permute.xlu0 %869  ;;  %v1208_v40 = vrot.slane %v8402_v22, %v7255_v7 }
 0x1ba   :  { %11989 = vst [vmem:[#allocation199_spill] sm:$0xff] %v8415_v59  ;;  %11990 = vst [vmem:[#allocation200_spill] sm:$0xff] %v8418_v6  ;;  %v4047_v36 = vcombine.low %v852_v52, %v874_v26  ;;  %v4048_v21 = vcombine.high %v852_v52, %v874_v26  ;;  %v3775_v60 = vcombine.low %v848_v18, %v870_v46 }
 0x1bb   :  { %v3776_v23 = vcombine.high %v848_v18, %v870_v46  ;;  %1192 = vbcast.lane.b32.xlu1 %v1186_v61, 264  ;;  %1188 = vbcast.lane.b32.xlu0 %v1186_v61, 256  ;;  %11993 = vst [vmem:[#allocation203_spill] sm:$0xff] %v8430_v33 }
 0x1bc   :  { %v8423_v43 = vrot.slane %v4047_v36, %v7305_v56  ;;  %v8426_v19 = vrot.slane %v4048_v21, %v7305_v56  ;;  %v3783_v26 = vrot.slane %v3775_v60, %v7305_v56 }
 0x1bd   :  { %v8434_v52 = vrot.slane %v3776_v23, %v7305_v56  ;;  %v885_v18 = vpop.permute.xlu1 %884  ;;  %v881_v21 = vpop.permute.xlu0 %880  ;;  %v1219_v23 = vrot.slane %v8402_v22, %v7259_v9 }
 0x1be   :  { %11991 = vst [vmem:[#allocation201_spill] sm:$0xff] %v8423_v43  ;;  %11992 = vst [vmem:[#allocation202_spill] sm:$0xff] %v8426_v19  ;;  %v4096_v46 = vcombine.high %v8415_v59, %v8423_v43  ;;  %v4112_v10 = vcombine.high %v8418_v6, %v8426_v19  ;;  %v3824_v36 = vcombine.high %v3767_v62, %v3783_v26 }
 0x1bf   :  { %11994 = vst [vmem:[#allocation204_spill] sm:$0xff] %v8434_v52  ;;  %v3840_v1 = vcombine.high %v8430_v33, %v8434_v52  ;;  %1203 = vbcast.lane.b32.xlu1 %v1197_v41, 264  ;;  %1199 = vbcast.lane.b32.xlu0 %v1197_v41, 256  ;;  %v1230_v43 = vrot.slane %v8402_v22, %v7263_v11 }
 0x1c0   :  { %v3823_v63 = vcombine.low %v3767_v62, %v3783_v26 }
 0x1c1   :  { %v896_v60 = vpop.permute.xlu1 %895  ;;  %v892_v61 = vpop.permute.xlu0 %891 }
 0x1c3   :  { %1214 = vbcast.lane.b32.xlu1 %v1208_v40, 264  ;;  %1210 = vbcast.lane.b32.xlu0 %v1208_v40, 256 }
 0x1c5   :  { %v907_v37 = vpop.permute.xlu1 %906  ;;  %v903_v19 = vpop.permute.xlu0 %902 }
 0x1c6   :  { %v4063_v59 = vcombine.low %v885_v18, %v907_v37  ;;  %v4064_v6 = vcombine.high %v885_v18, %v907_v37  ;;  %v3791_v33 = vcombine.low %v881_v21, %v903_v19  ;;  %v3792_v52 = vcombine.high %v881_v21, %v903_v19 }
 0x1c7   :  { %1225 = vbcast.lane.b32.xlu1 %v1219_v23, 264  ;;  %1221 = vbcast.lane.b32.xlu0 %v1219_v23, 256  ;;  %v1241_v18 = vrot.slane %v8402_v22, %v7267_v13 }
 0x1c8   :  { %v8449_v41 = vrot.slane %v4063_v59, %v7305_v56  ;;  %v8452_v0 = vrot.slane %v4064_v6, %v7305_v56  ;;  %v3799_v6 = vrot.slane %v3791_v33, %v7305_v56  ;;  %v8464_v59 = vrot.slane %v3792_v52, %v7305_v56 }
 0x1c9   :  { %v918_v55 = vpop.permute.xlu1 %917  ;;  %v914_v27 = vpop.permute.xlu0 %913 }
 0x1ca   :  { %11995 = vst [vmem:[#allocation205_spill] sm:$0xff] %v8449_v41  ;;  %11996 = vst [vmem:[#allocation206_spill] sm:$0xff] %v8452_v0  ;;  %v4079_v8 = vcombine.low %v896_v60, %v918_v55  ;;  %v4080_v40 = vcombine.high %v896_v60, %v918_v55  ;;  %v3807_v53 = vcombine.low %v892_v61, %v914_v27 }
 0x1cb   :  { %v3808_v37 = vcombine.high %v892_v61, %v914_v27  ;;  %1236 = vbcast.lane.b32.xlu1 %v1230_v43, 264  ;;  %1232 = vbcast.lane.b32.xlu0 %v1230_v43, 256  ;;  %11999 = vst [vmem:[#allocation209_spill] sm:$0xff] %v8464_v59  ;;  %v8475_v43 = vrot.slane %v4096_v46, %v7356_v50 }
 0x1cc   :  { %v8457_v23 = vrot.slane %v4079_v8, %v7305_v56  ;;  %v8460_v19 = vrot.slane %v4080_v40, %v7305_v56  ;;  %v3815_v55 = vrot.slane %v3807_v53, %v7305_v56  ;;  %v1252_v53 = vrot.slane %v8402_v22, %v7271_v15 }
 0x1cd   :  { %v8468_v27 = vrot.slane %v3808_v37, %v7305_v56  ;;  %v929_v21 = vpop.permute.xlu1 %928  ;;  %v925_v26 = vpop.permute.xlu0 %924  ;;  %12001 = vst [vmem:[#allocation211_spill] sm:$0xff] %v8475_v43  ;;  %v8482_v61 = vrot.slane %v3823_v63, %v7356_v50  ;;  %v8485_v40 = vrot.slane %v3824_v36, %v7356_v50  ;;  %v8491_v46 = vrot.slane %v4112_v10, %v7356_v50 }
 0x1ce   :  { %11997 = vst [vmem:[#allocation207_spill] sm:$0xff] %v8457_v23  ;;  %11998 = vst [vmem:[#allocation208_spill] sm:$0xff] %v8460_v19  ;;  %v4128_v62 = vcombine.high %v8449_v41, %v8457_v23  ;;  %v4144_v8 = vcombine.high %v8452_v0, %v8460_v19  ;;  %v3855_v33 = vcombine.low %v3799_v6, %v3815_v55  ;;  %v8520_v19 = vld [vmem:[#allocation2 + $0x70] sm:$0xff] }
 0x1cf   :  { %12000 = vst [vmem:[#allocation210_spill] sm:$0xff] %v8468_v27  ;;  %v3856_v60 = vcombine.high %v3799_v6, %v3815_v55  ;;  %v3872_v52 = vcombine.high %v8464_v59, %v8468_v27  ;;  %1247 = vbcast.lane.b32.xlu1 %v1241_v18, 264  ;;  %1243 = vbcast.lane.b32.xlu0 %v1241_v18, 256  ;;  %12002 = vst [vmem:[#allocation212_spill] sm:$0xff] %v8482_v61 }
 0x1d0   :  { %12003 = vst [vmem:[#allocation213_spill] sm:$0xff] %v8485_v40  ;;  %v8488_v37 = vrot.slane %v4128_v62, %v7356_v50  ;;  %12005 = vst [vmem:[#allocation215_spill] sm:$0xff] %v8491_v46  ;;  %v8494_v55 = vrot.slane %v3855_v33, %v7356_v50  ;;  %v8503_v63 = vrot.slane %v4144_v8, %v7356_v50 }
 0x1d1   :  { %v940_v6 = vpop.permute.xlu1 %939  ;;  %v8497_v0 = vrot.slane %v3856_v60, %v7356_v50  ;;  %v8500_v18 = vrot.slane %v3872_v52, %v7356_v50  ;;  %v936_v36 = vpop.permute.xlu0 %935  ;;  %v8506_v62 = vrot.slane %v3840_v1, %v7356_v50  ;;  %v1263_v60 = vrot.slane %v8402_v22, %v7275_v17 }
 0x1d2   :  { %12004 = vst [vmem:[#allocation214_spill] sm:$0xff] %v8488_v37  ;;  %12006 = vst [vmem:[#allocation216_spill] sm:$0xff] %v8494_v55 }
 0x1d3   :  { %12007 = vst [vmem:[#allocation217_spill] sm:$0xff] %v8497_v0  ;;  %12008 = vst [vmem:[#allocation218_spill] sm:$0xff] %v8500_v18  ;;  %1258 = vbcast.lane.b32.xlu1 %v1252_v53, 264  ;;  %1254 = vbcast.lane.b32.xlu0 %v1252_v53, 256  ;;  %v1274_v53 = vrot.slane %v8520_v19, %v7250_v3 }
 0x1d4   :  { %12009 = vst [vmem:[#allocation219_spill] sm:$0xff] %v8503_v63  ;;  %12010 = vst [vmem:[#allocation220_spill] sm:$0xff] %v8506_v62 }
 0x1d5   :  { %v951_v37 = vpop.permute.xlu1 %950  ;;  %v947_v41 = vpop.permute.xlu0 %946 }
 0x1d6   :  { %v4439_v8 = vcombine.low %v929_v21, %v951_v37  ;;  %v4440_v43 = vcombine.high %v929_v21, %v951_v37  ;;  %v4167_v1 = vcombine.low %v925_v26, %v947_v41  ;;  %v4168_v10 = vcombine.high %v925_v26, %v947_v41 }
 0x1d7   :  { %1269 = vbcast.lane.b32.xlu1 %v1263_v60, 264  ;;  %1265 = vbcast.lane.b32.xlu0 %v1263_v60, 256  ;;  %v1285_v37 = vrot.slane %v8520_v19, %v7247_v2 }
 0x1d8   :  { %v8533_v33 = vrot.slane %v4439_v8, %v7305_v56  ;;  %v8536_v18 = vrot.slane %v4440_v43, %v7305_v56  ;;  %v4175_v26 = vrot.slane %v4167_v1, %v7305_v56  ;;  %v8548_v43 = vrot.slane %v4168_v10, %v7305_v56 }
 0x1d9   :  { %v962_v23 = vpop.permute.xlu1 %961  ;;  %v958_v52 = vpop.permute.xlu0 %957  ;;  %v1296_v10 = vrot.slane %v8520_v19, %v7255_v7 }
 0x1da   :  { %12011 = vst [vmem:[#allocation221_spill] sm:$0xff] %v8533_v33  ;;  %12012 = vst [vmem:[#allocation222_spill] sm:$0xff] %v8536_v18  ;;  %v4455_v22 = vcombine.low %v940_v6, %v962_v23  ;;  %v4456_v62 = vcombine.high %v940_v6, %v962_v23  ;;  %v4183_v63 = vcombine.low %v936_v36, %v958_v52 }
 0x1db   :  { %v4184_v21 = vcombine.high %v936_v36, %v958_v52  ;;  %1280 = vbcast.lane.b32.xlu1 %v1274_v53, 264  ;;  %1276 = vbcast.lane.b32.xlu0 %v1274_v53, 256  ;;  %12015 = vst [vmem:[#allocation225_spill] sm:$0xff] %v8548_v43 }
 0x1dc   :  { %v8541_v60 = vrot.slane %v4455_v22, %v7305_v56  ;;  %v8544_v41 = vrot.slane %v4456_v62, %v7305_v56  ;;  %v4191_v23 = vrot.slane %v4183_v63, %v7305_v56 }
 0x1dd   :  { %v8552_v6 = vrot.slane %v4184_v21, %v7305_v56  ;;  %v973_v36 = vpop.permute.xlu1 %972  ;;  %v969_v62 = vpop.permute.xlu0 %968  ;;  %v1307_v21 = vrot.slane %v8520_v19, %v7259_v9 }
 0x1de   :  { %12013 = vst [vmem:[#allocation223_spill] sm:$0xff] %v8541_v60  ;;  %12014 = vst [vmem:[#allocation224_spill] sm:$0xff] %v8544_v41  ;;  %v4504_v52 = vcombine.high %v8533_v33, %v8541_v60  ;;  %v4520_v8 = vcombine.high %v8536_v18, %v8544_v41  ;;  %v4232_v22 = vcombine.high %v4175_v26, %v4191_v23 }
 0x1df   :  { %12016 = vst [vmem:[#allocation226_spill] sm:$0xff] %v8552_v6  ;;  %v4248_v1 = vcombine.high %v8548_v43, %v8552_v6  ;;  %1291 = vbcast.lane.b32.xlu1 %v1285_v37, 264  ;;  %1287 = vbcast.lane.b32.xlu0 %v1285_v37, 256  ;;  %v1318_v60 = vrot.slane %v8520_v19, %v7263_v11 }
 0x1e0   :  { %v4231_v31 = vcombine.low %v4175_v26, %v4191_v23 }
 0x1e1   :  { %v984_v63 = vpop.permute.xlu1 %983  ;;  %v980_v53 = vpop.permute.xlu0 %979 }
 0x1e3   :  { %1302 = vbcast.lane.b32.xlu1 %v1296_v10, 264  ;;  %1298 = vbcast.lane.b32.xlu0 %v1296_v10, 256 }
 0x1e5   :  { %v995_v46 = vpop.permute.xlu1 %994  ;;  %v991_v41 = vpop.permute.xlu0 %990 }
 0x1e6   :  { %v4471_v33 = vcombine.low %v973_v36, %v995_v46  ;;  %v4472_v18 = vcombine.high %v973_v36, %v995_v46  ;;  %v4199_v59 = vcombine.low %v969_v62, %v991_v41  ;;  %v4200_v27 = vcombine.high %v969_v62, %v991_v41 }
 0x1e7   :  { %1313 = vbcast.lane.b32.xlu1 %v1307_v21, 264  ;;  %1309 = vbcast.lane.b32.xlu0 %v1307_v21, 256  ;;  %v1329_v36 = vrot.slane %v8520_v19, %v7267_v13 }
 0x1e8   :  { %v8567_v37 = vrot.slane %v4471_v33, %v7305_v56  ;;  %v8570_v6 = vrot.slane %v4472_v18, %v7305_v56  ;;  %v4207_v18 = vrot.slane %v4199_v59, %v7305_v56  ;;  %v8582_v33 = vrot.slane %v4200_v27, %v7305_v56 }
 0x1e9   :  { %v1006_v43 = vpop.permute.xlu1 %1005  ;;  %v1002_v40 = vpop.permute.xlu0 %1001 }
 0x1ea   :  { %12017 = vst [vmem:[#allocation227_spill] sm:$0xff] %v8567_v37  ;;  %12018 = vst [vmem:[#allocation228_spill] sm:$0xff] %v8570_v6  ;;  %v4487_v0 = vcombine.low %v984_v63, %v1006_v43  ;;  %v4488_v10 = vcombine.high %v984_v63, %v1006_v43  ;;  %v4215_v4 = vcombine.low %v980_v53, %v1002_v40 }
 0x1eb   :  { %v4216_v46 = vcombine.high %v980_v53, %v1002_v40  ;;  %1324 = vbcast.lane.b32.xlu1 %v1318_v60, 264  ;;  %1320 = vbcast.lane.b32.xlu0 %v1318_v60, 256  ;;  %12021 = vst [vmem:[#allocation231_spill] sm:$0xff] %v8582_v33  ;;  %v8593_v60 = vrot.slane %v4504_v52, %v7356_v50 }
 0x1ec   :  { %v8575_v21 = vrot.slane %v4487_v0, %v7305_v56  ;;  %v8578_v41 = vrot.slane %v4488_v10, %v7305_v56  ;;  %v4223_v43 = vrot.slane %v4215_v4, %v7305_v56  ;;  %v1340_v4 = vrot.slane %v8520_v19, %v7271_v15 }
 0x1ed   :  { %v8586_v40 = vrot.slane %v4216_v46, %v7305_v56  ;;  %v1017_v62 = vpop.permute.xlu1 %1016  ;;  %v1013_v23 = vpop.permute.xlu0 %1012  ;;  %12023 = vst [vmem:[#allocation233_spill] sm:$0xff] %v8593_v60  ;;  %v8600_v53 = vrot.slane %v4231_v31, %v7356_v50  ;;  %v8603_v10 = vrot.slane %v4232_v22, %v7356_v50  ;;  %v8609_v52 = vrot.slane %v4520_v8, %v7356_v50 }
 0x1ee   :  { %12019 = vst [vmem:[#allocation229_spill] sm:$0xff] %v8575_v21  ;;  %12020 = vst [vmem:[#allocation230_spill] sm:$0xff] %v8578_v41  ;;  %v4536_v26 = vcombine.high %v8567_v37, %v8575_v21  ;;  %v4552_v0 = vcombine.high %v8570_v6, %v8578_v41  ;;  %v4263_v59 = vcombine.low %v4207_v18, %v4223_v43  ;;  %v8638_v41 = vld [vmem:[#allocation2 + $0x78] sm:$0xff] }
 0x1ef   :  { %12022 = vst [vmem:[#allocation232_spill] sm:$0xff] %v8586_v40  ;;  %v4264_v63 = vcombine.high %v4207_v18, %v4223_v43  ;;  %v4280_v27 = vcombine.high %v8582_v33, %v8586_v40  ;;  %1335 = vbcast.lane.b32.xlu1 %v1329_v36, 264  ;;  %1331 = vbcast.lane.b32.xlu0 %v1329_v36, 256  ;;  %12024 = vst [vmem:[#allocation234_spill] sm:$0xff] %v8600_v53 }
 0x1f0   :  { %v8606_v46 = vrot.slane %v4536_v26, %v7356_v50  ;;  %12026 = vst [vmem:[#allocation236_spill] sm:$0xff] %v8609_v52  ;;  %v8612_v43 = vrot.slane %v4263_v59, %v7356_v50  ;;  %v8621_v31 = vrot.slane %v4552_v0, %v7356_v50  ;;  %v8624_v26 = vrot.slane %v4248_v1, %v7356_v50 }
 0x1f1   :  { %v1028_v18 = vpop.permute.xlu1 %1027  ;;  %v8615_v6 = vrot.slane %v4264_v63, %v7356_v50  ;;  %v8618_v36 = vrot.slane %v4280_v27, %v7356_v50  ;;  %v1024_v22 = vpop.permute.xlu0 %1023  ;;  %v1351_v63 = vrot.slane %v8520_v19, %v7275_v17 }
 0x1f2   :  { %12025 = vst [vmem:[#allocation235_spill] sm:$0xff] %v8606_v46  ;;  %12027 = vst [vmem:[#allocation237_spill] sm:$0xff] %v8612_v43 }
 0x1f3   :  { %12028 = vst [vmem:[#allocation238_spill] sm:$0xff] %v8618_v36  ;;  %12029 = vst [vmem:[#allocation239_spill] sm:$0xff] %v8621_v31  ;;  %1346 = vbcast.lane.b32.xlu1 %v1340_v4, 264  ;;  %1342 = vbcast.lane.b32.xlu0 %v1340_v4, 256  ;;  %v1362_v4 = vrot.slane %v8638_v41, %v7250_v3 }
 0x1f4   :  { %12030 = vst [vmem:[#allocation240_spill] sm:$0xff] %v8624_v26 }
 0x1f5   :  { %v1039_v46 = vpop.permute.xlu1 %1038  ;;  %v1035_v37 = vpop.permute.xlu0 %1034 }
 0x1f6   :  { %v4575_v0 = vcombine.low %v1017_v62, %v1039_v46  ;;  %v4576_v60 = vcombine.high %v1017_v62, %v1039_v46  ;;  %v4303_v1 = vcombine.low %v1013_v23, %v1035_v37  ;;  %v4304_v8 = vcombine.high %v1013_v23, %v1035_v37 }
 0x1f7   :  { %1357 = vbcast.lane.b32.xlu1 %v1351_v63, 264  ;;  %1353 = vbcast.lane.b32.xlu0 %v1351_v63, 256  ;;  %v1373_v46 = vrot.slane %v8638_v41, %v7247_v2 }
 0x1f8   :  { %v8651_v59 = vrot.slane %v4575_v0, %v7305_v56  ;;  %v8654_v36 = vrot.slane %v4576_v60, %v7305_v56  ;;  %v4311_v23 = vrot.slane %v4303_v1, %v7305_v56  ;;  %v8666_v60 = vrot.slane %v4304_v8, %v7305_v56 }
 0x1f9   :  { %v1050_v21 = vpop.permute.xlu1 %1049  ;;  %v1046_v27 = vpop.permute.xlu0 %1045  ;;  %v1384_v8 = vrot.slane %v8638_v41, %v7255_v7 }
 0x1fa   :  { %12031 = vst [vmem:[#allocation241_spill] sm:$0xff] %v8651_v59  ;;  %12032 = vst [vmem:[#allocation242_spill] sm:$0xff] %v8654_v36  ;;  %v4591_v19 = vcombine.low %v1028_v18, %v1050_v21  ;;  %v4592_v26 = vcombine.high %v1028_v18, %v1050_v21  ;;  %v4319_v31 = vcombine.low %v1024_v22, %v1046_v27 }
 0x1fb   :  { %v4320_v62 = vcombine.high %v1024_v22, %v1046_v27  ;;  %1368 = vbcast.lane.b32.xlu1 %v1362_v4, 264  ;;  %1364 = vbcast.lane.b32.xlu0 %v1362_v4, 256  ;;  %12035 = vst [vmem:[#allocation245_spill] sm:$0xff] %v8666_v60 }
 0x1fc   :  { %v8659_v3 = vrot.slane %v4591_v19, %v7305_v56  ;;  %v8662_v37 = vrot.slane %v4592_v26, %v7305_v56  ;;  %v4327_v21 = vrot.slane %v4319_v31, %v7305_v56  ;;  %v1395_v19 = vrot.slane %v8638_v41, %v7259_v9 }
 0x1fd   :  { %v8670_v18 = vrot.slane %v4320_v62, %v7305_v56  ;;  %v1061_v22 = vpop.permute.xlu1 %1060  ;;  %v1057_v26 = vpop.permute.xlu0 %1056 }
 0x1fe   :  { %12033 = vst [vmem:[#allocation243_spill] sm:$0xff] %v8659_v3  ;;  %12034 = vst [vmem:[#allocation244_spill] sm:$0xff] %v8662_v37  ;;  %v4640_v2 = vcombine.high %v8651_v59, %v8659_v3  ;;  %v4368_v27 = vcombine.high %v4311_v23, %v4327_v21  ;;  %v1406_v59 = vrot.slane %v8638_v41, %v7263_v11 }
 0x1ff   :  { %12036 = vst [vmem:[#allocation246_spill] sm:$0xff] %v8670_v18  ;;  %v4384_v0 = vcombine.high %v8666_v60, %v8670_v18  ;;  %1379 = vbcast.lane.b32.xlu1 %v1373_v46, 264  ;;  %1375 = vbcast.lane.b32.xlu0 %v1373_v46, 256  ;;  %v4367_v11 = vcombine.low %v4311_v23, %v4327_v21 }
 0x201   :  { %v1072_v31 = vpop.permute.xlu1 %1071  ;;  %v1068_v1 = vpop.permute.xlu0 %1067 }
 0x203   :  { %1390 = vbcast.lane.b32.xlu1 %v1384_v8, 264  ;;  %1386 = vbcast.lane.b32.xlu0 %v1384_v8, 256 }
 0x205   :  { %v1083_v4 = vpop.permute.xlu1 %1082  ;;  %v1079_v52 = vpop.permute.xlu0 %1078 }
 0x206   :  { %v4607_v62 = vcombine.low %v1061_v22, %v1083_v4  ;;  %v4608_v63 = vcombine.high %v1061_v22, %v1083_v4  ;;  %v4335_v3 = vcombine.low %v1057_v26, %v1079_v52  ;;  %v4336_v60 = vcombine.high %v1057_v26, %v1079_v52 }
 0x207   :  { %1401 = vbcast.lane.b32.xlu1 %v1395_v19, 264  ;;  %1397 = vbcast.lane.b32.xlu0 %v1395_v19, 256  ;;  %v1417_v4 = vrot.slane %v8638_v41, %v7267_v13 }
 0x208   :  { %v8685_v46 = vrot.slane %v4607_v62, %v7305_v56  ;;  %v8688_v18 = vrot.slane %v4608_v63, %v7305_v56  ;;  %v4343_v63 = vrot.slane %v4335_v3, %v7305_v56  ;;  %v8700_v26 = vrot.slane %v4336_v60, %v7305_v56 }
 0x209   :  { %v1094_v7 = vpop.permute.xlu1 %1093  ;;  %v1090_v33 = vpop.permute.xlu0 %1089 }
 0x20a   :  { %12037 = vst [vmem:[#allocation247_spill] sm:$0xff] %v8685_v46  ;;  %12038 = vst [vmem:[#allocation248_spill] sm:$0xff] %v8688_v18  ;;  %v4623_v9 = vcombine.low %v1072_v31, %v1094_v7  ;;  %v4624_v8 = vcombine.high %v1072_v31, %v1094_v7  ;;  %v4351_v40 = vcombine.low %v1068_v1, %v1090_v33 }
 0x20b   :  { %v4352_v22 = vcombine.high %v1068_v1, %v1090_v33  ;;  %1412 = vbcast.lane.b32.xlu1 %v1406_v59, 264  ;;  %1408 = vbcast.lane.b32.xlu0 %v1406_v59, 256  ;;  %v8711_v59 = vrot.slane %v4640_v2, %v7356_v50  ;;  %v8718_v7 = vrot.slane %v4367_v11, %v7356_v50 }
 0x20c   :  { %v8693_v19 = vrot.slane %v4623_v9, %v7305_v56  ;;  %v8696_v52 = vrot.slane %v4624_v8, %v7305_v56  ;;  %v4359_v31 = vrot.slane %v4351_v40, %v7305_v56  ;;  %v1428_v40 = vrot.slane %v8638_v41, %v7271_v15 }
 0x20d   :  { %v8704_v33 = vrot.slane %v4352_v22, %v7305_v56  ;;  %v1105_v1 = vpop.permute.xlu1 %1104  ;;  %v1101_v21 = vpop.permute.xlu0 %1100  ;;  %12041 = vst [vmem:[#allocation251_spill] sm:$0xff] %v8711_v59  ;;  %12042 = vst [vmem:[#allocation252_spill] sm:$0xff] %v8718_v7  ;;  %v8727_v22 = vrot.slane %v4368_v27, %v7356_v50  ;;  %v8738_v11 = vrot.slane %v4384_v0, %v7356_v50 }
 0x20e   :  { %12039 = vst [vmem:[#allocation249_spill] sm:$0xff] %v8693_v19  ;;  %12040 = vst [vmem:[#allocation250_spill] sm:$0xff] %v8696_v52  ;;  %v4672_v13 = vcombine.high %v8685_v46, %v8693_v19  ;;  %v4688_v23 = vcombine.high %v8688_v18, %v8696_v52  ;;  %v4399_v3 = vcombine.low %v4343_v63, %v4359_v31 }
 0x20f   :  { %v4400_v62 = vcombine.high %v4343_v63, %v4359_v31  ;;  %v4416_v60 = vcombine.high %v8700_v26, %v8704_v33  ;;  %1423 = vbcast.lane.b32.xlu1 %v1417_v4, 264  ;;  %1419 = vbcast.lane.b32.xlu0 %v1417_v4, 256  ;;  %v1439_v4 = vrot.slane %v8638_v41, %v7275_v17 }
 0x210   :  { %v8721_v9 = vrot.slane %v4672_v13, %v7356_v50  ;;  %v8724_v2 = vrot.slane %v4399_v3, %v7356_v50  ;;  %12046 = vst [vmem:[#allocation256_spill] sm:$0xff] %v8738_v11  ;;  %v12047_v17 = vcombine.high %v8654_v36, %v8662_v37  ;;  %v8761_v13 = vrot.slane %v4688_v23, %v7356_v50 }
 0x211   :  { %v1116_v8 = vpop.permute.xlu1 %1115  ;;  %v8730_v63 = vrot.slane %v4400_v62, %v7356_v50  ;;  %v8733_v31 = vrot.slane %v4416_v60, %v7356_v50  ;;  %v1112_v15 = vpop.permute.xlu0 %1111  ;;  %v1712_v27 = vcombine.high %v7513_v39, %v7519_v44  ;;  %v1576_v23 = vcombine.high %v7385_v12, %v7394_v28 }
 0x212   :  { %12043 = vst [vmem:[#allocation253_spill] sm:$0xff] %v8721_v9  ;;  %12044 = vst [vmem:[#allocation254_spill] sm:$0xff] %v8724_v2  ;;  %v8754_v41 = vrot.slane %v12047_v17, %v7356_v50 }
 0x213   :  { %12045 = vst [vmem:[#allocation255_spill] sm:$0xff] %v8733_v31  ;;  %1434 = vbcast.lane.b32.xlu1 %v1428_v40, 264  ;;  %1430 = vbcast.lane.b32.xlu0 %v1428_v40, 256  ;;  %12049 = vst [vmem:[#allocation258_spill] sm:$0xff] %v8761_v13 }
 0x214   :  { %12048 = vst [vmem:[#allocation257_spill] sm:$0xff] %v8754_v41  ;;  %v2664_v41 = vcombine.high %v7880_v51, %v7886_v24 }
 0x215   :  { %v1127_v3 = vpop.permute.xlu1 %1126  ;;  %v1123_v60 = vpop.permute.xlu0 %1122 }
 0x216   :  { %v4983_v62 = vcombine.low %v1105_v1, %v1127_v3  ;;  %v4984_v18 = vcombine.high %v1105_v1, %v1127_v3  ;;  %v4711_v17 = vcombine.low %v1101_v21, %v1123_v60  ;;  %v4712_v0 = vcombine.high %v1101_v21, %v1123_v60 }
 0x217   :  { %1445 = vbcast.lane.b32.xlu1 %v1439_v4, 264  ;;  %1441 = vbcast.lane.b32.xlu0 %v1439_v4, 256 }
 0x218   :  { %v8772_v1 = vrot.slane %v4983_v62, %v7305_v56  ;;  %v8775_v3 = vrot.slane %v4984_v18, %v7305_v56  ;;  %v2256_v18 = vcombine.high %v7759_v42, %v7765_v35  ;;  %v4719_v62 = vrot.slane %v4711_v17, %v7305_v56 }
 0x219   :  { %v1138_v36 = vpop.permute.xlu1 %1137  ;;  %v1134_v9 = vpop.permute.xlu0 %1133  ;;  %v3344_v42 = vcombine.high %v8243_v45, %v8249_v54 }
 0x21a   :  { %12050 = vst [vmem:[#allocation259_spill] sm:$0xff] %v8772_v1  ;;  %12051 = vst [vmem:[#allocation260_spill] sm:$0xff] %v8775_v3  ;;  %v4999_v52 = vcombine.low %v1116_v8, %v1138_v36  ;;  %v5000_v37 = vcombine.high %v1116_v8, %v1138_v36  ;;  %v4727_v40 = vcombine.low %v1112_v15, %v1134_v9 }
 0x21b   :  { %v4728_v4 = vcombine.high %v1112_v15, %v1134_v9  ;;  %5817 = vrot.lane.b32.xlu1 %v1712_v27, %s7203_s0  ;;  %5815 = vrot.lane.b32.xlu0 %v1576_v23, %s7203_s0  ;;  %v8789_v36 = vrot.slane %v4712_v0, %v7305_v56  ;;  %v2120_v23 = vcombine.high %v7638_v47, %v7644_v16 }
 0x21c   :  { %v8779_v21 = vrot.slane %v4999_v52, %v7305_v56  ;;  %v8782_v60 = vrot.slane %v5000_v37, %v7305_v56  ;;  %v4735_v9 = vrot.slane %v4727_v40, %v7305_v56 }
 0x21d   :  { %v8793_v8 = vrot.slane %v4728_v4, %v7305_v56  ;;  %v1149_v52 = vpop.permute.xlu1 %1148  ;;  %v1145_v27 = vpop.permute.xlu0 %1144  ;;  %v2800_v4 = vcombine.high %v8001_v38, %v8007_v20 }
 0x21e   :  { %12052 = vst [vmem:[#allocation261_spill] sm:$0xff] %v8779_v21  ;;  %12053 = vst [vmem:[#allocation262_spill] sm:$0xff] %v8782_v60  ;;  %v5048_v37 = vcombine.high %v8772_v1, %v8779_v21  ;;  %v5064_v15 = vcombine.high %v8775_v3, %v8782_v60  ;;  %v4776_v17 = vcombine.high %v4719_v62, %v4735_v9  ;;  %v12103_v21 = vld [vmem:[#allocation150_spill] sm:$0xff] }
 0x21f   :  { %v4792_v0 = vcombine.high %v8789_v36, %v8793_v8  ;;  %5821 = vrot.lane.b32.xlu1 %v2256_v18, %s7203_s0  ;;  %5819 = vrot.lane.b32.xlu0 %v2120_v23, %s7203_s0  ;;  %v3208_v23 = vcombine.high %v8122_v14, %v8128_v5 }
 0x221   :  { %v1160_v40 = vpop.permute.xlu1 %1159  ;;  %v1156_v13 = vpop.permute.xlu0 %1155 }
 0x223   :  { %5825 = vrot.lane.b32.xlu1 %v2800_v4, %s7203_s0  ;;  %5823 = vrot.lane.b32.xlu0 %v2664_v41, %s7203_s0  ;;  %v3888_v41 = vcombine.high %v8482_v61, %v8494_v55  ;;  %v3752_v4 = vcombine.high %v8364_v32, %v8376_v58 }
 0x225   :  { %v1171_v35 = vpop.permute.xlu1 %1170  ;;  %v1167_v39 = vpop.permute.xlu0 %1166 }
 0x226   :  { %v5015_v44 = vcombine.low %v1149_v52, %v1171_v35  ;;  %v5016_v18 = vcombine.high %v1149_v52, %v1171_v35  ;;  %v4743_v20 = vcombine.low %v1145_v27, %v1167_v39  ;;  %v4744_v38 = vcombine.high %v1145_v27, %v1167_v39 }
 0x227   :  { %5829 = vrot.lane.b32.xlu1 %v3344_v42, %s7203_s0  ;;  %5827 = vrot.lane.b32.xlu0 %v3208_v23, %s7203_s0  ;;  %v4775_v39 = vcombine.low %v4719_v62, %v4735_v9 }
 0x228   :  { %v8822_v54 = vrot.slane %v5015_v44, %v7305_v56  ;;  %v8825_v35 = vrot.slane %v5016_v18, %v7305_v56  ;;  %v4432_v44 = vcombine.high %v8718_v7, %v8724_v2  ;;  %v4751_v18 = vrot.slane %v4743_v20, %v7305_v56 }
 0x229   :  { %v1182_v24 = vpop.permute.xlu1 %1181  ;;  %v1178_v42 = vpop.permute.xlu0 %1177  ;;  %v8852_v20 = vrot.slane %v5048_v37, %v7356_v50  ;;  %v8868_v37 = vrot.slane %v5064_v15, %v7356_v50 }
 0x22a   :  { %12054 = vst [vmem:[#allocation263_spill] sm:$0xff] %v8822_v54  ;;  %12055 = vst [vmem:[#allocation264_spill] sm:$0xff] %v8825_v35  ;;  %v5031_v52 = vcombine.low %v1160_v40, %v1182_v24  ;;  %v5032_v45 = vcombine.high %v1160_v40, %v1182_v24  ;;  %v4759_v5 = vcombine.low %v1156_v13, %v1178_v42 }
 0x22b   :  { %v4760_v23 = vcombine.high %v1156_v13, %v1178_v42  ;;  %5833 = vrot.lane.b32.xlu1 %v3888_v41, %s7203_s0  ;;  %5831 = vrot.lane.b32.xlu0 %v3752_v4, %s7203_s0  ;;  %v8839_v24 = vrot.slane %v4744_v38, %v7305_v56  ;;  %v4296_v4 = vcombine.high %v8600_v53, %v8612_v43 }
 0x22c   :  { %v8829_v27 = vrot.slane %v5031_v52, %v7305_v56  ;;  %v8832_v55 = vrot.slane %v5032_v45, %v7305_v56  ;;  %v4767_v13 = vrot.slane %v4759_v5, %v7305_v56  ;;  %12058 = vst [vmem:[#allocation267_spill] sm:$0xff] %v8852_v20  ;;  %v8859_v42 = vrot.slane %v4775_v39, %v7356_v50 }
 0x22d   :  { %v8843_v62 = vrot.slane %v4760_v23, %v7305_v56  ;;  %v1193_v9 = vpop.permute.xlu1 %1192  ;;  %v1189_v41 = vpop.permute.xlu0 %1188  ;;  %v8862_v23 = vrot.slane %v4776_v17, %v7356_v50  ;;  %12061 = vst [vmem:[#allocation270_spill] sm:$0xff] %v8868_v37 }
 0x22e   :  { %12056 = vst [vmem:[#allocation265_spill] sm:$0xff] %v8829_v27  ;;  %12057 = vst [vmem:[#allocation266_spill] sm:$0xff] %v8832_v55  ;;  %v5080_v45 = vcombine.high %v8822_v54, %v8829_v27  ;;  %v5096_v40 = vcombine.high %v8825_v35, %v8832_v55  ;;  %v4807_v38 = vcombine.low %v4751_v18, %v4767_v13 }
 0x22f   :  { %v4808_v52 = vcombine.high %v4751_v18, %v4767_v13  ;;  %v4824_v5 = vcombine.high %v8839_v24, %v8843_v62  ;;  %5837 = vrot.lane.b32.xlu1 %v4432_v44, %s7203_s0  ;;  %5835 = vrot.lane.b32.xlu0 %v4296_v4, %s7203_s0  ;;  %12059 = vst [vmem:[#allocation268_spill] sm:$0xff] %v8859_v42 }
 0x230   :  { %v8865_v2 = vrot.slane %v5080_v45, %v7356_v50  ;;  %v8871_v13 = vrot.slane %v4807_v38, %v7356_v50  ;;  %v8880_v39 = vrot.slane %v5096_v40, %v7356_v50  ;;  %v8883_v45 = vrot.slane %v4792_v0, %v7356_v50 }
 0x231   :  { %v1204_v18 = vpop.permute.xlu1 %1203  ;;  %v8874_v44 = vrot.slane %v4808_v52, %v7356_v50  ;;  %v8877_v4 = vrot.slane %v4824_v5, %v7356_v50  ;;  %v1200_v17 = vpop.permute.xlu0 %1199 }
 0x232   :  { %12060 = vst [vmem:[#allocation269_spill] sm:$0xff] %v8865_v2  ;;  %12062 = vst [vmem:[#allocation271_spill] sm:$0xff] %v8871_v13  ;;  %v4840_v52 = vcombine.high %v8859_v42, %v8871_v13 }
 0x233   :  { %12063 = vst [vmem:[#allocation272_spill] sm:$0xff] %v8880_v39 }
 0x234   :  { %5839 = vrot.lane.b32.xlu0 %v4840_v52, %s7203_s0 }
 0x235   :  { %v1215_v38 = vpop.permute.xlu1 %1214  ;;  %v1211_v13 = vpop.permute.xlu0 %1210 }
 0x236   :  { %v5119_v43 = vcombine.low %v1193_v9, %v1215_v38  ;;  %v5120_v40 = vcombine.high %v1193_v9, %v1215_v38  ;;  %v4847_v42 = vcombine.low %v1189_v41, %v1211_v13  ;;  %v4848_v7 = vcombine.high %v1189_v41, %v1211_v13 }
 0x238   :  { %v8907_v0 = vrot.slane %v5119_v43, %v7305_v56  ;;  %v8910_v15 = vrot.slane %v5120_v40, %v7305_v56  ;;  %v4855_v41 = vrot.slane %v4847_v42, %v7305_v56  ;;  %v8920_v13 = vrot.slane %v4848_v7, %v7305_v56 }
 0x239   :  { %v1226_v53 = vpop.permute.xlu1 %1225  ;;  %v1222_v32 = vpop.permute.xlu0 %1221 }
 0x23a   :  { %12064 = vst [vmem:[#allocation273_spill] sm:$0xff] %v8907_v0  ;;  %12065 = vst [vmem:[#allocation274_spill] sm:$0xff] %v8910_v15  ;;  %v5135_v52 = vcombine.low %v1204_v18, %v1226_v53  ;;  %v5136_v58 = vcombine.high %v1204_v18, %v1226_v53  ;;  %v4863_v14 = vcombine.low %v1200_v17, %v1222_v32 }
 0x23b   :  { %v4864_v61 = vcombine.high %v1200_v17, %v1222_v32 }
 0x23c   :  { %v8913_v51 = vrot.slane %v5135_v52, %v7305_v56  ;;  %v8916_v9 = vrot.slane %v5136_v58, %v7305_v56  ;;  %v4871_v43 = vrot.slane %v4863_v14, %v7305_v56 }
 0x23d   :  { %v8924_v38 = vrot.slane %v4864_v61, %v7305_v56  ;;  %v1237_v53 = vpop.permute.xlu1 %1236  ;;  %v1233_v17 = vpop.permute.xlu0 %1232 }
 0x23e   :  { %12066 = vst [vmem:[#allocation275_spill] sm:$0xff] %v8913_v51  ;;  %12067 = vst [vmem:[#allocation276_spill] sm:$0xff] %v8916_v9  ;;  %v5184_v32 = vcombine.high %v8907_v0, %v8913_v51  ;;  %v5200_v18 = vcombine.high %v8910_v15, %v8916_v9  ;;  %v4912_v58 = vcombine.high %v4855_v41, %v4871_v43 }
 0x23f   :  { %v4928_v42 = vcombine.high %v8920_v13, %v8924_v38  ;;  %v4911_v3 = vcombine.low %v4855_v41, %v4871_v43 }
 0x241   :  { %v1248_v40 = vpop.permute.xlu1 %1247  ;;  %v1244_v7 = vpop.permute.xlu0 %1243 }
 0x245   :  { %v1259_v52 = vpop.permute.xlu1 %1258  ;;  %v1255_v39 = vpop.permute.xlu0 %1254 }
 0x246   :  { %v5151_v5 = vcombine.low %v1237_v53, %v1259_v52  ;;  %v5152_v14 = vcombine.high %v1237_v53, %v1259_v52  ;;  %v4879_v61 = vcombine.low %v1233_v17, %v1255_v39  ;;  %v4880_v37 = vcombine.high %v1233_v17, %v1255_v39 }
 0x248   :  { %v8933_v47 = vrot.slane %v5151_v5, %v7305_v56  ;;  %v8936_v28 = vrot.slane %v5152_v14, %v7305_v56  ;;  %v4887_v39 = vrot.slane %v4879_v61, %v7305_v56  ;;  %v8946_v5 = vrot.slane %v4880_v37, %v7305_v56 }
 0x249   :  { %v1270_v16 = vpop.permute.xlu1 %1269  ;;  %v1266_v9 = vpop.permute.xlu0 %1265  ;;  %v8971_v14 = vrot.slane %v5200_v18, %v7356_v50 }
 0x24a   :  { %12068 = vst [vmem:[#allocation277_spill] sm:$0xff] %v8933_v47  ;;  %12069 = vst [vmem:[#allocation278_spill] sm:$0xff] %v8936_v28  ;;  %v5167_v12 = vcombine.low %v1248_v40, %v1270_v16  ;;  %v5168_v15 = vcombine.high %v1248_v40, %v1270_v16  ;;  %v4895_v35 = vcombine.low %v1244_v7, %v1266_v9 }
 0x24b   :  { %v4896_v55 = vcombine.high %v1244_v7, %v1266_v9  ;;  %12075 = vst [vmem:[#allocation284_spill] sm:$0xff] %v8971_v14 }
 0x24c   :  { %v8939_v60 = vrot.slane %v5167_v12, %v7305_v56  ;;  %v8942_v53 = vrot.slane %v5168_v15, %v7305_v56  ;;  %v4903_v17 = vrot.slane %v4895_v35, %v7305_v56  ;;  %v8957_v15 = vrot.slane %v5184_v32, %v7356_v50 }
 0x24d   :  { %v8950_v52 = vrot.slane %v4896_v55, %v7305_v56  ;;  %v1281_v16 = vpop.permute.xlu1 %1280  ;;  %v1277_v41 = vpop.permute.xlu0 %1276  ;;  %v8962_v35 = vrot.slane %v4911_v3, %v7356_v50  ;;  %v8965_v55 = vrot.slane %v4912_v58, %v7356_v50 }
 0x24e   :  { %12070 = vst [vmem:[#allocation279_spill] sm:$0xff] %v8939_v60  ;;  %12071 = vst [vmem:[#allocation280_spill] sm:$0xff] %v8942_v53  ;;  %v5216_v9 = vcombine.high %v8933_v47, %v8939_v60  ;;  %v5232_v12 = vcombine.high %v8936_v28, %v8942_v53  ;;  %v4943_v43 = vcombine.low %v4887_v39, %v4903_v17 }
 0x24f   :  { %12072 = vst [vmem:[#allocation281_spill] sm:$0xff] %v8957_v15  ;;  %v4944_v40 = vcombine.high %v4887_v39, %v4903_v17  ;;  %v4960_v37 = vcombine.high %v8946_v5, %v8950_v52  ;;  %12073 = vst [vmem:[#allocation282_spill] sm:$0xff] %v8962_v35 }
 0x250   :  { %v8968_v7 = vrot.slane %v5216_v9, %v7356_v50  ;;  %v8974_v32 = vrot.slane %v4943_v43, %v7356_v50  ;;  %v8983_v3 = vrot.slane %v5232_v12, %v7356_v50  ;;  %v8986_v9 = vrot.slane %v4928_v42, %v7356_v50 }
 0x251   :  { %v1292_v61 = vpop.permute.xlu1 %1291  ;;  %v8977_v39 = vrot.slane %v4944_v40, %v7356_v50  ;;  %v8980_v17 = vrot.slane %v4960_v37, %v7356_v50  ;;  %v1288_v58 = vpop.permute.xlu0 %1287 }
 0x252   :  { %12074 = vst [vmem:[#allocation283_spill] sm:$0xff] %v8968_v7  ;;  %12076 = vst [vmem:[#allocation285_spill] sm:$0xff] %v8974_v32  ;;  %v4976_v40 = vcombine.high %v8962_v35, %v8974_v32 }
 0x253   :  { %12077 = vst [vmem:[#allocation286_spill] sm:$0xff] %v8980_v17  ;;  %12078 = vst [vmem:[#allocation287_spill] sm:$0xff] %v8983_v3 }
 0x254   :  { %12079 = vst [vmem:[#allocation288_spill] sm:$0xff] %v8986_v9  ;;  %5841 = vrot.lane.b32.xlu1 %v4976_v40, %s7203_s0 }
 0x255   :  { %v1303_v43 = vpop.permute.xlu1 %1302  ;;  %v1299_v32 = vpop.permute.xlu0 %1298 }
 0x256   :  { %v5527_v7 = vcombine.low %v1281_v16, %v1303_v43  ;;  %v5528_v12 = vcombine.high %v1281_v16, %v1303_v43  ;;  %v5256_v35 = vcombine.high %v1277_v41, %v1299_v32  ;;  %v5255_v20 = vcombine.low %v1277_v41, %v1299_v32 }
 0x258   :  { %v9010_v15 = vrot.slane %v5527_v7, %v7305_v56  ;;  %v9013_v42 = vrot.slane %v5528_v12, %v7305_v56  ;;  %v9022_v16 = vrot.slane %v5256_v35, %v7305_v56  ;;  %v9037_v51 = vrot.slane %v5255_v20, %v7305_v56 }
 0x259   :  { %v1314_v28 = vpop.permute.xlu1 %1313  ;;  %v1310_v59 = vpop.permute.xlu0 %1309 }
 0x25a   :  { %12080 = vst [vmem:[#allocation289_spill] sm:$0xff] %v9010_v15  ;;  %12081 = vst [vmem:[#allocation290_spill] sm:$0xff] %v9013_v42  ;;  %v5543_v18 = vcombine.low %v1292_v61, %v1314_v28  ;;  %v5544_v40 = vcombine.high %v1292_v61, %v1314_v28  ;;  %v5272_v2 = vcombine.high %v1288_v58, %v1310_v59 }
 0x25b   :  { %v5271_v14 = vcombine.low %v1288_v58, %v1310_v59 }
 0x25c   :  { %v9016_v53 = vrot.slane %v5543_v18, %v7305_v56  ;;  %v9019_v37 = vrot.slane %v5544_v40, %v7305_v56  ;;  %v9025_v43 = vrot.slane %v5272_v2, %v7305_v56 }
 0x25d   :  { %v1325_v7 = vpop.permute.xlu1 %1324  ;;  %v1321_v61 = vpop.permute.xlu0 %1320  ;;  %v9034_v0 = vrot.slane %v5271_v14, %v7305_v56 }
 0x25e   :  { %12082 = vst [vmem:[#allocation291_spill] sm:$0xff] %v9016_v53  ;;  %12083 = vst [vmem:[#allocation292_spill] sm:$0xff] %v9019_v37  ;;  %v5592_v12 = vcombine.high %v9010_v15, %v9016_v53  ;;  %v5608_v28 = vcombine.high %v9013_v42, %v9019_v37  ;;  %v5336_v18 = vcombine.high %v9022_v16, %v9025_v43 }
 0x25f   :  { %v5319_v14 = vcombine.low %v9037_v51, %v9034_v0 }
 0x261   :  { %v1336_v3 = vpop.permute.xlu1 %1335  ;;  %v1332_v40 = vpop.permute.xlu0 %1331 }
 0x265   :  { %v1347_v35 = vpop.permute.xlu1 %1346  ;;  %v1343_v2 = vpop.permute.xlu0 %1342 }
 0x266   :  { %v5559_v47 = vcombine.low %v1325_v7, %v1347_v35  ;;  %v5560_v60 = vcombine.high %v1325_v7, %v1347_v35  ;;  %v5287_v46 = vcombine.low %v1321_v61, %v1343_v2  ;;  %v5288_v42 = vcombine.high %v1321_v61, %v1343_v2 }
 0x268   :  { %v9040_v19 = vrot.slane %v5559_v47, %v7305_v56  ;;  %v9043_v15 = vrot.slane %v5560_v60, %v7305_v56  ;;  %v9054_v47 = vrot.slane %v5287_v46, %v7305_v56  ;;  %v9057_v60 = vrot.slane %v5288_v42, %v7305_v56 }
 0x269   :  { %v1358_v37 = vpop.permute.xlu1 %1357  ;;  %v1354_v32 = vpop.permute.xlu0 %1353  ;;  %v9070_v46 = vrot.slane %v5592_v12, %v7356_v50 }
 0x26a   :  { %12084 = vst [vmem:[#allocation293_spill] sm:$0xff] %v9040_v19  ;;  %12085 = vst [vmem:[#allocation294_spill] sm:$0xff] %v9043_v15  ;;  %v5575_v59 = vcombine.low %v1336_v3, %v1358_v37  ;;  %v5576_v41 = vcombine.high %v1336_v3, %v1358_v37  ;;  %v5303_v58 = vcombine.low %v1332_v40, %v1354_v32 }
 0x26b   :  { %v5304_v7 = vcombine.high %v1332_v40, %v1354_v32  ;;  %12088 = vst [vmem:[#allocation297_spill] sm:$0xff] %v9070_v46 }
 0x26c   :  { %v9048_v20 = vrot.slane %v5575_v59, %v7305_v56  ;;  %v9051_v61 = vrot.slane %v5576_v41, %v7305_v56  ;;  %v9060_v3 = vrot.slane %v5303_v58, %v7305_v56  ;;  %v9080_v58 = vrot.slane %v5608_v28, %v7356_v50 }
 0x26d   :  { %v9063_v37 = vrot.slane %v5304_v7, %v7305_v56  ;;  %v1369_v40 = vpop.permute.xlu1 %1368  ;;  %v1365_v59 = vpop.permute.xlu0 %1364 }
 0x26e   :  { %12086 = vst [vmem:[#allocation295_spill] sm:$0xff] %v9048_v20  ;;  %12087 = vst [vmem:[#allocation296_spill] sm:$0xff] %v9051_v61  ;;  %v5624_v35 = vcombine.high %v9040_v19, %v9048_v20  ;;  %v5640_v2 = vcombine.high %v9043_v15, %v9051_v61  ;;  %v5351_v42 = vcombine.low %v9054_v47, %v9060_v3 }
 0x26f   :  { %v5368_v41 = vcombine.high %v9057_v60, %v9063_v37  ;;  %12090 = vst [vmem:[#allocation299_spill] sm:$0xff] %v9080_v58  ;;  %v9083_v19 = vrot.slane %v5319_v14, %v7356_v50 }
 0x270   :  { %v9077_v32 = vrot.slane %v5624_v35, %v7356_v50  ;;  %v9086_v15 = vrot.slane %v5351_v42, %v7356_v50  ;;  %v9092_v61 = vrot.slane %v5640_v2, %v7356_v50  ;;  %v9095_v35 = vrot.slane %v5336_v18, %v7356_v50 }
 0x271   :  { %v1380_v7 = vpop.permute.xlu1 %1379  ;;  %12091 = vst [vmem:[#allocation300_spill] sm:$0xff] %v9083_v19  ;;  %v9089_v12 = vrot.slane %v5368_v41, %v7356_v50  ;;  %v1376_v20 = vpop.permute.xlu0 %1375  ;;  %v12096_v41 = vcombine.low %v7397_v29, %v7400_v30 }
 0x272   :  { %12089 = vst [vmem:[#allocation298_spill] sm:$0xff] %v9077_v32  ;;  %12092 = vst [vmem:[#allocation301_spill] sm:$0xff] %v9086_v15  ;;  %v5384_v42 = vcombine.high %v9083_v19, %v9086_v15 }
 0x273   :  { %12093 = vst [vmem:[#allocation302_spill] sm:$0xff] %v9089_v12  ;;  %12094 = vst [vmem:[#allocation303_spill] sm:$0xff] %v9092_v61 }
 0x274   :  { %12095 = vst [vmem:[#allocation304_spill] sm:$0xff] %v9095_v35  ;;  %5843 = vrot.lane.b32.xlu0 %v5384_v42, %s7203_s0 }
 0x275   :  { %v1391_v18 = vpop.permute.xlu1 %1390  ;;  %v1387_v54 = vpop.permute.xlu0 %1386 }
 0x276   :  { %v5663_v32 = vcombine.low %v1369_v40, %v1391_v18  ;;  %v5664_v46 = vcombine.high %v1369_v40, %v1391_v18  ;;  %v5392_v27 = vcombine.high %v1365_v59, %v1387_v54 }
 0x278   :  { %5879 = vrot.lane.b32.xlu0 %v12096_v41, %s7204_s20  ;;  %v9119_v42 = vrot.slane %v5663_v32, %v7305_v56  ;;  %v9122_v2 = vrot.slane %v5664_v46, %v7305_v56  ;;  %v9131_v58 = vrot.slane %v5392_v27, %v7305_v56  ;;  %v12101_v46 = vcombine.low %v7647_v48, %v7650_v49 }
 0x279   :  { %v1402_v53 = vpop.permute.xlu1 %1401  ;;  %v1398_v14 = vpop.permute.xlu0 %1397 }
 0x27a   :  { %12097 = vst [vmem:[#allocation305_spill] sm:$0xff] %v9119_v42  ;;  %12098 = vst [vmem:[#allocation306_spill] sm:$0xff] %v9122_v2  ;;  %v5679_v28 = vcombine.low %v1380_v7, %v1402_v53  ;;  %v5680_v15 = vcombine.high %v1380_v7, %v1402_v53  ;;  %v5408_v61 = vcombine.high %v1376_v20, %v1398_v14 }
 0x27b   :  { %v5407_v1 = vcombine.low %v1376_v20, %v1398_v14  ;;  %v12105_v20 = vld [vmem:[#allocation191_spill] sm:$0xff] }
 0x27c   :  { %v9125_v40 = vrot.slane %v5679_v28, %v7305_v56  ;;  %v9128_v18 = vrot.slane %v5680_v15, %v7305_v56  ;;  %v9134_v41 = vrot.slane %v5408_v61, %v7305_v56  ;;  %5883 = vrot.lane.b32.xlu0 %v12101_v46, %s7204_s20  ;;  %v12102_v61 = vcombine.low %v7889_v25, %v7892_v34 }
 0x27d   :  { %v1413_v53 = vpop.permute.xlu1 %1412  ;;  %v1409_v15 = vpop.permute.xlu0 %1408  ;;  %v5391_v46 = vcombine.low %v1365_v59, %v1387_v54  ;;  %v9155_v9 = vrot.slane %v5407_v1, %v7305_v56  ;;  %v12106_v54 = vld [vmem:[#allocation195_spill] sm:$0xff] }
 0x27e   :  { %12099 = vst [vmem:[#allocation307_spill] sm:$0xff] %v9125_v40  ;;  %12100 = vst [vmem:[#allocation308_spill] sm:$0xff] %v9128_v18  ;;  %v5728_v32 = vcombine.high %v9119_v42, %v9125_v40  ;;  %v5744_v7 = vcombine.high %v9122_v2, %v9128_v18  ;;  %v5472_v27 = vcombine.high %v9131_v58, %v9134_v41 }
 0x27f   :  { %v12104_v42 = vcombine.low %v8131_v57, %v12103_v21  ;;  %v9158_v31 = vrot.slane %v5391_v46, %v7305_v56  ;;  %v12107_v59 = vcombine.low %v12105_v20, %v12106_v54  ;;  %v5352_v46 = vcombine.high %v9054_v47, %v9060_v3 }
 0x280   :  { %5887 = vrot.lane.b32.xlu0 %v12102_v61, %s7204_s20 }
 0x281   :  { %v1424_v28 = vpop.permute.xlu1 %1423  ;;  %v1420_v19 = vpop.permute.xlu0 %1419 }
 0x284   :  { %5891 = vrot.lane.b32.xlu0 %v12104_v42, %s7204_s20 }
 0x285   :  { %v1435_v40 = vpop.permute.xlu1 %1434  ;;  %v1431_v17 = vpop.permute.xlu0 %1430 }
 0x286   :  { %v5695_v2 = vcombine.low %v1413_v53, %v1435_v40  ;;  %v5696_v18 = vcombine.high %v1413_v53, %v1435_v40  ;;  %v5423_v61 = vcombine.low %v1409_v15, %v1431_v17  ;;  %v5424_v11 = vcombine.high %v1409_v15, %v1431_v17 }
 0x287   :  { %v5320_v15 = vcombine.high %v9037_v51, %v9034_v0  ;;  %v12109_v51 = vcombine.low %v8603_v10, %v8615_v6 }
 0x288   :  { %5895 = vrot.lane.b32.xlu0 %v12107_v59, %s7204_s20  ;;  %v9165_v42 = vrot.slane %v5695_v2, %v7305_v56  ;;  %v9168_v40 = vrot.slane %v5696_v18, %v7305_v56  ;;  %v5455_v59 = vcombine.low %v9158_v31, %v9155_v9 }
 0x289   :  { %v1446_v14 = vpop.permute.xlu1 %1445  ;;  %v1442_v12 = vpop.permute.xlu0 %1441 }
 0x28a   :  { %12108 = vst [vmem:[#allocation150_spill] sm:$0xff] %v9168_v40  ;;  %v5711_v53 = vcombine.low %v1424_v28, %v1446_v14  ;;  %v5712_v1 = vcombine.high %v1424_v28, %v1446_v14  ;;  %v5439_v35 = vcombine.low %v1420_v19, %v1442_v12  ;;  %v5440_v17 = vcombine.high %v1420_v19, %v1442_v12 }
 0x28b   :  { %v5431_v28 = vrot.slane %v5423_v61, %v7305_v56  ;;  %v9184_v14 = vrot.slane %v5424_v11, %v7305_v56  ;;  %v9199_v12 = vrot.slane %v5728_v32, %v7356_v50 }
 0x28c   :  { %v9177_v2 = vrot.slane %v5711_v53, %v7305_v56  ;;  %v9180_v18 = vrot.slane %v5712_v1, %v7305_v56  ;;  %v5447_v47 = vrot.slane %v5439_v35, %v7305_v56  ;;  %v9188_v19 = vrot.slane %v5440_v17, %v7305_v56  ;;  %5899 = vrot.lane.b32.xlu0 %v12109_v51, %s7204_s20 }
 0x28d   :  { %v5366_v56 = vrot.slane %v5352_v46, %v7356_v50  ;;  %v12110_v53 = vcombine.low %v8862_v23, %v8874_v44  ;;  %v5334_v1 = vrot.slane %v5320_v15, %v7356_v50  ;;  %v9213_v17 = vrot.slane %v5455_v59, %v7356_v50  ;;  %v12120_v15 = vld [vmem:[#allocation86_spill] sm:$0xff] }
 0x28e   :  { %v5760_v0 = vcombine.high %v9165_v42, %v9177_v2  ;;  %v5776_v3 = vcombine.high %v9168_v40, %v9180_v18  ;;  %v5487_v11 = vcombine.low %v5431_v28, %v5447_v47  ;;  %v5504_v35 = vcombine.high %v9184_v14, %v9188_v19 }
 0x28f   :  { %12111 = vst [vmem:[#allocation191_spill] sm:$0xff] %v9213_v17  ;;  %v9222_v46 = vrot.slane %v5472_v27, %v7356_v50  ;;  %v5385_v40 = vcombine.low %v5334_v1, %v5366_v56  ;;  %v12117_v27 = vld [vmem:[#allocation45_spill] sm:$0xff] }
 0x290   :  { %v9205_v61 = vrot.slane %v5760_v0, %v7356_v50  ;;  %5903 = vrot.lane.b32.xlu0 %v12110_v53, %s7204_s20  ;;  %v9216_v32 = vrot.slane %v5487_v11, %v7356_v50  ;;  %v9219_v51 = vrot.slane %v5504_v35, %v7356_v50  ;;  %v9233_v11 = vrot.slane %v5744_v7, %v7356_v50  ;;  %v12121_v35 = vld [vmem:[#allocation87_spill] sm:$0xff] }
 0x291   :  { %v9242_v0 = vrot.slane %v5776_v3, %v7356_v50  ;;  %v12119_v3 = vcombine.high %v7647_v48, %v7650_v49  ;;  %v12122_v7 = vcombine.low %v12120_v15, %v12121_v35  ;;  %v12127_v48 = vcombine.high %v8131_v57, %v12103_v21  ;;  %v12128_v49 = vld [vmem:[#allocation171_spill] sm:$0xff] }
 0x292   :  { %12112 = vst [vmem:[#allocation195_spill] sm:$0xff] %v9216_v32  ;;  %v5520_v53 = vcombine.high %v9213_v17, %v9216_v32  ;;  %12113 = vst [vmem:[#allocation309_spill] sm:$0xff] %v9233_v11  ;;  %v5456_v57 = vcombine.high %v9158_v31, %v9155_v9  ;;  %v12135_v21 = vcombine.high %v8603_v10, %v8615_v6  ;;  %v12143_v9 = vld [vmem:[#allocation60_spill] sm:$0xff]  ;;  %v12273_v17 = vld [vmem:[#allocation286_spill] sm:$0xff] }
 0x293   :  { %12114 = vst [vmem:[#allocation310_spill] sm:$0xff] %v9242_v0  ;;  %v12141_v31 = vcombine.high %v8862_v23, %v8874_v44  ;;  %v12142_v6 = vcombine.low %v8965_v55, %v8977_v39  ;;  %v12145_v23 = vld [vmem:[#allocation54_spill] sm:$0xff]  ;;  %v12146_v44 = vld [vmem:[#allocation55_spill] sm:$0xff]  ;;  %v12272_v32 = vld [vmem:[#allocation288_spill] sm:$0xff] }
 0x294   :  { %5907 = vrot.lane.b32.xlu0 %v5385_v40, %s7204_s20  ;;  %5845 = vrot.lane.b32.xlu1 %v5520_v53, %s7203_s0  ;;  %v12115_v40 = vcombine.high %v7397_v29, %v7400_v30  ;;  %v12116_v53 = vld [vmem:[#allocation44_spill] sm:$0xff]  ;;  %v12123_v29 = vcombine.high %v7889_v25, %v7892_v34  ;;  %v12131_v25 = vcombine.high %v12105_v20, %v12106_v54  ;;  %v12132_v34 = vld [vmem:[#allocation213_spill] sm:$0xff]  ;;  %v12137_v20 = vld [vmem:[#allocation18_spill] sm:$0xff] }
 0x295   :  { %v12118_v59 = vcombine.low %v12116_v53, %v12117_v27  ;;  %v12124_v30 = vld [vmem:[#allocation128_spill] sm:$0xff]  ;;  %v12138_v54 = vld [vmem:[#allocation19_spill] sm:$0xff]  ;;  %v9314_v10 = vrot.slane %v5456_v57, %v7356_v50 }
 0x298   :  { %5943 = vrot.lane.b32.xlu0 %v12115_v40, %s7205_s21  ;;  %5881 = vrot.lane.b32.xlu1 %v12118_v59, %s7204_s20  ;;  %v12125_v40 = vld [vmem:[#allocation129_spill] sm:$0xff]  ;;  %v12129_v59 = vld [vmem:[#allocation172_spill] sm:$0xff] }
 0x299   :  { %v12126_v0 = vcombine.low %v12124_v30, %v12125_v40 }
 0x29c   :  { %5947 = vrot.lane.b32.xlu0 %v12119_v3, %s7205_s21  ;;  %5885 = vrot.lane.b32.xlu1 %v12122_v7, %s7204_s20  ;;  %v12130_v3 = vcombine.low %v12128_v49, %v12129_v59  ;;  %v12133_v7 = vld [vmem:[#allocation217_spill] sm:$0xff] }
 0x2a0   :  { %5951 = vrot.lane.b32.xlu0 %v12123_v29, %s7205_s21  ;;  %5889 = vrot.lane.b32.xlu1 %v12126_v0, %s7204_s20  ;;  %v12134_v29 = vcombine.low %v12132_v34, %v12133_v7  ;;  %v5488_v0 = vcombine.high %v5431_v28, %v5447_v47  ;;  %v12139_v28 = vld [vmem:[#allocation12_spill] sm:$0xff]  ;;  %v12140_v47 = vld [vmem:[#allocation13_spill] sm:$0xff] }
 0x2a4   :  { %5955 = vrot.lane.b32.xlu0 %v12127_v48, %s7205_s21  ;;  %5893 = vrot.lane.b32.xlu1 %v12130_v3, %s7204_s20  ;;  %v12136_v48 = vcombine.low %v8727_v22, %v8730_v63  ;;  %v1559_v3 = vcombine.low %v12138_v54, %v12137_v20 }
 0x2a6   :  { %v9321_v54 = vrot.slane %v1559_v3, %v7356_v50  ;;  %v12149_v3 = vld [vmem:[#allocation97_spill] sm:$0xff] }
 0x2a8   :  { %5959 = vrot.lane.b32.xlu0 %v12131_v25, %s7205_s21  ;;  %5897 = vrot.lane.b32.xlu1 %v12134_v29, %s7204_s20  ;;  %v9301_v25 = vrot.slane %v5488_v0, %v7356_v50  ;;  %v1527_v29 = vcombine.low %v12140_v47, %v12139_v28  ;;  %v2071_v28 = vcombine.low %v12146_v44, %v12145_v23  ;;  %v12147_v47 = vld [vmem:[#allocation103_spill] sm:$0xff]  ;;  %v12153_v23 = vld [vmem:[#allocation144_spill] sm:$0xff] }
 0x2aa   :  { %v5521_v20 = vcombine.low %v9314_v10, %v9301_v25  ;;  %v9328_v57 = vrot.slane %v1527_v29, %v7356_v50  ;;  %v9345_v29 = vrot.slane %v2071_v28, %v7356_v50  ;;  %v12157_v28 = vld [vmem:[#allocation188_spill] sm:$0xff] }
 0x2ac   :  { %5963 = vrot.lane.b32.xlu0 %v12135_v21, %s7205_s21  ;;  %5901 = vrot.lane.b32.xlu1 %v12136_v48, %s7204_s20  ;;  %v12144_v21 = vld [vmem:[#allocation61_spill] sm:$0xff]  ;;  %v5386_v48 = vcombine.high %v5334_v1, %v5366_v56  ;;  %v1579_v56 = vcombine.low %v9328_v57, %v9321_v54 }
 0x2ad   :  { %v2103_v0 = vcombine.low %v12144_v21, %v12143_v9  ;;  %v12150_v9 = vld [vmem:[#allocation96_spill] sm:$0xff] }
 0x2ae   :  { %v2615_v21 = vcombine.low %v12150_v9, %v12149_v3  ;;  %v12155_v3 = vld [vmem:[#allocation138_spill] sm:$0xff]  ;;  %v12158_v9 = vld [vmem:[#allocation187_spill] sm:$0xff] }
 0x2af   :  { %v9335_v1 = vrot.slane %v2103_v0, %v7356_v50 }
 0x2b0   :  { %5967 = vrot.lane.b32.xlu0 %v12141_v31, %s7205_s21  ;;  %5905 = vrot.lane.b32.xlu1 %v12142_v6, %s7204_s20  ;;  %v12148_v31 = vld [vmem:[#allocation102_spill] sm:$0xff] }
 0x2b1   :  { %v2647_v6 = vcombine.low %v12148_v31, %v12147_v47  ;;  %v2123_v0 = vcombine.low %v9345_v29, %v9335_v1  ;;  %v12154_v31 = vld [vmem:[#allocation139_spill] sm:$0xff] }
 0x2b3   :  { %v9352_v47 = vrot.slane %v2647_v6, %v7356_v50 }
 0x2b4   :  { %5971 = vrot.lane.b32.xlu0 %v5386_v48, %s7205_s21  ;;  %5909 = vrot.lane.b32.xlu1 %v5521_v20, %s7204_s20  ;;  %v12151_v48 = vcombine.high %v12116_v53, %v12117_v27  ;;  %v12152_v20 = vld [vmem:[#allocation145_spill] sm:$0xff]  ;;  %v12156_v27 = vcombine.high %v12120_v15, %v12121_v35  ;;  %v9362_v53 = vrot.slane %v2615_v21, %v7356_v50  ;;  %v12162_v21 = vld [vmem:[#allocation232_spill] sm:$0xff] }
 0x2b5   :  { %v3191_v44 = vcombine.low %v12153_v23, %v12152_v20  ;;  %v9366_v20 = vpop.permute.xlu0 %5815  ;;  %v12161_v15 = vcombine.high %v12124_v30, %v12125_v40  ;;  %v12166_v30 = vcombine.high %v12128_v49, %v12129_v59  ;;  %v12167_v49 = vcombine.high %v12132_v34, %v12133_v7  ;;  %v12170_v7 = vld [vmem:[#allocation39_spill] sm:$0xff] }
 0x2b6   :  { %v2667_v6 = vcombine.low %v9362_v53, %v9352_v47  ;;  %v12168_v34 = vcombine.high %v8727_v22, %v8730_v63  ;;  %v12174_v22 = vcombine.high %v8965_v55, %v8977_v39  ;;  %v12179_v39 = vld [vmem:[#allocation123_spill] sm:$0xff] }
 0x2b7   :  { %v9371_v23 = vrot.slane %v3191_v44, %v7356_v50 }
 0x2b8   :  { %6007 = vrot.lane.b32.xlu0 %v1579_v56, %s7200_s17  ;;  %5945 = vrot.lane.b32.xlu1 %v12151_v48, %s7205_s21  ;;  %v3159_v56 = vcombine.low %v12155_v3, %v12154_v31  ;;  %v3735_v48 = vcombine.low %v12158_v9, %v12157_v28  ;;  %v12160_v31 = vld [vmem:[#allocation181_spill] sm:$0xff] }
 0x2b9   :  { %v9392_v11 = vpop.permute.xlu0 %5819 }
 0x2ba   :  { %v9381_v35 = vrot.slane %v3159_v56, %v7356_v50  ;;  %v9388_v9 = vrot.slane %v3735_v48, %v7356_v50  ;;  %v4823_v56 = vcombine.low %v8839_v24, %v8843_v62  ;;  %v5367_v24 = vcombine.low %v9057_v60, %v9063_v37  ;;  %v12169_v37 = vld [vmem:[#allocation38_spill] sm:$0xff] }
 0x2bc   :  { %6011 = vrot.lane.b32.xlu0 %v2123_v0, %s7200_s17  ;;  %5949 = vrot.lane.b32.xlu1 %v12156_v27, %s7205_s21  ;;  %v12159_v0 = vld [vmem:[#allocation182_spill] sm:$0xff]  ;;  %v12163_v27 = vld [vmem:[#allocation231_spill] sm:$0xff]  ;;  %v3211_v44 = vcombine.low %v9381_v35, %v9371_v23 }
 0x2bd   :  { %v3703_v3 = vcombine.low %v12160_v31, %v12159_v0  ;;  %v4279_v28 = vcombine.low %v12163_v27, %v12162_v21  ;;  %v12164_v0 = vld [vmem:[#allocation226_spill] sm:$0xff]  ;;  %v12165_v31 = vld [vmem:[#allocation225_spill] sm:$0xff]  ;;  %v4791_v21 = vcombine.low %v8789_v36, %v8793_v8  ;;  %v9421_v62 = vpop.permute.xlu0 %5823  ;;  %v9426_v36 = vrot.slane %v4823_v56, %v7356_v50 }
 0x2be   :  { %v5335_v8 = vcombine.low %v9022_v16, %v9025_v43  ;;  %v1695_v27 = vcombine.low %v12170_v7, %v12169_v37  ;;  %v12171_v16 = vld [vmem:[#allocation32_spill] sm:$0xff]  ;;  %v12172_v43 = vld [vmem:[#allocation33_spill] sm:$0xff] }
 0x2bf   :  { %v9400_v40 = vrot.slane %v3703_v3, %v7356_v50  ;;  %v9436_v60 = vrot.slane %v4791_v21, %v7356_v50  ;;  %v5522_v21 = vcombine.high %v9314_v10, %v9301_v25  ;;  %v1580_v25 = vcombine.high %v9328_v57, %v9321_v54 }
 0x2c0   :  { %6015 = vrot.lane.b32.xlu0 %v2667_v6, %s7200_s17  ;;  %5953 = vrot.lane.b32.xlu1 %v12161_v15, %s7205_s21  ;;  %v4247_v6 = vcombine.low %v12165_v31, %v12164_v0  ;;  %v9407_v15 = vrot.slane %v4279_v28, %v7356_v50  ;;  %v1663_v0 = vcombine.low %v12172_v43, %v12171_v16  ;;  %v12183_v16 = vld [vmem:[#allocation116_spill] sm:$0xff] }
 0x2c1   :  { %v3755_v48 = vcombine.low %v9400_v40, %v9388_v9  ;;  %v4843_v28 = vcombine.low %v9436_v60, %v9426_v36  ;;  %v9447_v31 = vpop.permute.xlu0 %5827  ;;  %v9455_v63 = vrot.slane %v5335_v8, %v7356_v50  ;;  %v12180_v8 = vld [vmem:[#allocation122_spill] sm:$0xff]  ;;  %v2124_v57 = vcombine.high %v9345_v29, %v9335_v1  ;;  %v12190_v1 = vld [vmem:[#allocation209_spill] sm:$0xff] }
 0x2c2   :  { %v9417_v59 = vrot.slane %v4247_v6, %v7356_v50  ;;  %12173 = vst [vmem:[#allocation44_spill] sm:$0xff] %v9447_v31  ;;  %v12175_v6 = vld [vmem:[#allocation80_spill] sm:$0xff]  ;;  %v9471_v55 = vrot.slane %v1663_v0, %v7356_v50  ;;  %v2783_v37 = vcombine.low %v12180_v8, %v12179_v39  ;;  %v12189_v39 = vld [vmem:[#allocation210_spill] sm:$0xff]  ;;  %v2668_v8 = vcombine.high %v9362_v53, %v9352_v47 }
 0x2c3   :  { %v3871_v29 = vcombine.low %v12190_v1, %v12189_v39  ;;  %v4415_v47 = vcombine.low %v8700_v26, %v8704_v33  ;;  %v4959_v26 = vcombine.low %v8946_v5, %v8950_v52  ;;  %v5503_v5 = vcombine.low %v9184_v14, %v9188_v19 }
 0x2c4   :  { %6019 = vrot.lane.b32.xlu0 %v3211_v44, %s7200_s17  ;;  %5957 = vrot.lane.b32.xlu1 %v12166_v30, %s7205_s21  ;;  %v4299_v3 = vcombine.low %v9417_v59, %v9407_v15  ;;  %v9443_v44 = vrot.slane %v5367_v24, %v7356_v50  ;;  %v12176_v30 = vld [vmem:[#allocation81_spill] sm:$0xff]  ;;  %v12177_v24 = vld [vmem:[#allocation74_spill] sm:$0xff]  ;;  %v4844_v19 = vcombine.high %v9436_v60, %v9426_v36 }
 0x2c5   :  { %v2239_v56 = vcombine.low %v12176_v30, %v12175_v6  ;;  %v9475_v7 = vpop.permute.xlu0 %5831  ;;  %v12185_v6 = vld [vmem:[#allocation165_spill] sm:$0xff]  ;;  %v4423_v1 = vrot.slane %v4415_v47, %v7356_v50 }
 0x2c6   :  { %12181 = vst [vmem:[#allocation45_spill] sm:$0xff] %v9475_v7 }
 0x2c8   :  { %6023 = vrot.lane.b32.xlu0 %v3755_v48, %s7200_s17  ;;  %5961 = vrot.lane.b32.xlu1 %v12167_v49, %s7205_s21  ;;  %v5387_v48 = vcombine.low %v9455_v63, %v9443_v44  ;;  %v9464_v49 = vrot.slane %v1695_v27, %v7356_v50  ;;  %v9482_v27 = vrot.slane %v2239_v56, %v7356_v50 }
 0x2c9   :  { %v9498_v56 = vrot.slane %v2783_v37, %v7356_v50 }
 0x2ca   :  { %v1715_v10 = vcombine.low %v9471_v55, %v9464_v49  ;;  %v1716_v60 = vcombine.high %v9471_v55, %v9464_v49 }
 0x2cc   :  { %6027 = vrot.lane.b32.xlu0 %v4299_v3, %s7200_s17  ;;  %5965 = vrot.lane.b32.xlu1 %v12168_v34, %s7205_s21  ;;  %v12178_v3 = vld [vmem:[#allocation75_spill] sm:$0xff] }
 0x2cd   :  { %v2207_v34 = vcombine.low %v12178_v3, %v12177_v24  ;;  %v9502_v3 = vpop.permute.xlu0 %5835 }
 0x2ce   :  { %12188 = vst [vmem:[#allocation86_spill] sm:$0xff] %v9502_v3 }
 0x2cf   :  { %v9489_v0 = vrot.slane %v2207_v34, %v7356_v50 }
 0x2d0   :  { %6031 = vrot.lane.b32.xlu0 %v4843_v28, %s7200_s17  ;;  %5969 = vrot.lane.b32.xlu1 %v12174_v22, %s7205_s21  ;;  %v12182_v28 = vld [vmem:[#allocation117_spill] sm:$0xff]  ;;  %v12184_v22 = vld [vmem:[#allocation166_spill] sm:$0xff] }
 0x2d1   :  { %v2751_v43 = vcombine.low %v12183_v16, %v12182_v28  ;;  %v3327_v54 = vcombine.low %v12185_v6, %v12184_v22  ;;  %v2259_v30 = vcombine.low %v9489_v0, %v9482_v27  ;;  %v12192_v28 = vld [vmem:[#allocation203_spill] sm:$0xff]  ;;  %v9520_v22 = vpop.permute.xlu1 %5817  ;;  %v9527_v53 = vpop.permute.xlu0 %5839  ;;  %v3212_v6 = vcombine.high %v9381_v35, %v9371_v23 }
 0x2d2   :  { %12193 = vst [vmem:[#allocation87_spill] sm:$0xff] %v9520_v22  ;;  %12194 = vst [vmem:[#allocation128_spill] sm:$0xff] %v9527_v53  ;;  %v3756_v23 = vcombine.high %v9400_v40, %v9388_v9  ;;  %v4300_v9 = vcombine.high %v9417_v59, %v9407_v15  ;;  %v5511_v59 = vrot.slane %v5503_v5, %v7356_v50  ;;  %v12212_v5 = vld [vmem:[#allocation108_spill] sm:$0xff] }
 0x2d3   :  { %v9507_v34 = vrot.slane %v2751_v43, %v7356_v50 }
 0x2d4   :  { %6035 = vrot.lane.b32.xlu0 %v5387_v48, %s7200_s17  ;;  %5973 = vrot.lane.b32.xlu1 %v5522_v21, %s7205_s21  ;;  %v12186_v48 = vld [vmem:[#allocation160_spill] sm:$0xff]  ;;  %v12187_v21 = vld [vmem:[#allocation159_spill] sm:$0xff] }
 0x2d5   :  { %v3295_v24 = vcombine.low %v12187_v21, %v12186_v48  ;;  %v2803_v37 = vcombine.low %v9507_v34, %v9498_v56  ;;  %v12196_v48 = vld [vmem:[#allocation245_spill] sm:$0xff]  ;;  %v9540_v33 = vpop.permute.xlu1 %5821 }
 0x2d6   :  { %12197 = vst [vmem:[#allocation129_spill] sm:$0xff] %v9540_v33 }
 0x2d7   :  { %v3303_v43 = vrot.slane %v3295_v24, %v7356_v50 }
 0x2d8   :  { %6071 = vrot.lane.b32.xlu0 %v1580_v25, %s7206_s22  ;;  %6009 = vrot.lane.b32.xlu1 %v1715_v10, %s7200_s17  ;;  %v9516_v25 = vrot.slane %v3327_v54, %v7356_v50  ;;  %v12191_v10 = vld [vmem:[#allocation204_spill] sm:$0xff] }
 0x2d9   :  { %v3839_v16 = vcombine.low %v12192_v28, %v12191_v10 }
 0x2da   :  { %v3347_v54 = vcombine.low %v3303_v43, %v9516_v25 }
 0x2db   :  { %v3847_v24 = vrot.slane %v3839_v16, %v7356_v50  ;;  %v5388_v16 = vcombine.high %v9455_v63, %v9443_v44  ;;  %v2260_v63 = vcombine.high %v9489_v0, %v9482_v27 }
 0x2dc   :  { %6075 = vrot.lane.b32.xlu0 %v2124_v57, %s7206_s22  ;;  %6013 = vrot.lane.b32.xlu1 %v2259_v30, %s7200_s17  ;;  %v3879_v57 = vrot.slane %v3871_v29, %v7356_v50  ;;  %v12195_v30 = vld [vmem:[#allocation246_spill] sm:$0xff]  ;;  %v4927_v29 = vcombine.low %v8920_v13, %v8924_v38  ;;  %v5471_v13 = vcombine.low %v9131_v58, %v9134_v41  ;;  %v9561_v38 = vpop.permute.xlu1 %5825 }
 0x2dd   :  { %v4383_v21 = vcombine.low %v12196_v48, %v12195_v30  ;;  %12198 = vst [vmem:[#allocation171_spill] sm:$0xff] %v9561_v38  ;;  %v12203_v30 = vld [vmem:[#allocation24_spill] sm:$0xff] }
 0x2de   :  { %v3891_v35 = vcombine.low %v3847_v24, %v3879_v57  ;;  %v4935_v10 = vrot.slane %v4927_v29, %v7356_v50  ;;  %v5479_v58 = vrot.slane %v5471_v13, %v7356_v50  ;;  %v12211_v29 = vld [vmem:[#allocation109_spill] sm:$0xff]  ;;  %v12216_v13 = vld [vmem:[#allocation152_spill] sm:$0xff] }
 0x2e0   :  { %6079 = vrot.lane.b32.xlu0 %v2668_v8, %s7206_s22  ;;  %6017 = vrot.lane.b32.xlu1 %v2803_v37, %s7200_s17  ;;  %v4391_v8 = vrot.slane %v4383_v21, %v7356_v50  ;;  %v4967_v37 = vrot.slane %v4959_v26, %v7356_v50  ;;  %v9574_v41 = vpop.permute.xlu1 %5829  ;;  %v5523_v47 = vcombine.low %v5479_v58, %v5511_v59  ;;  %v12206_v21 = vld [vmem:[#allocation67_spill] sm:$0xff]  ;;  %v12207_v26 = vld [vmem:[#allocation66_spill] sm:$0xff] }
 0x2e1   :  { %12199 = vst [vmem:[#allocation172_spill] sm:$0xff] %v9574_v41 }
 0x2e2   :  { %v4435_v40 = vcombine.low %v4391_v8, %v4423_v1  ;;  %v4979_v15 = vcombine.low %v4935_v10, %v4967_v37 }
 0x2e4   :  { %6083 = vrot.lane.b32.xlu0 %v3212_v6, %s7206_s22  ;;  %6021 = vrot.lane.b32.xlu1 %v3347_v54, %s7200_s17  ;;  %v9586_v6 = vpop.permute.xlu1 %5833  ;;  %v12202_v54 = vld [vmem:[#allocation25_spill] sm:$0xff] }
 0x2e5   :  { %12201 = vst [vmem:[#allocation217_spill] sm:$0xff] %v9586_v6  ;;  %v12204_v48 = vcombine.low %v12202_v54, %v12203_v30 }
 0x2e6   :  { %v9542_v39 = vpop.permute.xlu0 %5843 }
 0x2e8   :  { %6087 = vrot.lane.b32.xlu0 %v3756_v23, %s7206_s22  ;;  %6025 = vrot.lane.b32.xlu1 %v3891_v35, %s7200_s17  ;;  %v12208_v23 = vcombine.low %v12206_v21, %v12207_v26  ;;  %v9602_v49 = vpop.permute.xlu1 %5837  ;;  %v2804_v35 = vcombine.high %v9507_v34, %v9498_v56 }
 0x2e9   :  { %12209 = vst [vmem:[#allocation19_spill] sm:$0xff] %v9602_v49  ;;  %v12242_v49 = vld [vmem:[#allocation88_spill] sm:$0xff] }
 0x2ea   :  { %v9554_v52 = vpop.permute.xlu0 %5879 }
 0x2ec   :  { %6091 = vrot.lane.b32.xlu0 %v4300_v9, %s7206_s22  ;;  %6029 = vrot.lane.b32.xlu1 %v4435_v40, %s7200_s17  ;;  %v12213_v9 = vcombine.low %v12211_v29, %v12212_v5  ;;  %v9613_v27 = vpop.permute.xlu1 %5841  ;;  %v3348_v40 = vcombine.high %v3303_v43, %v9516_v25 }
 0x2ed   :  { %12214 = vst [vmem:[#allocation13_spill] sm:$0xff] %v9613_v27  ;;  %v12236_v27 = vld [vmem:[#allocation46_spill] sm:$0xff] }
 0x2ee   :  { %v9566_v14 = vpop.permute.xlu0 %5883 }
 0x2f0   :  { %6095 = vrot.lane.b32.xlu0 %v4844_v19, %s7206_s22  ;;  %6033 = vrot.lane.b32.xlu1 %v4979_v15, %s7200_s17  ;;  %v12217_v19 = vld [vmem:[#allocation151_spill] sm:$0xff] }
 0x2f1   :  { %v12218_v15 = vcombine.low %v12216_v13, %v12217_v19 }
 0x2f2   :  { %v9576_v28 = vpop.permute.xlu0 %5887 }
 0x2f4   :  { %6099 = vrot.lane.b32.xlu0 %v5388_v16, %s7206_s22  ;;  %6037 = vrot.lane.b32.xlu1 %v5523_v47, %s7200_s17  ;;  %v3892_v16 = vcombine.high %v3847_v24, %v3879_v57  ;;  %v12220_v47 = vld [vmem:[#allocation198_spill] sm:$0xff] }
 0x2f6   :  { %v9582_v36 = vpop.permute.xlu0 %5891 }
 0x2f7   :  { %12200 = vst [vmem:[#allocation213_spill] sm:$0xff] %v9582_v36 }
 0x2f8   :  { %6135 = vrot.lane.b32.xlu0 %v12204_v48, %s7207_s23  ;;  %6073 = vrot.lane.b32.xlu1 %v1716_v60, %s7206_s22  ;;  %v12221_v60 = vld [vmem:[#allocation196_spill] sm:$0xff] }
 0x2f9   :  { %v12222_v48 = vcombine.low %v12220_v47, %v12221_v60 }
 0x2fa   :  { %v9593_v44 = vpop.permute.xlu0 %5895 }
 0x2fb   :  { %12205 = vst [vmem:[#allocation18_spill] sm:$0xff] %v9593_v44 }
 0x2fc   :  { %6139 = vrot.lane.b32.xlu0 %v12208_v23, %s7207_s23  ;;  %6077 = vrot.lane.b32.xlu1 %v2260_v63, %s7206_s22  ;;  %v4436_v63 = vcombine.high %v4391_v8, %v4423_v1  ;;  %v12224_v23 = vld [vmem:[#allocation240_spill] sm:$0xff] }
 0x2fe   :  { %v9604_v55 = vpop.permute.xlu0 %5899 }
 0x2ff   :  { %12210 = vst [vmem:[#allocation12_spill] sm:$0xff] %v9604_v55 }
 0x300   :  { %6143 = vrot.lane.b32.xlu0 %v12213_v9, %s7207_s23  ;;  %6081 = vrot.lane.b32.xlu1 %v2804_v35, %s7206_s22  ;;  %v12225_v35 = vld [vmem:[#allocation238_spill] sm:$0xff] }
 0x301   :  { %v12226_v9 = vcombine.low %v12224_v23, %v12225_v35  ;;  %v12266_v33 = vcombine.high %v12224_v23, %v12225_v35  ;;  %v12275_v23 = vcombine.high %v8883_v45, %v8877_v4  ;;  %v12277_v35 = vld [vmem:[#allocation50_spill] sm:$0xff] }
 0x302   :  { %v9615_v0 = vpop.permute.xlu0 %5903 }
 0x303   :  { %12215 = vst [vmem:[#allocation60_spill] sm:$0xff] %v9615_v0 }
 0x304   :  { %6147 = vrot.lane.b32.xlu0 %v12218_v15, %s7207_s23  ;;  %6085 = vrot.lane.b32.xlu1 %v3348_v40, %s7206_s22  ;;  %v4980_v40 = vcombine.high %v4935_v10, %v4967_v37  ;;  %v12228_v15 = vcombine.low %v8883_v45, %v8877_v4 }
 0x306   :  { %v9623_v56 = vpop.permute.xlu1 %5845  ;;  %v9625_v34 = vpop.permute.xlu0 %5907 }
 0x307   :  { %12219 = vst [vmem:[#allocation61_spill] sm:$0xff] %v9623_v56  ;;  %v12274_v56 = vcombine.low %v12272_v32, %v12273_v17 }
 0x308   :  { %6151 = vrot.lane.b32.xlu0 %v12222_v48, %s7207_s23  ;;  %6089 = vrot.lane.b32.xlu1 %v3892_v16, %s7206_s22  ;;  %v5524_v16 = vcombine.high %v5479_v58, %v5511_v59  ;;  %v12230_v48 = vld [vmem:[#allocation304_spill] sm:$0xff]  ;;  %v12238_v59 = vcombine.high %v12202_v54, %v12203_v30  ;;  %v12247_v54 = vld [vmem:[#allocation131_spill] sm:$0xff]  ;;  %v12248_v30 = vld [vmem:[#allocation130_spill] sm:$0xff] }
 0x30a   :  { %v9632_v25 = vpop.permute.xlu1 %5881  ;;  %v9634_v43 = vpop.permute.xlu0 %5943 }
 0x30b   :  { %12223 = vst [vmem:[#allocation54_spill] sm:$0xff] %v9632_v25  ;;  %v12268_v25 = vld [vmem:[#allocation14_spill] sm:$0xff] }
 0x30c   :  { %6155 = vrot.lane.b32.xlu0 %v12226_v9, %s7207_s23  ;;  %6093 = vrot.lane.b32.xlu1 %v4436_v63, %s7206_s22  ;;  %v12231_v63 = vld [vmem:[#allocation302_spill] sm:$0xff] }
 0x30d   :  { %v12232_v9 = vcombine.low %v12230_v48, %v12231_v63  ;;  %v12282_v4 = vcombine.high %v12230_v48, %v12231_v63 }
 0x30e   :  { %v9641_v57 = vpop.permute.xlu1 %5885  ;;  %v9643_v24 = vpop.permute.xlu0 %5947 }
 0x30f   :  { %12227 = vst [vmem:[#allocation55_spill] sm:$0xff] %v9641_v57 }
 0x310   :  { %6159 = vrot.lane.b32.xlu0 %v12228_v15, %s7207_s23  ;;  %6097 = vrot.lane.b32.xlu1 %v4980_v40, %s7206_s22  ;;  %v12235_v15 = vld [vmem:[#allocation47_spill] sm:$0xff] }
 0x311   :  { %v12237_v40 = vcombine.low %v12235_v15, %v12236_v27  ;;  %v12289_v63 = vcombine.high %v12235_v15, %v12236_v27 }
 0x312   :  { %v9650_v1 = vpop.permute.xlu1 %5889  ;;  %v9652_v8 = vpop.permute.xlu0 %5951 }
 0x313   :  { %12229 = vst [vmem:[#allocation103_spill] sm:$0xff] %v9650_v1 }
 0x314   :  { %6163 = vrot.lane.b32.xlu0 %v12232_v9, %s7207_s23  ;;  %6101 = vrot.lane.b32.xlu1 %v5524_v16, %s7206_s22  ;;  %v12241_v16 = vld [vmem:[#allocation89_spill] sm:$0xff] }
 0x315   :  { %v12243_v6 = vcombine.low %v12241_v16, %v12242_v49  ;;  %v12296_v15 = vcombine.high %v12241_v16, %v12242_v49  ;;  %v12303_v16 = vcombine.high %v12247_v54, %v12248_v30 }
 0x316   :  { %v9659_v37 = vpop.permute.xlu1 %5893  ;;  %v9661_v10 = vpop.permute.xlu0 %5955 }
 0x317   :  { %12233 = vst [vmem:[#allocation102_spill] sm:$0xff] %v9659_v37  ;;  %12234 = vst [vmem:[#allocation97_spill] sm:$0xff] %v9661_v10  ;;  %v12244_v37 = vcombine.high %v12206_v21, %v12207_v26  ;;  %v12253_v21 = vld [vmem:[#allocation174_spill] sm:$0xff]  ;;  %v12254_v26 = vld [vmem:[#allocation173_spill] sm:$0xff] }
 0x318   :  { %6137 = vrot.lane.b32.xlu1 %v12237_v40, %s7207_s23  ;;  %6199 = vrot.lane.b32.xlu0 %v12238_v59, %s7208_s24  ;;  %v12249_v59 = vcombine.low %v12247_v54, %v12248_v30  ;;  %v12310_v30 = vcombine.high %v12253_v21, %v12254_v26  ;;  %v12449_v10 = vld [vmem:[#allocation283_spill] sm:$0xff] }
 0x31a   :  { %v9671_v58 = vpop.permute.xlu1 %5897  ;;  %v9673_v9 = vpop.permute.xlu0 %5959 }
 0x31b   :  { %12239 = vst [vmem:[#allocation96_spill] sm:$0xff] %v9671_v58  ;;  %12240 = vst [vmem:[#allocation145_spill] sm:$0xff] %v9673_v9  ;;  %v12250_v58 = vcombine.high %v12211_v29, %v12212_v5  ;;  %v12258_v29 = vld [vmem:[#allocation220_spill] sm:$0xff]  ;;  %v12259_v5 = vld [vmem:[#allocation218_spill] sm:$0xff] }
 0x31c   :  { %6141 = vrot.lane.b32.xlu1 %v12243_v6, %s7207_s23  ;;  %6203 = vrot.lane.b32.xlu0 %v12244_v37, %s7208_s24  ;;  %v12255_v37 = vcombine.low %v12253_v21, %v12254_v26  ;;  %v12316_v26 = vcombine.high %v12258_v29, %v12259_v5 }
 0x31e   :  { %v9683_v40 = vpop.permute.xlu1 %5901  ;;  %v9685_v41 = vpop.permute.xlu0 %5963 }
 0x31f   :  { %12245 = vst [vmem:[#allocation144_spill] sm:$0xff] %v9683_v40  ;;  %12246 = vst [vmem:[#allocation139_spill] sm:$0xff] %v9685_v41  ;;  %v12256_v40 = vcombine.high %v12216_v13, %v12217_v19  ;;  %v12263_v13 = vld [vmem:[#allocation256_spill] sm:$0xff]  ;;  %v12264_v19 = vld [vmem:[#allocation255_spill] sm:$0xff] }
 0x320   :  { %6145 = vrot.lane.b32.xlu1 %v12249_v59, %s7207_s23  ;;  %6207 = vrot.lane.b32.xlu0 %v12250_v58, %s7208_s24  ;;  %v12260_v58 = vcombine.low %v12258_v29, %v12259_v5  ;;  %v12322_v5 = vcombine.high %v12263_v13, %v12264_v19 }
 0x322   :  { %v9695_v6 = vpop.permute.xlu1 %5905  ;;  %v9697_v1 = vpop.permute.xlu0 %5967 }
 0x323   :  { %12251 = vst [vmem:[#allocation138_spill] sm:$0xff] %v9695_v6  ;;  %12252 = vst [vmem:[#allocation188_spill] sm:$0xff] %v9697_v1  ;;  %v12261_v6 = vcombine.high %v12220_v47, %v12221_v60  ;;  %v12270_v60 = vld [vmem:[#allocation10_spill] sm:$0xff] }
 0x324   :  { %6149 = vrot.lane.b32.xlu1 %v12255_v37, %s7207_s23  ;;  %6211 = vrot.lane.b32.xlu0 %v12256_v40, %s7208_s24  ;;  %v12265_v40 = vcombine.low %v12263_v13, %v12264_v19  ;;  %v12328_v19 = vcombine.high %v12272_v32, %v12273_v17  ;;  %v12335_v32 = vcombine.high %v9222_v46, %v9219_v51 }
 0x326   :  { %v9707_v59 = vpop.permute.xlu1 %5909  ;;  %v9709_v38 = vpop.permute.xlu0 %5971 }
 0x327   :  { %12257 = vst [vmem:[#allocation187_spill] sm:$0xff] %v9707_v59 }
 0x328   :  { %6153 = vrot.lane.b32.xlu1 %v12260_v58, %s7207_s23  ;;  %6215 = vrot.lane.b32.xlu0 %v12261_v6, %s7208_s24  ;;  %v12267_v58 = vld [vmem:[#allocation16_spill] sm:$0xff] }
 0x329   :  { %v1815_v22 = vcombine.low %v12268_v25, %v12267_v58  ;;  %v12271_v6 = vld [vmem:[#allocation8_spill] sm:$0xff] }
 0x32a   :  { %v9719_v37 = vpop.permute.xlu1 %5945  ;;  %v9721_v57 = vpop.permute.xlu0 %6007  ;;  %v12279_v58 = vld [vmem:[#allocation56_spill] sm:$0xff] }
 0x32b   :  { %12262 = vst [vmem:[#allocation182_spill] sm:$0xff] %v9719_v37  ;;  %v1783_v37 = vcombine.low %v12271_v6, %v12270_v60  ;;  %v9756_v60 = vrot.slane %v1815_v22, %v7356_v50  ;;  %v12283_v6 = vld [vmem:[#allocation94_spill] sm:$0xff] }
 0x32c   :  { %6157 = vrot.lane.b32.xlu1 %v12265_v40, %s7207_s23  ;;  %6219 = vrot.lane.b32.xlu0 %v12266_v33, %s7208_s24  ;;  %v12276_v33 = vld [vmem:[#allocation52_spill] sm:$0xff]  ;;  %v12278_v40 = vld [vmem:[#allocation58_spill] sm:$0xff] }
 0x32d   :  { %v2327_v25 = vcombine.low %v12277_v35, %v12276_v33  ;;  %v9767_v45 = vrot.slane %v1783_v37, %v7356_v50  ;;  %v12285_v35 = vld [vmem:[#allocation100_spill] sm:$0xff] }
 0x32e   :  { %v9733_v59 = vpop.permute.xlu1 %5949  ;;  %v9735_v47 = vpop.permute.xlu0 %6011 }
 0x32f   :  { %12269 = vst [vmem:[#allocation181_spill] sm:$0xff] %v9733_v59  ;;  %v2359_v59 = vcombine.low %v12279_v58, %v12278_v40  ;;  %v12286_v40 = vld [vmem:[#allocation98_spill] sm:$0xff]  ;;  %v9780_v53 = vrot.slane %v2327_v25, %v7356_v50  ;;  %v1848_v44 = vcombine.high %v9767_v45, %v9756_v60 }
 0x330   :  { %6161 = vrot.lane.b32.xlu1 %v12274_v56, %s7207_s23  ;;  %6223 = vrot.lane.b32.xlu0 %v12275_v23, %s7208_s24  ;;  %v12281_v56 = vcombine.low %v9222_v46, %v9219_v51  ;;  %v12284_v23 = vld [vmem:[#allocation92_spill] sm:$0xff]  ;;  %v2903_v22 = vcombine.low %v12286_v40, %v12285_v35  ;;  %v12291_v25 = vld [vmem:[#allocation134_spill] sm:$0xff] }
 0x331   :  { %v2871_v33 = vcombine.low %v12284_v23, %v12283_v6  ;;  %v9783_v48 = vrot.slane %v2359_v59, %v7356_v50  ;;  %v12290_v6 = vld [vmem:[#allocation136_spill] sm:$0xff]  ;;  %v12292_v35 = vld [vmem:[#allocation142_spill] sm:$0xff] }
 0x332   :  { %v9751_v1 = vpop.permute.xlu1 %5953  ;;  %v9753_v0 = vpop.permute.xlu0 %6015  ;;  %v3415_v23 = vcombine.low %v12291_v25, %v12290_v6  ;;  %v12293_v59 = vld [vmem:[#allocation140_spill] sm:$0xff]  ;;  %v12299_v6 = vld [vmem:[#allocation185_spill] sm:$0xff]  ;;  %v12300_v25 = vld [vmem:[#allocation183_spill] sm:$0xff] }
 0x333   :  { %12280 = vst [vmem:[#allocation232_spill] sm:$0xff] %v9751_v1  ;;  %v9791_v37 = vrot.slane %v2871_v33, %v7356_v50  ;;  %v3447_v40 = vcombine.low %v12293_v59, %v12292_v35  ;;  %v2391_v27 = vcombine.low %v9780_v53, %v9783_v48  ;;  %v3991_v35 = vcombine.low %v12300_v25, %v12299_v6  ;;  %v12307_v6 = vld [vmem:[#allocation227_spill] sm:$0xff] }
 0x334   :  { %6165 = vrot.lane.b32.xlu1 %v12281_v56, %s7207_s23  ;;  %6227 = vrot.lane.b32.xlu0 %v12282_v4, %s7208_s24  ;;  %v1847_v56 = vcombine.low %v9767_v45, %v9756_v60  ;;  %v9794_v4 = vrot.slane %v2903_v22, %v7356_v50  ;;  %v12297_v22 = vld [vmem:[#allocation179_spill] sm:$0xff]  ;;  %v9822_v55 = vrot.slane %v3415_v23, %v7356_v50 }
 0x335   :  { %v9825_v49 = vrot.slane %v3447_v40, %v7356_v50  ;;  %v9846_v54 = vrot.slane %v3991_v35, %v7356_v50  ;;  %v12344_v45 = vld [vmem:[#allocation163_spill] sm:$0xff] }
 0x336   :  { %v9773_v58 = vpop.permute.xlu1 %5957  ;;  %v9775_v1 = vpop.permute.xlu0 %6019  ;;  %v2935_v33 = vcombine.low %v9791_v37, %v9794_v4 }
 0x337   :  { %12287 = vst [vmem:[#allocation231_spill] sm:$0xff] %v9773_v58  ;;  %12288 = vst [vmem:[#allocation226_spill] sm:$0xff] %v9775_v1  ;;  %v3479_v40 = vcombine.low %v9822_v55, %v9825_v49 }
 0x338   :  { %6201 = vrot.lane.b32.xlu1 %v12289_v63, %s7208_s24  ;;  %6263 = vrot.lane.b32.xlu0 %v1847_v56, %s7209_s25  ;;  %v12298_v56 = vld [vmem:[#allocation177_spill] sm:$0xff] }
 0x339   :  { %v3959_v63 = vcombine.low %v12298_v56, %v12297_v22  ;;  %v12306_v56 = vld [vmem:[#allocation229_spill] sm:$0xff] }
 0x33a   :  { %v9800_v58 = vpop.permute.xlu1 %5961  ;;  %v9802_v41 = vpop.permute.xlu0 %6023  ;;  %v4535_v25 = vcombine.low %v12307_v6, %v12306_v56  ;;  %v12313_v56 = vld [vmem:[#allocation265_spill] sm:$0xff]  ;;  %v12314_v6 = vld [vmem:[#allocation263_spill] sm:$0xff] }
 0x33b   :  { %12294 = vst [vmem:[#allocation225_spill] sm:$0xff] %v9800_v58  ;;  %12295 = vst [vmem:[#allocation38_spill] sm:$0xff] %v9802_v41  ;;  %v5079_v35 = vcombine.low %v12314_v6, %v12313_v56 }
 0x33c   :  { %6205 = vrot.lane.b32.xlu1 %v12296_v15, %s7208_s24  ;;  %6267 = vrot.lane.b32.xlu0 %v2391_v27, %s7209_s25  ;;  %v12304_v27 = vld [vmem:[#allocation223_spill] sm:$0xff]  ;;  %v12305_v15 = vld [vmem:[#allocation221_spill] sm:$0xff] }
 0x33d   :  { %v4503_v22 = vcombine.low %v12305_v15, %v12304_v27  ;;  %v12311_v27 = vld [vmem:[#allocation261_spill] sm:$0xff]  ;;  %v12312_v15 = vld [vmem:[#allocation259_spill] sm:$0xff]  ;;  %v9888_v29 = vrot.slane %v5079_v35, %v7356_v50 }
 0x33e   :  { %v9817_v59 = vpop.permute.xlu1 %5965  ;;  %v9819_v58 = vpop.permute.xlu0 %6027 }
 0x33f   :  { %12301 = vst [vmem:[#allocation39_spill] sm:$0xff] %v9817_v59  ;;  %12302 = vst [vmem:[#allocation32_spill] sm:$0xff] %v9819_v58  ;;  %v9843_v58 = vrot.slane %v3959_v63, %v7356_v50  ;;  %v5047_v63 = vcombine.low %v12312_v15, %v12311_v27  ;;  %v12319_v27 = vld [vmem:[#allocation295_spill] sm:$0xff]  ;;  %v12320_v15 = vld [vmem:[#allocation293_spill] sm:$0xff] }
 0x340   :  { %6209 = vrot.lane.b32.xlu1 %v12303_v16, %s7208_s24  ;;  %6271 = vrot.lane.b32.xlu0 %v2935_v33, %s7209_s25  ;;  %v9854_v33 = vrot.slane %v4503_v22, %v7356_v50  ;;  %v9857_v16 = vrot.slane %v4535_v25, %v7356_v50  ;;  %v12317_v25 = vld [vmem:[#allocation291_spill] sm:$0xff]  ;;  %v5623_v56 = vcombine.low %v12320_v15, %v12319_v27  ;;  %v12326_v27 = vld [vmem:[#allocation34_spill] sm:$0xff] }
 0x341   :  { %v4023_v21 = vcombine.low %v9843_v58, %v9846_v54  ;;  %v9885_v3 = vrot.slane %v5047_v63, %v7356_v50 }
 0x342   :  { %v9836_v59 = vpop.permute.xlu1 %5969  ;;  %v9838_v23 = vpop.permute.xlu0 %6031  ;;  %v4567_v22 = vcombine.low %v9854_v33, %v9857_v16  ;;  %v9909_v13 = vrot.slane %v5623_v56, %v7356_v50 }
 0x343   :  { %12308 = vst [vmem:[#allocation33_spill] sm:$0xff] %v9836_v59  ;;  %12309 = vst [vmem:[#allocation80_spill] sm:$0xff] %v9838_v23  ;;  %v5111_v35 = vcombine.low %v9885_v3, %v9888_v29 }
 0x344   :  { %6213 = vrot.lane.b32.xlu1 %v12310_v30, %s7208_s24  ;;  %6275 = vrot.lane.b32.xlu0 %v3479_v40, %s7209_s25  ;;  %v12318_v40 = vld [vmem:[#allocation289_spill] sm:$0xff] }
 0x345   :  { %v5591_v30 = vcombine.low %v12318_v40, %v12317_v25  ;;  %v12325_v40 = vld [vmem:[#allocation36_spill] sm:$0xff] }
 0x346   :  { %v9863_v59 = vpop.permute.xlu1 %5973  ;;  %v9865_v23 = vpop.permute.xlu0 %6035  ;;  %v1951_v15 = vcombine.low %v12326_v27, %v12325_v40  ;;  %v12331_v40 = vld [vmem:[#allocation78_spill] sm:$0xff]  ;;  %v12332_v27 = vld [vmem:[#allocation76_spill] sm:$0xff] }
 0x347   :  { %12315 = vst [vmem:[#allocation81_spill] sm:$0xff] %v9863_v59  ;;  %v9906_v41 = vrot.slane %v5591_v30, %v7356_v50  ;;  %v2495_v30 = vcombine.low %v12332_v27, %v12331_v40 }
 0x348   :  { %6217 = vrot.lane.b32.xlu1 %v12316_v26, %s7208_s24  ;;  %6279 = vrot.lane.b32.xlu0 %v4023_v21, %s7209_s25  ;;  %v12323_v21 = vld [vmem:[#allocation30_spill] sm:$0xff]  ;;  %v12324_v26 = vld [vmem:[#allocation28_spill] sm:$0xff]  ;;  %v9930_v17 = vrot.slane %v1951_v15, %v7356_v50 }
 0x349   :  { %v1919_v25 = vcombine.low %v12324_v26, %v12323_v21  ;;  %v12330_v21 = vld [vmem:[#allocation70_spill] sm:$0xff]  ;;  %v5655_v9 = vcombine.low %v9906_v41, %v9909_v13  ;;  %v9953_v46 = vrot.slane %v2495_v30, %v7356_v50 }
 0x34a   :  { %v9880_v6 = vpop.permute.xlu1 %6009  ;;  %v9882_v59 = vpop.permute.xlu0 %6071 }
 0x34b   :  { %12321 = vst [vmem:[#allocation74_spill] sm:$0xff] %v9880_v6 }
 0x34c   :  { %6221 = vrot.lane.b32.xlu1 %v12322_v5, %s7208_s24  ;;  %6283 = vrot.lane.b32.xlu0 %v4567_v22, %s7209_s25  ;;  %v9917_v22 = vrot.slane %v1919_v25, %v7356_v50  ;;  %v12329_v5 = vld [vmem:[#allocation72_spill] sm:$0xff]  ;;  %v12336_v25 = vld [vmem:[#allocation114_spill] sm:$0xff] }
 0x34d   :  { %v2463_v26 = vcombine.low %v12330_v21, %v12329_v5  ;;  %v12338_v5 = vld [vmem:[#allocation120_spill] sm:$0xff]  ;;  %v12339_v21 = vld [vmem:[#allocation118_spill] sm:$0xff] }
 0x34e   :  { %v9899_v6 = vpop.permute.xlu1 %6013  ;;  %v9901_v63 = vpop.permute.xlu0 %6075  ;;  %v3039_v40 = vcombine.low %v12339_v21, %v12338_v5  ;;  %v1983_v15 = vcombine.low %v9917_v22, %v9930_v17 }
 0x34f   :  { %12327 = vst [vmem:[#allocation75_spill] sm:$0xff] %v9899_v6  ;;  %v9950_v51 = vrot.slane %v2463_v26, %v7356_v50  ;;  %v12345_v26 = vld [vmem:[#allocation161_spill] sm:$0xff] }
 0x350   :  { %6225 = vrot.lane.b32.xlu1 %v12328_v19, %s7208_s24  ;;  %6287 = vrot.lane.b32.xlu0 %v5111_v35, %s7209_s25  ;;  %v12337_v35 = vld [vmem:[#allocation112_spill] sm:$0xff]  ;;  %v3583_v5 = vcombine.low %v12345_v26, %v12344_v45  ;;  %v12350_v26 = vld [vmem:[#allocation207_spill] sm:$0xff] }
 0x351   :  { %v3007_v19 = vcombine.low %v12337_v35, %v12336_v25  ;;  %v12342_v25 = vld [vmem:[#allocation157_spill] sm:$0xff]  ;;  %v12343_v35 = vld [vmem:[#allocation155_spill] sm:$0xff] }
 0x352   :  { %v9923_v6 = vpop.permute.xlu1 %6017  ;;  %v9925_v56 = vpop.permute.xlu0 %6079  ;;  %v3551_v60 = vcombine.low %v12343_v35, %v12342_v25  ;;  %v12348_v25 = vld [vmem:[#allocation201_spill] sm:$0xff]  ;;  %v12349_v35 = vld [vmem:[#allocation199_spill] sm:$0xff] }
 0x353   :  { %12333 = vst [vmem:[#allocation123_spill] sm:$0xff] %v9923_v6  ;;  %12334 = vst [vmem:[#allocation122_spill] sm:$0xff] %v9925_v56  ;;  %v4095_v45 = vcombine.low %v12349_v35, %v12348_v25  ;;  %v12357_v25 = vld [vmem:[#allocation247_spill] sm:$0xff] }
 0x354   :  { %6229 = vrot.lane.b32.xlu1 %v12335_v32, %s7208_s24  ;;  %6291 = vrot.lane.b32.xlu0 %v5655_v9, %s7209_s25  ;;  %v9958_v9 = vrot.slane %v3007_v19, %v7356_v50  ;;  %v9961_v32 = vrot.slane %v3039_v40, %v7356_v50  ;;  %v2936_v40 = vcombine.high %v9791_v37, %v9794_v4  ;;  %v12354_v37 = vld [vmem:[#allocation243_spill] sm:$0xff]  ;;  %v12355_v4 = vld [vmem:[#allocation241_spill] sm:$0xff] }
 0x356   :  { %v9941_v27 = vpop.permute.xlu1 %6021  ;;  %v9943_v6 = vpop.permute.xlu0 %6083  ;;  %v3071_v19 = vcombine.low %v9958_v9, %v9961_v32 }
 0x357   :  { %12340 = vst [vmem:[#allocation117_spill] sm:$0xff] %v9941_v27  ;;  %12341 = vst [vmem:[#allocation116_spill] sm:$0xff] %v9943_v6 }
 0x358   :  { %6265 = vrot.lane.b32.xlu1 %v1983_v15, %s7209_s25  ;;  %6327 = vrot.lane.b32.xlu0 %v1848_v44, %s7210_s26  ;;  %v2527_v15 = vcombine.low %v9950_v51, %v9953_v46  ;;  %v2392_v44 = vcombine.high %v9780_v53, %v9783_v48  ;;  %v9990_v53 = vrot.slane %v3551_v60, %v7356_v50 }
 0x359   :  { %v9993_v48 = vrot.slane %v3583_v5, %v7356_v50  ;;  %v3480_v5 = vcombine.high %v9822_v55, %v9825_v49 }
 0x35a   :  { %v9967_v21 = vpop.permute.xlu1 %6025  ;;  %v9969_v30 = vpop.permute.xlu0 %6087 }
 0x35b   :  { %12346 = vst [vmem:[#allocation166_spill] sm:$0xff] %v9967_v21  ;;  %12347 = vst [vmem:[#allocation165_spill] sm:$0xff] %v9969_v30  ;;  %v12351_v21 = vld [vmem:[#allocation205_spill] sm:$0xff]  ;;  %v3615_v60 = vcombine.low %v9990_v53, %v9993_v48 }
 0x35c   :  { %6269 = vrot.lane.b32.xlu1 %v2527_v15, %s7209_s25  ;;  %6331 = vrot.lane.b32.xlu0 %v2392_v44, %s7210_s26  ;;  %v4127_v27 = vcombine.low %v12351_v21, %v12350_v26  ;;  %v4639_v15 = vcombine.low %v12355_v4, %v12354_v37  ;;  %v12356_v44 = vld [vmem:[#allocation249_spill] sm:$0xff] }
 0x35d   :  { %v4671_v21 = vcombine.low %v12357_v25, %v12356_v44  ;;  %v12360_v44 = vld [vmem:[#allocation275_spill] sm:$0xff]  ;;  %v12361_v25 = vld [vmem:[#allocation273_spill] sm:$0xff] }
 0x35e   :  { %v9985_v30 = vpop.permute.xlu1 %6029  ;;  %v9987_v6 = vpop.permute.xlu0 %6091  ;;  %v10014_v37 = vrot.slane %v4639_v15, %v7356_v50 }
 0x35f   :  { %12352 = vst [vmem:[#allocation160_spill] sm:$0xff] %v9985_v30  ;;  %12353 = vst [vmem:[#allocation159_spill] sm:$0xff] %v9987_v6  ;;  %v4679_v4 = vrot.slane %v4671_v21, %v7356_v50  ;;  %v12362_v30 = vld [vmem:[#allocation279_spill] sm:$0xff]  ;;  %v4568_v21 = vcombine.high %v9854_v33, %v9857_v16 }
 0x360   :  { %6273 = vrot.lane.b32.xlu1 %v3071_v19, %s7209_s25  ;;  %6335 = vrot.lane.b32.xlu0 %v2936_v40, %s7210_s26  ;;  %v4103_v19 = vrot.slane %v4095_v45, %v7356_v50  ;;  %v4135_v40 = vrot.slane %v4127_v27, %v7356_v50  ;;  %v4024_v45 = vcombine.high %v9843_v58, %v9846_v54 }
 0x361   :  { %v4703_v15 = vcombine.low %v10014_v37, %v4679_v4 }
 0x362   :  { %v10001_v35 = vpop.permute.xlu1 %6033  ;;  %v10003_v26 = vpop.permute.xlu0 %6095  ;;  %v4159_v27 = vcombine.low %v4103_v19, %v4135_v40 }
 0x363   :  { %12358 = vst [vmem:[#allocation210_spill] sm:$0xff] %v10001_v35  ;;  %12359 = vst [vmem:[#allocation209_spill] sm:$0xff] %v10003_v26  ;;  %v5183_v35 = vcombine.low %v12361_v25, %v12360_v44  ;;  %v12363_v26 = vld [vmem:[#allocation277_spill] sm:$0xff] }
 0x364   :  { %6277 = vrot.lane.b32.xlu1 %v3615_v60, %s7209_s25  ;;  %6339 = vrot.lane.b32.xlu0 %v3480_v5, %s7210_s26  ;;  %v5215_v6 = vcombine.low %v12363_v26, %v12362_v30  ;;  %v12365_v60 = vld [vmem:[#allocation307_spill] sm:$0xff]  ;;  %v12366_v5 = vld [vmem:[#allocation305_spill] sm:$0xff]  ;;  %v5759_v26 = vcombine.low %v9165_v42, %v9177_v2  ;;  %v5112_v42 = vcombine.high %v9885_v3, %v9888_v29 }
 0x365   :  { %v5727_v30 = vcombine.low %v12366_v5, %v12365_v60  ;;  %v5191_v58 = vrot.slane %v5183_v35, %v7356_v50  ;;  %v1984_v60 = vcombine.high %v9917_v22, %v9930_v17  ;;  %v12373_v5 = vld [vmem:[#allocation21_spill] sm:$0xff]  ;;  %v12379_v22 = vld [vmem:[#allocation64_spill] sm:$0xff] }
 0x366   :  { %v10021_v55 = vpop.permute.xlu1 %6037  ;;  %v10023_v49 = vpop.permute.xlu0 %6099  ;;  %v5223_v54 = vrot.slane %v5215_v6, %v7356_v50 }
 0x367   :  { %12364 = vst [vmem:[#allocation204_spill] sm:$0xff] %v10021_v55  ;;  %v5735_v2 = vrot.slane %v5727_v30, %v7356_v50  ;;  %v12374_v30 = vld [vmem:[#allocation22_spill] sm:$0xff] }
 0x368   :  { %6281 = vrot.lane.b32.xlu1 %v4159_v27, %s7209_s25  ;;  %6343 = vrot.lane.b32.xlu0 %v4024_v45, %s7210_s26  ;;  %v5247_v16 = vcombine.low %v5191_v58, %v5223_v54  ;;  %v5767_v45 = vrot.slane %v5759_v26, %v7356_v50  ;;  %v12375_v26 = vcombine.low %v12373_v5, %v12374_v30 }
 0x36a   :  { %v10036_v44 = vpop.permute.xlu1 %6073  ;;  %v10038_v25 = vpop.permute.xlu0 %6135 }
 0x36b   :  { %12367 = vst [vmem:[#allocation203_spill] sm:$0xff] %v10036_v44  ;;  %v12397_v44 = vld [vmem:[#allocation235_spill] sm:$0xff] }
 0x36c   :  { %6285 = vrot.lane.b32.xlu1 %v4703_v15, %s7209_s25  ;;  %6347 = vrot.lane.b32.xlu0 %v4568_v21, %s7210_s26  ;;  %v5791_v15 = vcombine.low %v5735_v2, %v5767_v45  ;;  %v5656_v21 = vcombine.high %v9906_v41, %v9909_v13 }
 0x36e   :  { %v10044_v27 = vpop.permute.xlu1 %6077  ;;  %v10046_v33 = vpop.permute.xlu0 %6139 }
 0x36f   :  { %12368 = vst [vmem:[#allocation246_spill] sm:$0xff] %v10044_v27 }
 0x370   :  { %6289 = vrot.lane.b32.xlu1 %v5247_v16, %s7209_s25  ;;  %6351 = vrot.lane.b32.xlu0 %v5112_v42, %s7210_s26  ;;  %v2528_v16 = vcombine.high %v9950_v51, %v9953_v46  ;;  %v12378_v42 = vld [vmem:[#allocation62_spill] sm:$0xff] }
 0x371   :  { %v12380_v17 = vcombine.low %v12378_v42, %v12379_v22 }
 0x372   :  { %v10054_v6 = vpop.permute.xlu1 %6081  ;;  %v10056_v35 = vpop.permute.xlu0 %6143 }
 0x373   :  { %12369 = vst [vmem:[#allocation245_spill] sm:$0xff] %v10054_v6  ;;  %12370 = vst [vmem:[#allocation25_spill] sm:$0xff] %v10056_v35  ;;  %v4160_v6 = vcombine.high %v4103_v19, %v4135_v40 }
 0x374   :  { %6293 = vrot.lane.b32.xlu1 %v5791_v15, %s7209_s25  ;;  %6355 = vrot.lane.b32.xlu0 %v5656_v21, %s7210_s26 }
 0x376   :  { %v10062_v3 = vpop.permute.xlu1 %6085  ;;  %v10064_v29 = vpop.permute.xlu0 %6147 }
 0x377   :  { %12371 = vst [vmem:[#allocation24_spill] sm:$0xff] %v10062_v3  ;;  %12372 = vst [vmem:[#allocation67_spill] sm:$0xff] %v10064_v29  ;;  %v12389_v3 = vld [vmem:[#allocation148_spill] sm:$0xff]  ;;  %v12443_v29 = vld [vmem:[#allocation15_spill] sm:$0xff] }
 0x378   :  { %6329 = vrot.lane.b32.xlu1 %v1984_v60, %s7210_s26  ;;  %6391 = vrot.lane.b32.xlu0 %v12375_v26, %s7211_s27  ;;  %v3072_v60 = vcombine.high %v9958_v9, %v9961_v32  ;;  %v12383_v26 = vld [vmem:[#allocation104_spill] sm:$0xff] }
 0x37a   :  { %v10073_v41 = vpop.permute.xlu1 %6089  ;;  %v10075_v13 = vpop.permute.xlu0 %6151 }
 0x37b   :  { %12376 = vst [vmem:[#allocation66_spill] sm:$0xff] %v10073_v41  ;;  %12377 = vst [vmem:[#allocation109_spill] sm:$0xff] %v10075_v13  ;;  %v12384_v41 = vld [vmem:[#allocation106_spill] sm:$0xff]  ;;  %v12419_v13 = vcombine.high %v12378_v42, %v12379_v22  ;;  %v12429_v42 = vld [vmem:[#allocation169_spill] sm:$0xff] }
 0x37c   :  { %6333 = vrot.lane.b32.xlu1 %v2528_v16, %s7210_s26  ;;  %6395 = vrot.lane.b32.xlu0 %v12380_v17, %s7211_s27  ;;  %v12385_v51 = vcombine.low %v12383_v26, %v12384_v41  ;;  %v3616_v17 = vcombine.high %v9990_v53, %v9993_v48 }
 0x37e   :  { %v10084_v15 = vpop.permute.xlu1 %6093  ;;  %v10086_v21 = vpop.permute.xlu0 %6155 }
 0x37f   :  { %12381 = vst [vmem:[#allocation108_spill] sm:$0xff] %v10084_v15  ;;  %12382 = vst [vmem:[#allocation152_spill] sm:$0xff] %v10086_v21  ;;  %v12388_v15 = vld [vmem:[#allocation146_spill] sm:$0xff] }
 0x380   :  { %6337 = vrot.lane.b32.xlu1 %v3072_v60, %s7210_s26  ;;  %6399 = vrot.lane.b32.xlu0 %v12385_v51, %s7211_s27  ;;  %v12390_v9 = vcombine.low %v12388_v15, %v12389_v3  ;;  %v12392_v51 = vld [vmem:[#allocation189_spill] sm:$0xff]  ;;  %v12411_v21 = vld [vmem:[#allocation42_spill] sm:$0xff] }
 0x382   :  { %v10095_v46 = vpop.permute.xlu1 %6097  ;;  %v10097_v16 = vpop.permute.xlu0 %6159 }
 0x383   :  { %12386 = vst [vmem:[#allocation151_spill] sm:$0xff] %v10095_v46  ;;  %12387 = vst [vmem:[#allocation198_spill] sm:$0xff] %v10097_v16  ;;  %v12393_v46 = vld [vmem:[#allocation192_spill] sm:$0xff] }
 0x384   :  { %6341 = vrot.lane.b32.xlu1 %v3616_v17, %s7210_s26  ;;  %6403 = vrot.lane.b32.xlu0 %v12390_v9, %s7211_s27  ;;  %v12394_v27 = vcombine.low %v12392_v51, %v12393_v46  ;;  %v4704_v17 = vcombine.high %v10014_v37, %v4679_v4  ;;  %v12396_v9 = vld [vmem:[#allocation233_spill] sm:$0xff] }
 0x386   :  { %v10106_v32 = vpop.permute.xlu1 %6101  ;;  %v10108_v60 = vpop.permute.xlu0 %6163 }
 0x387   :  { %12391 = vst [vmem:[#allocation196_spill] sm:$0xff] %v10106_v32  ;;  %v12398_v32 = vcombine.low %v12396_v9, %v12397_v44 }
 0x388   :  { %6345 = vrot.lane.b32.xlu1 %v4160_v6, %s7210_s26  ;;  %6407 = vrot.lane.b32.xlu0 %v12394_v27, %s7211_s27  ;;  %v5248_v6 = vcombine.high %v5191_v58, %v5223_v54  ;;  %v12400_v27 = vld [vmem:[#allocation267_spill] sm:$0xff] }
 0x38a   :  { %v10115_v53 = vpop.permute.xlu1 %6137  ;;  %v10117_v48 = vpop.permute.xlu0 %6199 }
 0x38b   :  { %12395 = vst [vmem:[#allocation240_spill] sm:$0xff] %v10115_v53  ;;  %v12401_v53 = vld [vmem:[#allocation269_spill] sm:$0xff] }
 0x38c   :  { %6349 = vrot.lane.b32.xlu1 %v4704_v17, %s7210_s26  ;;  %6411 = vrot.lane.b32.xlu0 %v12398_v32, %s7211_s27  ;;  %v12402_v55 = vcombine.low %v12400_v27, %v12401_v53  ;;  %v5792_v17 = vcombine.high %v5735_v2, %v5767_v45  ;;  %v12405_v32 = vld [vmem:[#allocation297_spill] sm:$0xff]  ;;  %v12413_v2 = vcombine.high %v12373_v5, %v12374_v30  ;;  %v12422_v5 = vld [vmem:[#allocation124_spill] sm:$0xff]  ;;  %v12423_v30 = vld [vmem:[#allocation126_spill] sm:$0xff] }
 0x38e   :  { %v10125_v19 = vpop.permute.xlu1 %6141  ;;  %v10127_v40 = vpop.permute.xlu0 %6203 }
 0x38f   :  { %12399 = vst [vmem:[#allocation238_spill] sm:$0xff] %v10125_v19  ;;  %v12406_v19 = vld [vmem:[#allocation298_spill] sm:$0xff] }
 0x390   :  { %6353 = vrot.lane.b32.xlu1 %v5248_v6, %s7210_s26  ;;  %6415 = vrot.lane.b32.xlu0 %v12402_v55, %s7211_s27  ;;  %v12407_v16 = vcombine.low %v12405_v32, %v12406_v19  ;;  %v12410_v6 = vld [vmem:[#allocation40_spill] sm:$0xff] }
 0x391   :  { %v12412_v55 = vcombine.low %v12410_v6, %v12411_v21 }
 0x392   :  { %v10134_v37 = vpop.permute.xlu1 %6145  ;;  %v10136_v4 = vpop.permute.xlu0 %6207 }
 0x393   :  { %12403 = vst [vmem:[#allocation304_spill] sm:$0xff] %v10134_v37  ;;  %12404 = vst [vmem:[#allocation302_spill] sm:$0xff] %v10136_v4  ;;  %v12448_v4 = vld [vmem:[#allocation281_spill] sm:$0xff] }
 0x394   :  { %6357 = vrot.lane.b32.xlu1 %v5792_v17, %s7210_s26  ;;  %6419 = vrot.lane.b32.xlu0 %v12407_v16, %s7211_s27  ;;  %v12416_v16 = vld [vmem:[#allocation82_spill] sm:$0xff]  ;;  %v12450_v35 = vcombine.low %v12448_v4, %v12449_v10 }
 0x396   :  { %v10143_v58 = vpop.permute.xlu1 %6149  ;;  %v10145_v54 = vpop.permute.xlu0 %6211 }
 0x397   :  { %12408 = vst [vmem:[#allocation47_spill] sm:$0xff] %v10143_v58  ;;  %12409 = vst [vmem:[#allocation46_spill] sm:$0xff] %v10145_v54  ;;  %v12417_v58 = vld [vmem:[#allocation84_spill] sm:$0xff] }
 0x398   :  { %6393 = vrot.lane.b32.xlu1 %v12412_v55, %s7211_s27  ;;  %6455 = vrot.lane.b32.xlu0 %v12413_v2, %s7212_s28  ;;  %v12418_v37 = vcombine.low %v12416_v16, %v12417_v58  ;;  %v12424_v2 = vcombine.low %v12422_v5, %v12423_v30 }
 0x39a   :  { %v10155_v45 = vpop.permute.xlu1 %6153  ;;  %v10157_v17 = vpop.permute.xlu0 %6215 }
 0x39b   :  { %12414 = vst [vmem:[#allocation89_spill] sm:$0xff] %v10155_v45  ;;  %12415 = vst [vmem:[#allocation88_spill] sm:$0xff] %v10157_v17  ;;  %v12425_v45 = vcombine.high %v12383_v26, %v12384_v41  ;;  %v12433_v41 = vld [vmem:[#allocation211_spill] sm:$0xff]  ;;  %v12434_v26 = vld [vmem:[#allocation214_spill] sm:$0xff] }
 0x39c   :  { %6397 = vrot.lane.b32.xlu1 %v12418_v37, %s7211_s27  ;;  %6459 = vrot.lane.b32.xlu0 %v12419_v13, %s7212_s28  ;;  %v12428_v13 = vld [vmem:[#allocation167_spill] sm:$0xff] }
 0x39d   :  { %v12430_v22 = vcombine.low %v12428_v13, %v12429_v42 }
 0x39e   :  { %v10167_v55 = vpop.permute.xlu1 %6157  ;;  %v10169_v54 = vpop.permute.xlu0 %6219 }
 0x39f   :  { %12420 = vst [vmem:[#allocation131_spill] sm:$0xff] %v10167_v55  ;;  %12421 = vst [vmem:[#allocation130_spill] sm:$0xff] %v10169_v54  ;;  %v12431_v55 = vcombine.high %v12388_v15, %v12389_v3  ;;  %v12438_v3 = vld [vmem:[#allocation251_spill] sm:$0xff]  ;;  %v12439_v15 = vld [vmem:[#allocation253_spill] sm:$0xff] }
 0x3a0   :  { %6401 = vrot.lane.b32.xlu1 %v12424_v2, %s7211_s27  ;;  %6463 = vrot.lane.b32.xlu0 %v12425_v45, %s7212_s28  ;;  %v12435_v45 = vcombine.low %v12433_v41, %v12434_v26 }
 0x3a2   :  { %v10179_v37 = vpop.permute.xlu1 %6161  ;;  %v10181_v17 = vpop.permute.xlu0 %6223 }
 0x3a3   :  { %12426 = vst [vmem:[#allocation174_spill] sm:$0xff] %v10179_v37  ;;  %12427 = vst [vmem:[#allocation173_spill] sm:$0xff] %v10181_v17  ;;  %v12436_v37 = vcombine.high %v12392_v51, %v12393_v46  ;;  %v12446_v51 = vld [vmem:[#allocation11_spill] sm:$0xff] }
 0x3a4   :  { %6405 = vrot.lane.b32.xlu1 %v12430_v22, %s7211_s27  ;;  %6467 = vrot.lane.b32.xlu0 %v12431_v55, %s7212_s28  ;;  %v12440_v55 = vcombine.low %v12438_v3, %v12439_v15 }
 0x3a6   :  { %v10191_v2 = vpop.permute.xlu1 %6165  ;;  %v10193_v54 = vpop.permute.xlu0 %6227 }
 0x3a7   :  { %12432 = vst [vmem:[#allocation220_spill] sm:$0xff] %v10191_v2  ;;  %v12441_v2 = vcombine.high %v12396_v9, %v12397_v44  ;;  %v12451_v44 = vcombine.high %v12400_v27, %v12401_v53  ;;  %v12452_v9 = vld [vmem:[#allocation53_spill] sm:$0xff]  ;;  %v12459_v53 = vcombine.high %v12405_v32, %v12406_v19  ;;  %v12466_v32 = vcombine.high %v12410_v6, %v12411_v21 }
 0x3a8   :  { %6409 = vrot.lane.b32.xlu1 %v12435_v45, %s7211_s27  ;;  %6471 = vrot.lane.b32.xlu0 %v12436_v37, %s7212_s28  ;;  %v12442_v45 = vld [vmem:[#allocation17_spill] sm:$0xff]  ;;  %v12473_v6 = vcombine.high %v12416_v16, %v12417_v58  ;;  %v12480_v16 = vcombine.high %v12422_v5, %v12423_v30  ;;  %v12487_v30 = vcombine.high %v12428_v13, %v12429_v42 }
 0x3a9   :  { %v1831_v7 = vcombine.low %v12443_v29, %v12442_v45  ;;  %v12447_v37 = vld [vmem:[#allocation9_spill] sm:$0xff]  ;;  %v12493_v42 = vcombine.high %v12433_v41, %v12434_v26  ;;  %v12499_v26 = vcombine.high %v12438_v3, %v12439_v15  ;;  %v12506_v15 = vcombine.high %v12448_v4, %v12449_v10 }
 0x3aa   :  { %v10203_v22 = vpop.permute.xlu1 %6201  ;;  %v10205_v17 = vpop.permute.xlu0 %6263  ;;  %v12455_v45 = vld [vmem:[#allocation57_spill] sm:$0xff]  ;;  %v12513_v4 = vcombine.high %v9199_v12, %v9205_v61 }
 0x3ab   :  { %12437 = vst [vmem:[#allocation218_spill] sm:$0xff] %v10203_v22  ;;  %v1799_v22 = vcombine.low %v12447_v37, %v12446_v51  ;;  %v10240_v51 = vrot.slane %v1831_v7, %v7356_v50  ;;  %v12460_v37 = vld [vmem:[#allocation95_spill] sm:$0xff] }
 0x3ac   :  { %6413 = vrot.lane.b32.xlu1 %v12440_v55, %s7211_s27  ;;  %6475 = vrot.lane.b32.xlu0 %v12441_v2, %s7212_s28  ;;  %v12453_v2 = vld [vmem:[#allocation51_spill] sm:$0xff] }
 0x3ad   :  { %v2343_v29 = vcombine.low %v12453_v2, %v12452_v9  ;;  %v12454_v55 = vld [vmem:[#allocation59_spill] sm:$0xff]  ;;  %v10251_v27 = vrot.slane %v1799_v22, %v7356_v50  ;;  %v12462_v2 = vld [vmem:[#allocation101_spill] sm:$0xff] }
 0x3ae   :  { %v10217_v1 = vpop.permute.xlu1 %6205  ;;  %v10219_v46 = vpop.permute.xlu0 %6267 }
 0x3af   :  { %12444 = vst [vmem:[#allocation256_spill] sm:$0xff] %v10217_v1  ;;  %12445 = vst [vmem:[#allocation255_spill] sm:$0xff] %v10219_v46  ;;  %v2375_v1 = vcombine.low %v12455_v45, %v12454_v55  ;;  %v12463_v55 = vld [vmem:[#allocation99_spill] sm:$0xff] }
 0x3b0   :  { %6417 = vrot.lane.b32.xlu1 %v12450_v35, %s7211_s27  ;;  %6479 = vrot.lane.b32.xlu0 %v12451_v44, %s7212_s28  ;;  %v12458_v35 = vcombine.low %v9199_v12, %v9205_v61  ;;  %v12461_v44 = vld [vmem:[#allocation93_spill] sm:$0xff]  ;;  %v2919_v7 = vcombine.low %v12463_v55, %v12462_v2  ;;  %v12469_v2 = vld [vmem:[#allocation143_spill] sm:$0xff] }
 0x3b1   :  { %v2887_v9 = vcombine.low %v12461_v44, %v12460_v37  ;;  %v10267_v19 = vrot.slane %v2375_v1, %v7356_v50  ;;  %v12467_v37 = vld [vmem:[#allocation137_spill] sm:$0xff] }
 0x3b2   :  { %v10235_v36 = vpop.permute.xlu1 %6209  ;;  %v10237_v56 = vpop.permute.xlu0 %6271  ;;  %v12470_v1 = vld [vmem:[#allocation141_spill] sm:$0xff] }
 0x3b3   :  { %12456 = vst [vmem:[#allocation16_spill] sm:$0xff] %v10235_v36  ;;  %12457 = vst [vmem:[#allocation14_spill] sm:$0xff] %v10237_v56  ;;  %v10264_v56 = vrot.slane %v2343_v29, %v7356_v50  ;;  %v10275_v22 = vrot.slane %v2887_v9, %v7356_v50  ;;  %v12468_v29 = vld [vmem:[#allocation135_spill] sm:$0xff]  ;;  %v3463_v55 = vcombine.low %v12470_v1, %v12469_v2 }
 0x3b4   :  { %6421 = vrot.lane.b32.xlu1 %v12458_v35, %s7211_s27  ;;  %6483 = vrot.lane.b32.xlu0 %v12459_v53, %s7212_s28  ;;  %v1851_v35 = vcombine.low %v10251_v27, %v10240_v51  ;;  %v10278_v53 = vrot.slane %v2919_v7, %v7356_v50  ;;  %v3431_v44 = vcombine.low %v12468_v29, %v12467_v37  ;;  %v12474_v7 = vld [vmem:[#allocation180_spill] sm:$0xff]  ;;  %v12476_v37 = vld [vmem:[#allocation186_spill] sm:$0xff] }
 0x3b5   :  { %v2395_v21 = vcombine.low %v10264_v56, %v10267_v19  ;;  %v12477_v29 = vld [vmem:[#allocation184_spill] sm:$0xff]  ;;  %v10309_v58 = vrot.slane %v3463_v55, %v7356_v50 }
 0x3b6   :  { %v10257_v45 = vpop.permute.xlu1 %6213  ;;  %v10259_v36 = vpop.permute.xlu0 %6275  ;;  %v2939_v9 = vcombine.low %v10275_v22, %v10278_v53  ;;  %v4007_v2 = vcombine.low %v12477_v29, %v12476_v37  ;;  %v12484_v37 = vld [vmem:[#allocation228_spill] sm:$0xff] }
 0x3b7   :  { %12464 = vst [vmem:[#allocation10_spill] sm:$0xff] %v10257_v45  ;;  %12465 = vst [vmem:[#allocation8_spill] sm:$0xff] %v10259_v36 }
 0x3b8   :  { %6457 = vrot.lane.b32.xlu1 %v12466_v32, %s7212_s28  ;;  %6519 = vrot.lane.b32.xlu0 %v1851_v35, %s7213_s29  ;;  %v12475_v35 = vld [vmem:[#allocation178_spill] sm:$0xff]  ;;  %v10330_v5 = vrot.slane %v4007_v2, %v7356_v50 }
 0x3b9   :  { %v3975_v32 = vcombine.low %v12475_v35, %v12474_v7  ;;  %v12483_v35 = vld [vmem:[#allocation230_spill] sm:$0xff] }
 0x3ba   :  { %v10284_v45 = vpop.permute.xlu1 %6217  ;;  %v10286_v36 = vpop.permute.xlu0 %6279  ;;  %v4551_v29 = vcombine.low %v12484_v37, %v12483_v35  ;;  %v12490_v35 = vld [vmem:[#allocation266_spill] sm:$0xff]  ;;  %v12491_v37 = vld [vmem:[#allocation264_spill] sm:$0xff] }
 0x3bb   :  { %12471 = vst [vmem:[#allocation288_spill] sm:$0xff] %v10284_v45  ;;  %12472 = vst [vmem:[#allocation286_spill] sm:$0xff] %v10286_v36  ;;  %v10306_v36 = vrot.slane %v3431_v44, %v7356_v50  ;;  %v5095_v2 = vcombine.low %v12491_v37, %v12490_v35 }
 0x3bc   :  { %6461 = vrot.lane.b32.xlu1 %v12473_v6, %s7212_s28  ;;  %6523 = vrot.lane.b32.xlu0 %v2395_v21, %s7213_s29  ;;  %v12481_v21 = vld [vmem:[#allocation224_spill] sm:$0xff]  ;;  %v12482_v6 = vld [vmem:[#allocation222_spill] sm:$0xff] }
 0x3bd   :  { %v4519_v7 = vcombine.low %v12482_v6, %v12481_v21  ;;  %v3483_v55 = vcombine.low %v10306_v36, %v10309_v58  ;;  %v12488_v21 = vld [vmem:[#allocation262_spill] sm:$0xff]  ;;  %v12489_v6 = vld [vmem:[#allocation260_spill] sm:$0xff]  ;;  %v10372_v41 = vrot.slane %v5095_v2, %v7356_v50 }
 0x3be   :  { %v10301_v1 = vpop.permute.xlu1 %6221  ;;  %v10303_v45 = vpop.permute.xlu0 %6283 }
 0x3bf   :  { %12478 = vst [vmem:[#allocation52_spill] sm:$0xff] %v10301_v1  ;;  %12479 = vst [vmem:[#allocation50_spill] sm:$0xff] %v10303_v45  ;;  %v10327_v45 = vrot.slane %v3975_v32, %v7356_v50  ;;  %v5063_v32 = vcombine.low %v12489_v6, %v12488_v21  ;;  %v12496_v21 = vld [vmem:[#allocation296_spill] sm:$0xff]  ;;  %v12497_v6 = vld [vmem:[#allocation294_spill] sm:$0xff] }
 0x3c0   :  { %6465 = vrot.lane.b32.xlu1 %v12480_v16, %s7212_s28  ;;  %6527 = vrot.lane.b32.xlu0 %v2939_v9, %s7213_s29  ;;  %v10338_v9 = vrot.slane %v4519_v7, %v7356_v50  ;;  %v10341_v16 = vrot.slane %v4551_v29, %v7356_v50  ;;  %v12494_v29 = vld [vmem:[#allocation292_spill] sm:$0xff]  ;;  %v5639_v35 = vcombine.low %v12497_v6, %v12496_v21  ;;  %v12503_v21 = vld [vmem:[#allocation35_spill] sm:$0xff] }
 0x3c1   :  { %v4027_v13 = vcombine.low %v10327_v45, %v10330_v5  ;;  %v10369_v31 = vrot.slane %v5063_v32, %v7356_v50 }
 0x3c2   :  { %v10320_v1 = vpop.permute.xlu1 %6225  ;;  %v10322_v44 = vpop.permute.xlu0 %6287  ;;  %v4571_v7 = vcombine.low %v10338_v9, %v10341_v16  ;;  %v10393_v3 = vrot.slane %v5639_v35, %v7356_v50 }
 0x3c3   :  { %12485 = vst [vmem:[#allocation58_spill] sm:$0xff] %v10320_v1  ;;  %12486 = vst [vmem:[#allocation56_spill] sm:$0xff] %v10322_v44  ;;  %v5115_v2 = vcombine.low %v10369_v31, %v10372_v41 }
 0x3c4   :  { %6469 = vrot.lane.b32.xlu1 %v12487_v30, %s7212_s28  ;;  %6531 = vrot.lane.b32.xlu0 %v3483_v55, %s7213_s29  ;;  %v12495_v55 = vld [vmem:[#allocation290_spill] sm:$0xff] }
 0x3c5   :  { %v5607_v30 = vcombine.low %v12495_v55, %v12494_v29  ;;  %v12502_v55 = vld [vmem:[#allocation37_spill] sm:$0xff] }
 0x3c6   :  { %v10347_v1 = vpop.permute.xlu1 %6229  ;;  %v10349_v44 = vpop.permute.xlu0 %6291  ;;  %v1967_v6 = vcombine.low %v12503_v21, %v12502_v55  ;;  %v12509_v55 = vld [vmem:[#allocation79_spill] sm:$0xff]  ;;  %v12510_v21 = vld [vmem:[#allocation77_spill] sm:$0xff] }
 0x3c7   :  { %12492 = vst [vmem:[#allocation94_spill] sm:$0xff] %v10347_v1  ;;  %v10390_v46 = vrot.slane %v5607_v30, %v7356_v50  ;;  %v2511_v30 = vcombine.low %v12510_v21, %v12509_v55 }
 0x3c8   :  { %6473 = vrot.lane.b32.xlu1 %v12493_v42, %s7212_s28  ;;  %6535 = vrot.lane.b32.xlu0 %v4027_v13, %s7213_s29  ;;  %v12500_v13 = vld [vmem:[#allocation31_spill] sm:$0xff]  ;;  %v12501_v42 = vld [vmem:[#allocation29_spill] sm:$0xff]  ;;  %v10414_v10 = vrot.slane %v1967_v6, %v7356_v50 }
 0x3c9   :  { %v1935_v29 = vcombine.low %v12501_v42, %v12500_v13  ;;  %v12508_v13 = vld [vmem:[#allocation71_spill] sm:$0xff]  ;;  %v10437_v61 = vrot.slane %v2511_v30, %v7356_v50 }
 0x3ca   :  { %v10364_v37 = vpop.permute.xlu1 %6265  ;;  %v10366_v1 = vpop.permute.xlu0 %6327 }
 0x3cb   :  { %12498 = vst [vmem:[#allocation92_spill] sm:$0xff] %v10364_v37 }
 0x3cc   :  { %6477 = vrot.lane.b32.xlu1 %v12499_v26, %s7212_s28  ;;  %6539 = vrot.lane.b32.xlu0 %v4571_v7, %s7213_s29  ;;  %v10401_v7 = vrot.slane %v1935_v29, %v7356_v50  ;;  %v12507_v26 = vld [vmem:[#allocation73_spill] sm:$0xff]  ;;  %v12514_v29 = vld [vmem:[#allocation115_spill] sm:$0xff] }
 0x3cd   :  { %v2479_v42 = vcombine.low %v12508_v13, %v12507_v26  ;;  %v12516_v26 = vld [vmem:[#allocation121_spill] sm:$0xff]  ;;  %v12517_v13 = vld [vmem:[#allocation119_spill] sm:$0xff] }
 0x3ce   :  { %v10383_v37 = vpop.permute.xlu1 %6269  ;;  %v10385_v32 = vpop.permute.xlu0 %6331  ;;  %v3055_v55 = vcombine.low %v12517_v13, %v12516_v26  ;;  %v1987_v6 = vcombine.low %v10401_v7, %v10414_v10 }
 0x3cf   :  { %12504 = vst [vmem:[#allocation100_spill] sm:$0xff] %v10383_v37  ;;  %12505 = vst [vmem:[#allocation98_spill] sm:$0xff] %v10385_v32  ;;  %v5659_v32 = vcombine.low %v10390_v46, %v10393_v3  ;;  %v10434_v12 = vrot.slane %v2479_v42, %v7356_v50  ;;  %v12523_v42 = vld [vmem:[#allocation162_spill] sm:$0xff] }
 0x3d0   :  { %6481 = vrot.lane.b32.xlu1 %v12506_v15, %s7212_s28  ;;  %6543 = vrot.lane.b32.xlu0 %v5115_v2, %s7213_s29  ;;  %v12515_v2 = vld [vmem:[#allocation113_spill] sm:$0xff] }
 0x3d1   :  { %v3023_v15 = vcombine.low %v12515_v2, %v12514_v29  ;;  %v12520_v29 = vld [vmem:[#allocation158_spill] sm:$0xff]  ;;  %v12521_v2 = vld [vmem:[#allocation156_spill] sm:$0xff] }
 0x3d2   :  { %v10407_v37 = vpop.permute.xlu1 %6273  ;;  %v10409_v35 = vpop.permute.xlu0 %6335 }
 0x3d3   :  { %12511 = vst [vmem:[#allocation136_spill] sm:$0xff] %v10407_v37  ;;  %12512 = vst [vmem:[#allocation134_spill] sm:$0xff] %v10409_v35  ;;  %v1852_v35 = vcombine.high %v10251_v27, %v10240_v51  ;;  %v3567_v51 = vcombine.low %v12521_v2, %v12520_v29  ;;  %v12522_v27 = vld [vmem:[#allocation164_spill] sm:$0xff]  ;;  %v12526_v29 = vld [vmem:[#allocation202_spill] sm:$0xff] }
 0x3d4   :  { %6485 = vrot.lane.b32.xlu1 %v12513_v4, %s7212_s28  ;;  %6547 = vrot.lane.b32.xlu0 %v5659_v32, %s7213_s29  ;;  %v10442_v32 = vrot.slane %v3023_v15, %v7356_v50  ;;  %v10445_v4 = vrot.slane %v3055_v55, %v7356_v50  ;;  %v3599_v26 = vcombine.low %v12523_v42, %v12522_v27  ;;  %v12527_v2 = vld [vmem:[#allocation200_spill] sm:$0xff] }
 0x3d5   :  { %v2940_v55 = vcombine.high %v10275_v22, %v10278_v53  ;;  %v4111_v27 = vcombine.low %v12527_v2, %v12526_v29  ;;  %v12528_v42 = vld [vmem:[#allocation208_spill] sm:$0xff]  ;;  %v12533_v53 = vld [vmem:[#allocation242_spill] sm:$0xff] }
 0x3d6   :  { %v10425_v21 = vpop.permute.xlu1 %6277  ;;  %v10427_v37 = vpop.permute.xlu0 %6339  ;;  %v3075_v15 = vcombine.low %v10442_v32, %v10445_v4  ;;  %v12532_v22 = vld [vmem:[#allocation244_spill] sm:$0xff] }
 0x3d7   :  { %12518 = vst [vmem:[#allocation142_spill] sm:$0xff] %v10425_v21  ;;  %12519 = vst [vmem:[#allocation140_spill] sm:$0xff] %v10427_v37  ;;  %v12535_v29 = vld [vmem:[#allocation248_spill] sm:$0xff] }
 0x3d8   :  { %6521 = vrot.lane.b32.xlu1 %v1987_v6, %s7213_s29  ;;  %6583 = vrot.lane.b32.xlu0 %v1852_v35, %s7214_s30  ;;  %v2531_v6 = vcombine.low %v10434_v12, %v10437_v61  ;;  %v2396_v35 = vcombine.high %v10264_v56, %v10267_v19  ;;  %v10474_v56 = vrot.slane %v3567_v51, %v7356_v50 }
 0x3d9   :  { %v10477_v19 = vrot.slane %v3599_v26, %v7356_v50  ;;  %v3484_v26 = vcombine.high %v10306_v36, %v10309_v58  ;;  %v12540_v36 = vld [vmem:[#allocation280_spill] sm:$0xff]  ;;  %v12541_v58 = vld [vmem:[#allocation278_spill] sm:$0xff] }
 0x3da   :  { %v10451_v13 = vpop.permute.xlu1 %6281  ;;  %v10453_v30 = vpop.permute.xlu0 %6343 }
 0x3db   :  { %12524 = vst [vmem:[#allocation179_spill] sm:$0xff] %v10451_v13  ;;  %12525 = vst [vmem:[#allocation177_spill] sm:$0xff] %v10453_v30  ;;  %v12529_v13 = vld [vmem:[#allocation206_spill] sm:$0xff]  ;;  %v3619_v51 = vcombine.low %v10474_v56, %v10477_v19 }
 0x3dc   :  { %6525 = vrot.lane.b32.xlu1 %v2531_v6, %s7213_s29  ;;  %6587 = vrot.lane.b32.xlu0 %v2396_v35, %s7214_s30  ;;  %v4143_v21 = vcombine.low %v12529_v13, %v12528_v42  ;;  %v4655_v6 = vcombine.low %v12533_v53, %v12532_v22  ;;  %v12534_v35 = vld [vmem:[#allocation250_spill] sm:$0xff] }
 0x3dd   :  { %v4687_v13 = vcombine.low %v12535_v29, %v12534_v35  ;;  %v12538_v35 = vld [vmem:[#allocation276_spill] sm:$0xff]  ;;  %v12539_v29 = vld [vmem:[#allocation274_spill] sm:$0xff] }
 0x3de   :  { %v10469_v30 = vpop.permute.xlu1 %6285  ;;  %v10471_v37 = vpop.permute.xlu0 %6347  ;;  %v10502_v22 = vrot.slane %v4655_v6, %v7356_v50  ;;  %v4028_v6 = vcombine.high %v10327_v45, %v10330_v5 }
 0x3df   :  { %12530 = vst [vmem:[#allocation185_spill] sm:$0xff] %v10469_v30  ;;  %12531 = vst [vmem:[#allocation183_spill] sm:$0xff] %v10471_v37  ;;  %v10505_v53 = vrot.slane %v4687_v13, %v7356_v50 }
 0x3e0   :  { %6529 = vrot.lane.b32.xlu1 %v3075_v15, %s7213_s29  ;;  %6591 = vrot.lane.b32.xlu0 %v2940_v55, %s7214_s30  ;;  %v10494_v15 = vrot.slane %v4111_v27, %v7356_v50  ;;  %v10497_v55 = vrot.slane %v4143_v21, %v7356_v50  ;;  %v5231_v27 = vcombine.low %v12541_v58, %v12540_v36  ;;  %v12545_v58 = vld [vmem:[#allocation150_spill] sm:$0xff] }
 0x3e1   :  { %v4707_v13 = vcombine.low %v10502_v22, %v10505_v53 }
 0x3e2   :  { %v10485_v2 = vpop.permute.xlu1 %6289  ;;  %v10487_v42 = vpop.permute.xlu0 %6351  ;;  %v10537_v5 = vrot.slane %v5231_v27, %v7356_v50 }
 0x3e3   :  { %12536 = vst [vmem:[#allocation223_spill] sm:$0xff] %v10485_v2  ;;  %12537 = vst [vmem:[#allocation221_spill] sm:$0xff] %v10487_v42  ;;  %v5199_v2 = vcombine.low %v12539_v29, %v12538_v35  ;;  %v12543_v35 = vld [vmem:[#allocation308_spill] sm:$0xff]  ;;  %v12544_v29 = vld [vmem:[#allocation306_spill] sm:$0xff] }
 0x3e4   :  { %6533 = vrot.lane.b32.xlu1 %v3619_v51, %s7213_s29  ;;  %6595 = vrot.lane.b32.xlu0 %v3484_v26, %s7214_s30  ;;  %v4163_v51 = vcombine.low %v10494_v15, %v10497_v55  ;;  %v4572_v26 = vcombine.high %v10338_v9, %v10341_v16  ;;  %v5743_v36 = vcombine.low %v12544_v29, %v12543_v35  ;;  %v12546_v35 = vld [vmem:[#allocation26_spill] sm:$0xff]  ;;  %v12547_v29 = vld [vmem:[#allocation27_spill] sm:$0xff] }
 0x3e5   :  { %v10534_v45 = vrot.slane %v5199_v2, %v7356_v50 }
 0x3e6   :  { %v10511_v30 = vpop.permute.xlu1 %6293  ;;  %v10513_v21 = vpop.permute.xlu0 %6355  ;;  %v10550_v2 = vrot.slane %v5743_v36, %v7356_v50  ;;  %v12548_v36 = vcombine.low %v12546_v35, %v12547_v29 }
 0x3e7   :  { %12542 = vst [vmem:[#allocation229_spill] sm:$0xff] %v10511_v30  ;;  %v5775_v30 = vcombine.low %v12545_v58, %v9180_v18  ;;  %v5251_v18 = vcombine.low %v10534_v45, %v10537_v5  ;;  %v2532_v58 = vcombine.high %v10434_v12, %v10437_v61  ;;  %v3076_v12 = vcombine.high %v10442_v32, %v10445_v4 }
 0x3e8   :  { %6537 = vrot.lane.b32.xlu1 %v4163_v51, %s7213_s29  ;;  %6599 = vrot.lane.b32.xlu0 %v4028_v6, %s7214_s30  ;;  %v5116_v51 = vcombine.high %v10369_v31, %v10372_v41  ;;  %v5660_v31 = vcombine.high %v10390_v46, %v10393_v3 }
 0x3e9   :  { %v10553_v27 = vrot.slane %v5775_v30, %v7356_v50  ;;  %v1988_v30 = vcombine.high %v10401_v7, %v10414_v10  ;;  %v12551_v7 = vld [vmem:[#allocation69_spill] sm:$0xff] }
 0x3ea   :  { %v10529_v42 = vpop.permute.xlu1 %6329  ;;  %v10531_v37 = vpop.permute.xlu0 %6391 }
 0x3ec   :  { %6541 = vrot.lane.b32.xlu1 %v4707_v13, %s7213_s29  ;;  %6603 = vrot.lane.b32.xlu0 %v4572_v26, %s7214_s30  ;;  %v5795_v26 = vcombine.low %v10550_v2, %v10553_v27 }
 0x3ee   :  { %v10541_v9 = vpop.permute.xlu1 %6333  ;;  %v10543_v16 = vpop.permute.xlu0 %6395 }
 0x3f0   :  { %6545 = vrot.lane.b32.xlu1 %v5251_v18, %s7213_s29  ;;  %6607 = vrot.lane.b32.xlu0 %v5116_v51, %s7214_s30  ;;  %v12550_v18 = vld [vmem:[#allocation68_spill] sm:$0xff] }
 0x3f1   :  { %v12552_v10 = vcombine.low %v12550_v18, %v12551_v7  ;;  %v12553_v51 = vld [vmem:[#allocation300_spill] sm:$0xff] }
 0x3f2   :  { %v10557_v6 = vpop.permute.xlu1 %6337  ;;  %v10559_v13 = vpop.permute.xlu0 %6399 }
 0x3f4   :  { %6549 = vrot.lane.b32.xlu1 %v5795_v26, %s7213_s29  ;;  %6611 = vrot.lane.b32.xlu0 %v5660_v31, %s7214_s30  ;;  %v12554_v26 = vld [vmem:[#allocation301_spill] sm:$0xff] }
 0x3f5   :  { %v12555_v31 = vcombine.low %v12553_v51, %v12554_v26  ;;  %v12560_v26 = vld [vmem:[#allocation20_spill] sm:$0xff] }
 0x3f6   :  { %v10567_v50 = vpop.permute.xlu1 %6341  ;;  %v10569_v41 = vpop.permute.xlu0 %6403 }
 0x3f8   :  { %6585 = vrot.lane.b32.xlu1 %v1988_v30, %s7214_s30  ;;  %6647 = vrot.lane.b32.xlu0 %v12548_v36, %s7215_s2  ;;  %v6774_v30 = vsel %vm6759_vm0, %v12555_v31, %v9542_v39  ;;  %v12557_v39 = vld [vmem:[#allocation110_spill] sm:$0xff]  ;;  %v12561_v31 = vld [vmem:[#allocation23_spill] sm:$0xff] }
 0x3f9   :  { %v6791_v61 = vsel %vm6776_vm1, %v6774_v30, %v9625_v34 }
 0x3fa   :  { %v10578_v46 = vpop.permute.xlu1 %6345  ;;  %v10580_v3 = vpop.permute.xlu0 %6407 }
 0x3fb   :  { %12549 = vst [vmem:[#allocation227_spill] sm:$0xff] %v10578_v46 }
 0x3fc   :  { %6589 = vrot.lane.b32.xlu1 %v2532_v58, %s7214_s30  ;;  %6651 = vrot.lane.b32.xlu0 %v12552_v10, %s7215_s2  ;;  %v6808_v58 = vsel %vm6793_vm2, %v6791_v61, %v9709_v38  ;;  %v12558_v10 = vld [vmem:[#allocation111_spill] sm:$0xff]  ;;  %v3620_v61 = vcombine.high %v10474_v56, %v10477_v19  ;;  %v12567_v19 = vld [vmem:[#allocation65_spill] sm:$0xff] }
 0x3fd   :  { %v12559_v51 = vcombine.low %v12557_v39, %v12558_v10  ;;  %v6825_v34 = vsel %vm6810_vm3, %v6808_v58, %v9865_v23  ;;  %v12564_v58 = vld [vmem:[#allocation154_spill] sm:$0xff] }
 0x3fe   :  { %v10594_v36 = vpop.permute.xlu1 %6349  ;;  %v10596_v46 = vpop.permute.xlu0 %6411  ;;  %v6842_v4 = vsel %vm6827_vm4, %v6825_v34, %v10023_v49 }
 0x3ff   :  { %12556 = vst [vmem:[#allocation261_spill] sm:$0xff] %v10594_v36  ;;  %v12562_v36 = vcombine.low %v12560_v26, %v12561_v31  ;;  %v6859_v23 = vsel %vm6844_vm5, %v6842_v4, %v10108_v60  ;;  %v12566_v60 = vld [vmem:[#allocation63_spill] sm:$0xff] }
 0x400   :  { %6593 = vrot.lane.b32.xlu1 %v3076_v12, %s7214_s30  ;;  %6655 = vrot.lane.b32.xlu0 %v12559_v51, %s7215_s2  ;;  %v6876_v49 = vsel %vm6861_vm6, %v6859_v23, %v10193_v54  ;;  %v12568_v51 = vcombine.low %v12566_v60, %v12567_v19  ;;  %v12575_v60 = vld [vmem:[#allocation255_spill] sm:$0xff]  ;;  %v12576_v19 = vld [vmem:[#allocation236_spill] sm:$0xff] }
 0x401   :  { %v6760_v32 = vsel %vm6759_vm0, %v12562_v36, %v9366_v20  ;;  %v12563_v36 = vld [vmem:[#allocation153_spill] sm:$0xff]  ;;  %v6893_v26 = vsel %vm6878_vm7, %v6876_v49, %v10349_v44 }
 0x402   :  { %v6777_v38 = vsel %vm6776_vm1, %v6760_v32, %v9554_v52  ;;  %v10620_v30 = vpop.permute.xlu1 %6353  ;;  %v10622_v12 = vpop.permute.xlu0 %6415  ;;  %v12565_v56 = vcombine.low %v12563_v36, %v12564_v58 }
 0x403   :  { %v6794_v20 = vsel %vm6793_vm2, %v6777_v38, %v9634_v43  ;;  %v4164_v43 = vcombine.high %v10494_v15, %v10497_v55  ;;  %v6910_v15 = vsel %vm6895_vm8, %v6893_v26, %v10513_v21  ;;  %v12569_v21 = vld [vmem:[#allocation193_spill] sm:$0xff]  ;;  %v12583_v26 = vld [vmem:[#allocation122_spill] sm:$0xff] }
 0x404   :  { %v6811_v52 = vsel %vm6810_vm3, %v6794_v20, %v9721_v57  ;;  %6597 = vrot.lane.b32.xlu1 %v3620_v61, %s7214_s30  ;;  %6659 = vrot.lane.b32.xlu0 %v12565_v56, %s7215_s2  ;;  %v6762_v57 = vsel %vm6759_vm0, %v12568_v51, %v9392_v11  ;;  %v12570_v38 = vld [vmem:[#allocation197_spill] sm:$0xff]  ;;  %v12580_v51 = vld [vmem:[#allocation147_spill] sm:$0xff] }
 0x405   :  { %v6828_v54 = vsel %vm6827_vm4, %v6811_v52, %v9882_v59  ;;  %v6779_v31 = vsel %vm6776_vm1, %v6762_v57, %v9566_v14  ;;  %v12571_v4 = vcombine.low %v12569_v21, %v12570_v38  ;;  %v12581_v57 = vld [vmem:[#allocation149_spill] sm:$0xff] }
 0x406   :  { %v6845_v32 = vsel %vm6844_vm5, %v6828_v54, %v10038_v25  ;;  %v10656_v55 = vpop.permute.xlu1 %6357  ;;  %v6420_v11 = vpop.permute.xlu0 %6419  ;;  %v6796_v59 = vsel %vm6793_vm2, %v6779_v31, %v9643_v24  ;;  %v12572_v24 = vld [vmem:[#allocation105_spill] sm:$0xff] }
 0x407   :  { %v6862_v44 = vsel %vm6861_vm6, %v6845_v32, %v10117_v48  ;;  %v10663_v34 = vsel %vm6912_vm9, %v6910_v15, %v6420_v11  ;;  %v6813_v14 = vsel %vm6810_vm3, %v6796_v59, %v9735_v47  ;;  %v12573_v48 = vld [vmem:[#allocation107_spill] sm:$0xff]  ;;  %v12585_v15 = vld [vmem:[#allocation213_spill] sm:$0xff] }
 0x408   :  { %v6879_v25 = vsel %vm6878_vm7, %v6862_v44, %v10205_v17  ;;  %6601 = vrot.lane.b32.xlu1 %v4164_v43, %s7214_s30  ;;  %6663 = vrot.lane.b32.xlu0 %v12571_v4, %s7215_s2  ;;  %v12574_v61 = vcombine.low %v12572_v24, %v12573_v48  ;;  %v6830_v47 = vsel %vm6827_vm4, %v6813_v14, %v9901_v63  ;;  %v12586_v59 = vld [vmem:[#allocation25_spill] sm:$0xff] }
 0x409   :  { %v6896_v17 = vsel %vm6895_vm8, %v6879_v25, %v10366_v1  ;;  %v6847_v52 = vsel %vm6844_vm5, %v6830_v47, %v10046_v33  ;;  %v5252_v24 = vcombine.high %v10534_v45, %v10537_v5  ;;  %v12587_v48 = vld [vmem:[#allocation97_spill] sm:$0xff]  ;;  %v12592_v45 = vld [vmem:[#allocation272_spill] sm:$0xff] }
 0x40a   :  { %v6764_v20 = vsel %vm6759_vm0, %v12574_v61, %v9421_v62  ;;  %v6913_v49 = vsel %vm6912_vm9, %v6896_v17, %v10531_v37  ;;  %v10689_v56 = vpop.permute.xlu1 %6393  ;;  %v6456_v43 = vpop.permute.xlu0 %6455  ;;  %v4708_v62 = vcombine.high %v10502_v22, %v10505_v53  ;;  %v6864_v1 = vsel %vm6861_vm6, %v6847_v52, %v10127_v40  ;;  %v12577_v22 = vld [vmem:[#allocation239_spill] sm:$0xff] }
 0x40b   :  { %v6781_v23 = vsel %vm6776_vm1, %v6764_v20, %v9576_v28  ;;  %v10698_v28 = vsel %vm6929_vm10, %v6913_v49, %v6456_v43  ;;  %v6881_v37 = vsel %vm6878_vm7, %v6864_v1, %v12575_v60  ;;  %v12578_v53 = vcombine.low %v12576_v19, %v12577_v22  ;;  %v12588_v20 = vld [vmem:[#allocation302_spill] sm:$0xff] }
 0x40c   :  { %v6798_v63 = vsel %vm6793_vm2, %v6781_v23, %v9652_v8  ;;  %6605 = vrot.lane.b32.xlu1 %v4708_v62, %s7214_s30  ;;  %v12579_v8 = vld [vmem:[#allocation44_spill] sm:$0xff]  ;;  %v12582_v40 = vcombine.low %v12580_v51, %v12581_v57  ;;  %v12589_v23 = vld [vmem:[#allocation226_spill] sm:$0xff]  ;;  %v12594_v62 = vld [vmem:[#allocation45_spill] sm:$0xff] }
 0x40d   :  { %v6815_v33 = vsel %vm6810_vm3, %v6798_v63, %v9753_v0  ;;  %6667 = vrot.lane.b32.xlu0 %v12578_v53, %s7215_s2  ;;  %v12584_v0 = vld [vmem:[#allocation98_spill] sm:$0xff] }
 0x40e   :  { %v6766_v54 = vsel %vm6759_vm0, %v12582_v40, %v12579_v8  ;;  %v6832_v31 = vsel %vm6827_vm4, %v6815_v33, %v12583_v26  ;;  %v6898_v32 = vsel %vm6895_vm8, %v6881_v37, %v12584_v0  ;;  %v10724_v25 = vpop.permute.xlu1 %6397  ;;  %v6460_v4 = vpop.permute.xlu0 %6459  ;;  %v12590_v49 = vld [vmem:[#allocation14_spill] sm:$0xff]  ;;  %v12598_v37 = vld [vmem:[#allocation116_spill] sm:$0xff] }
 0x40f   :  { %v6783_v11 = vsel %vm6776_vm1, %v6766_v54, %v12585_v15  ;;  %v6849_v44 = vsel %vm6844_vm5, %v6832_v31, %v12586_v59  ;;  %v6915_v14 = vsel %vm6912_vm9, %v6898_v32, %v10543_v16  ;;  %v12591_v43 = vld [vmem:[#allocation270_spill] sm:$0xff]  ;;  %v12601_v54 = vld [vmem:[#allocation67_spill] sm:$0xff]  ;;  %v5796_v15 = vcombine.high %v10550_v2, %v10553_v27 }
 0x410   :  { %v6800_v61 = vsel %vm6793_vm2, %v6783_v11, %v12587_v48  ;;  %v6866_v47 = vsel %vm6861_vm6, %v6849_v44, %v12588_v20  ;;  %v10733_v17 = vsel %vm6929_vm10, %v6915_v14, %v6460_v4  ;;  %6609 = vrot.lane.b32.xlu1 %v5252_v24, %s7214_s30  ;;  %v12593_v5 = vcombine.low %v12591_v43, %v12592_v45  ;;  %v12595_v63 = vld [vmem:[#allocation190_spill] sm:$0xff]  ;;  %v12602_v11 = vld [vmem:[#allocation145_spill] sm:$0xff]  ;;  %v12606_v20 = vld [vmem:[#allocation299_spill] sm:$0xff] }
 0x411   :  { %v6817_v52 = vsel %vm6810_vm3, %v6800_v61, %v12589_v23  ;;  %v6883_v16 = vsel %vm6878_vm7, %v6866_v47, %v12590_v49  ;;  %v12596_v1 = vld [vmem:[#allocation194_spill] sm:$0xff]  ;;  %v12605_v61 = vld [vmem:[#allocation8_spill] sm:$0xff]  ;;  %v12607_v2 = vld [vmem:[#allocation303_spill] sm:$0xff] }
 0x412   :  { %6671 = vrot.lane.b32.xlu0 %v12593_v5, %s7215_s2  ;;  %v12597_v33 = vcombine.low %v12595_v63, %v12596_v1  ;;  %v6834_v53 = vsel %vm6827_vm4, %v6817_v52, %v12598_v37  ;;  %v12599_v8 = vld [vmem:[#allocation134_spill] sm:$0xff]  ;;  %v10759_v0 = vpop.permute.xlu1 %6401  ;;  %v6464_v32 = vpop.permute.xlu0 %6463  ;;  %v12608_v27 = vcombine.low %v12606_v20, %v12607_v2  ;;  %v12611_v52 = vld [vmem:[#allocation237_spill] sm:$0xff]  ;;  %v12614_v63 = vld [vmem:[#allocation140_spill] sm:$0xff] }
 0x413   :  { %v6900_v51 = vsel %vm6895_vm8, %v6883_v16, %v12599_v8  ;;  %v12600_v57 = vld [vmem:[#allocation18_spill] sm:$0xff]  ;;  %v6851_v26 = vsel %vm6844_vm5, %v6834_v53, %v12601_v54  ;;  %v12613_v5 = vld [vmem:[#allocation165_spill] sm:$0xff] }
 0x414   :  { %v6768_v60 = vsel %vm6759_vm0, %v12597_v33, %v12594_v62  ;;  %v6917_v31 = vsel %vm6912_vm9, %v6900_v51, %v10559_v13  ;;  %v12603_v44 = vld [vmem:[#allocation46_spill] sm:$0xff]  ;;  %6613 = vrot.lane.b32.xlu1 %v5796_v15, %s7214_s30  ;;  %v12615_v33 = vld [vmem:[#allocation12_spill] sm:$0xff]  ;;  %v12616_v37 = vld [vmem:[#allocation109_spill] sm:$0xff] }
 0x415   :  { %v6785_v40 = vsel %vm6776_vm1, %v6768_v60, %v12600_v57  ;;  %v6868_v14 = vsel %vm6861_vm6, %v6851_v26, %v12603_v44  ;;  %v10768_v4 = vsel %vm6929_vm10, %v6917_v31, %v6464_v32  ;;  %v12604_v24 = vld [vmem:[#allocation38_spill] sm:$0xff]  ;;  %v12618_v26 = vld [vmem:[#allocation88_spill] sm:$0xff] }
 0x416   :  { %v6802_v59 = vsel %vm6793_vm2, %v6785_v40, %v12602_v11  ;;  %v6885_v13 = vsel %vm6878_vm7, %v6868_v14, %v12605_v61  ;;  %6675 = vrot.lane.b32.xlu0 %v12608_v27, %s7215_s2  ;;  %v12609_v47 = vld [vmem:[#allocation86_spill] sm:$0xff]  ;;  %v10794_v51 = vpop.permute.xlu1 %6405  ;;  %v6468_v57 = vpop.permute.xlu0 %6467  ;;  %v12617_v40 = vld [vmem:[#allocation139_spill] sm:$0xff]  ;;  %v12619_v15 = vld [vmem:[#allocation32_spill] sm:$0xff] }
 0x417   :  { %v6819_v48 = vsel %vm6810_vm3, %v6802_v59, %v12604_v24  ;;  %v12610_v23 = vld [vmem:[#allocation234_spill] sm:$0xff]  ;;  %v6902_v1 = vsel %vm6895_vm8, %v6885_v13, %v12614_v63  ;;  %v12622_v14 = vld [vmem:[#allocation49_spill] sm:$0xff]  ;;  %v12625_v61 = vld [vmem:[#allocation128_spill] sm:$0xff] }
 0x418   :  { %v12612_v49 = vcombine.low %v12610_v23, %v12611_v52  ;;  %v6836_v62 = vsel %vm6827_vm4, %v6819_v48, %v12613_v5  ;;  %v6919_v8 = vsel %vm6912_vm9, %v6902_v1, %v10569_v41  ;;  %v12620_v59 = vld [vmem:[#allocation286_spill] sm:$0xff]  ;;  %v12621_v41 = vld [vmem:[#allocation48_spill] sm:$0xff]  ;;  %v12624_v48 = vcombine.high %v12546_v35, %v12547_v29  ;;  %v12627_v27 = vld [vmem:[#allocation271_spill] sm:$0xff] }
 0x419   :  { %v6853_v53 = vsel %vm6844_vm5, %v6836_v62, %v12616_v37  ;;  %v10801_v32 = vsel %vm6929_vm10, %v6919_v8, %v6468_v57  ;;  %v12623_v24 = vcombine.low %v12621_v41, %v12622_v14  ;;  %v12626_v13 = vld [vmem:[#allocation268_spill] sm:$0xff]  ;;  %v12629_v52 = vld [vmem:[#allocation159_spill] sm:$0xff]  ;;  %v12634_v8 = vld [vmem:[#allocation130_spill] sm:$0xff] }
 0x41a   :  { %v6770_v16 = vsel %vm6759_vm0, %v12612_v49, %v12609_v47  ;;  %v6870_v31 = vsel %vm6861_vm6, %v6853_v53, %v12618_v26  ;;  %6711 = vrot.lane.b32.xlu0 %v12624_v48, %s7216_s3  ;;  %v12628_v47 = vcombine.low %v12626_v13, %v12627_v27  ;;  %v12631_v62 = vld [vmem:[#allocation60_spill] sm:$0xff]  ;;  %v10830_v29 = vpop.permute.xlu1 %6409  ;;  %v12643_v27 = vld [vmem:[#allocation61_spill] sm:$0xff] }
 0x41b   :  { %v6787_v60 = vsel %vm6776_vm1, %v6770_v16, %v12615_v33  ;;  %v6887_v44 = vsel %vm6878_vm7, %v6870_v31, %v12620_v59  ;;  %6649 = vrot.lane.b32.xlu1 %v12623_v24, %s7215_s2  ;;  %v12630_v16 = vld [vmem:[#allocation177_spill] sm:$0xff]  ;;  %v12632_v1 = vld [vmem:[#allocation152_spill] sm:$0xff]  ;;  %v12636_v31 = vld [vmem:[#allocation50_spill] sm:$0xff] }
 0x41c   :  { %v6804_v54 = vsel %vm6793_vm2, %v6787_v60, %v12617_v40  ;;  %v6772_v23 = vsel %vm6759_vm0, %v12628_v47, %v12625_v61  ;;  %v6904_v5 = vsel %vm6895_vm8, %v6887_v44, %v12630_v16  ;;  %v6472_v60 = vpop.permute.xlu0 %6471  ;;  %v12633_v37 = vld [vmem:[#allocation188_spill] sm:$0xff]  ;;  %v12640_v44 = vcombine.high %v12550_v18, %v12551_v7  ;;  %v12641_v24 = vld [vmem:[#allocation209_spill] sm:$0xff]  ;;  %v12642_v61 = vld [vmem:[#allocation183_spill] sm:$0xff] }
 0x41d   :  { %v6821_v11 = vsel %vm6810_vm3, %v6804_v54, %v12619_v15  ;;  %v6789_v63 = vsel %vm6776_vm1, %v6772_v23, %v12631_v62  ;;  %v6921_v35 = vsel %vm6912_vm9, %v6904_v5, %v10580_v3  ;;  %v12635_v54 = vld [vmem:[#allocation80_spill] sm:$0xff]  ;;  %v12637_v3 = vld [vmem:[#allocation90_spill] sm:$0xff]  ;;  %v12644_v47 = vld [vmem:[#allocation191_spill] sm:$0xff] }
 0x41e   :  { %v6838_v49 = vsel %vm6827_vm4, %v6821_v11, %v12629_v52  ;;  %v6806_v53 = vsel %vm6793_vm2, %v6789_v63, %v12633_v37  ;;  %v10837_v40 = vsel %vm6929_vm10, %v6921_v35, %v6472_v60  ;;  %v12638_v11 = vld [vmem:[#allocation91_spill] sm:$0xff]  ;;  %6715 = vrot.lane.b32.xlu0 %v12640_v44, %s7216_s3  ;;  %v12647_v16 = vld [vmem:[#allocation198_spill] sm:$0xff]  ;;  %v10864_v18 = vpop.permute.xlu1 %6413  ;;  %v12650_v37 = vld [vmem:[#allocation81_spill] sm:$0xff] }
 0x41f   :  { %v6855_v33 = vsel %vm6844_vm5, %v6838_v49, %v12632_v1  ;;  %v6823_v26 = vsel %vm6810_vm3, %v6806_v53, %v12635_v54  ;;  %v12639_v59 = vcombine.low %v12637_v3, %v12638_v11  ;;  %v12645_v23 = vld [vmem:[#allocation195_spill] sm:$0xff]  ;;  %v12653_v54 = vld [vmem:[#allocation133_spill] sm:$0xff] }
 0x420   :  { %v6872_v57 = vsel %vm6861_vm6, %v6855_v33, %v12634_v8  ;;  %v6840_v48 = vsel %vm6827_vm4, %v6823_v26, %v12641_v24  ;;  %v12646_v52 = vcombine.low %v12644_v47, %v12645_v23  ;;  %v6476_v7 = vpop.permute.xlu0 %6475  ;;  %v12648_v63 = vld [vmem:[#allocation187_spill] sm:$0xff]  ;;  %v12649_v33 = vld [vmem:[#allocation173_spill] sm:$0xff]  ;;  %v12651_v8 = vld [vmem:[#allocation56_spill] sm:$0xff] }
 0x421   :  { %v6889_v15 = vsel %vm6878_vm7, %v6872_v57, %v12636_v31  ;;  %6653 = vrot.lane.b32.xlu1 %v12639_v59, %s7215_s2  ;;  %v6857_v5 = vsel %vm6844_vm5, %v6840_v48, %v12647_v16  ;;  %v12655_v31 = vcombine.high %v12557_v39, %v12558_v10  ;;  %v12657_v59 = vld [vmem:[#allocation41_spill] sm:$0xff]  ;;  %v12658_v44 = vld [vmem:[#allocation43_spill] sm:$0xff]  ;;  %v12662_v23 = vld [vmem:[#allocation54_spill] sm:$0xff] }
 0x422   :  { %v6906_v13 = vsel %vm6895_vm8, %v6889_v15, %v12642_v61  ;;  %v6775_v49 = vsel %vm6759_vm0, %v12646_v52, %v12643_v27  ;;  %v6874_v35 = vsel %vm6861_vm6, %v6857_v5, %v12649_v33  ;;  %v12656_v15 = vld [vmem:[#allocation87_spill] sm:$0xff]  ;;  %v12659_v24 = vcombine.low %v12657_v59, %v12658_v44  ;;  %v12660_v61 = vld [vmem:[#allocation204_spill] sm:$0xff]  ;;  %v12661_v27 = vld [vmem:[#allocation221_spill] sm:$0xff]  ;;  %v10900_v10 = vpop.permute.xlu1 %6417 }
 0x423   :  { %v6923_v62 = vsel %vm6912_vm9, %v6906_v13, %v10596_v46  ;;  %v6792_v1 = vsel %vm6776_vm1, %v6775_v49, %v12648_v63  ;;  %v6891_v57 = vsel %vm6878_vm7, %v6874_v35, %v12651_v8  ;;  %v12652_v46 = vld [vmem:[#allocation132_spill] sm:$0xff]  ;;  %6719 = vrot.lane.b32.xlu0 %v12655_v31, %s7216_s3  ;;  %v12666_v35 = vld [vmem:[#allocation74_spill] sm:$0xff]  ;;  %v12671_v31 = vcombine.high %v12563_v36, %v12564_v58  ;;  %v12673_v59 = vld [vmem:[#allocation83_spill] sm:$0xff] }
 0x424   :  { %v10871_v60 = vsel %vm6929_vm10, %v6923_v62, %v6476_v7  ;;  %v6809_v53 = vsel %vm6793_vm2, %v6792_v1, %v12650_v37  ;;  %v12654_v26 = vcombine.low %v12652_v46, %v12653_v54  ;;  %v6761_v48 = vsel %vm6759_vm0, %v12659_v24, %v12656_v15  ;;  %v12663_v49 = vld [vmem:[#allocation196_spill] sm:$0xff]  ;;  %v6480_v5 = vpop.permute.xlu0 %6479  ;;  %v12664_v62 = vld [vmem:[#allocation182_spill] sm:$0xff]  ;;  %v12672_v15 = vld [vmem:[#allocation129_spill] sm:$0xff] }
 0x425   :  { %v6826_v13 = vsel %vm6810_vm3, %v6809_v53, %v12660_v61  ;;  %v6908_v47 = vsel %vm6895_vm8, %v6891_v57, %v12661_v27  ;;  %v6778_v52 = vsel %vm6776_vm1, %v6761_v48, %v12662_v23  ;;  %v12665_v63 = vld [vmem:[#allocation220_spill] sm:$0xff]  ;;  %v12667_v53 = vld [vmem:[#allocation94_spill] sm:$0xff]  ;;  %v12674_v44 = vld [vmem:[#allocation85_spill] sm:$0xff] }
 0x426   :  { %6657 = vrot.lane.b32.xlu1 %v12654_v26, %s7215_s2  ;;  %v6843_v16 = vsel %vm6827_vm4, %v6826_v13, %v12663_v49  ;;  %v6925_v39 = vsel %vm6912_vm9, %v6908_v47, %v10622_v12  ;;  %v6795_v7 = vsel %vm6793_vm2, %v6778_v52, %v12664_v62  ;;  %v12668_v12 = vld [vmem:[#allocation175_spill] sm:$0xff]  ;;  %v12669_v57 = vld [vmem:[#allocation176_spill] sm:$0xff]  ;;  %v12675_v24 = vcombine.low %v12673_v59, %v12674_v44  ;;  %v12677_v27 = vld [vmem:[#allocation229_spill] sm:$0xff]  ;;  %v6422_v58 = vpop.permute.xlu1 %6421 }
 0x427   :  { %v6860_v1 = vsel %vm6844_vm5, %v6843_v16, %v12665_v63  ;;  %v10907_v33 = vsel %vm6929_vm10, %v6925_v39, %v6480_v5  ;;  %v6812_v37 = vsel %vm6810_vm3, %v6795_v7, %v12666_v35  ;;  %v12670_v26 = vcombine.low %v12668_v12, %v12669_v57  ;;  %6723 = vrot.lane.b32.xlu0 %v12671_v31, %s7216_s3  ;;  %v12676_v61 = vld [vmem:[#allocation203_spill] sm:$0xff]  ;;  %v12679_v49 = vld [vmem:[#allocation240_spill] sm:$0xff]  ;;  %v12680_v5 = vld [vmem:[#allocation181_spill] sm:$0xff] }
 0x428   :  { %v6877_v8 = vsel %vm6861_vm6, %v6860_v1, %v12667_v53  ;;  %v6763_v48 = vsel %vm6759_vm0, %v12675_v24, %v12672_v15  ;;  %v6829_v13 = vsel %vm6827_vm4, %v6812_v37, %v12676_v61  ;;  %v12678_v23 = vld [vmem:[#allocation55_spill] sm:$0xff]  ;;  %v6484_v39 = vpop.permute.xlu0 %6483  ;;  %v12681_v7 = vld [vmem:[#allocation218_spill] sm:$0xff]  ;;  %v12687_v59 = vcombine.high %v12569_v21, %v12570_v38 }
 0x429   :  { %v6894_v47 = vsel %vm6878_vm7, %v6877_v8, %v12677_v27  ;;  %v6780_v52 = vsel %vm6776_vm1, %v6763_v48, %v12678_v23  ;;  %v6846_v16 = vsel %vm6844_vm5, %v6829_v13, %v12679_v49  ;;  %v10945_v35 = vsel %vm6929_vm10, %v10663_v34, %v6484_v39  ;;  %v12682_v37 = vld [vmem:[#allocation75_spill] sm:$0xff]  ;;  %v12683_v8 = vld [vmem:[#allocation92_spill] sm:$0xff]  ;;  %v12689_v34 = vld [vmem:[#allocation125_spill] sm:$0xff] }
 0x42a   :  { %6661 = vrot.lane.b32.xlu1 %v12670_v26, %s7215_s2  ;;  %v6911_v36 = vsel %vm6895_vm8, %v6894_v47, %v10656_v55  ;;  %v6797_v62 = vsel %vm6793_vm2, %v6780_v52, %v12680_v5  ;;  %v6863_v63 = vsel %vm6861_vm6, %v6846_v16, %v12681_v7  ;;  %v12684_v26 = vld [vmem:[#allocation215_spill] sm:$0xff]  ;;  %v12692_v13 = vld [vmem:[#allocation246_spill] sm:$0xff]  ;;  %v6458_v16 = vpop.permute.xlu1 %6457  ;;  %v12696_v5 = vld [vmem:[#allocation256_spill] sm:$0xff] }
 0x42b   :  { %v10941_v1 = vsel %vm6912_vm9, %v6911_v36, %v6422_v58  ;;  %v6814_v53 = vsel %vm6810_vm3, %v6797_v62, %v12682_v37  ;;  %v6880_v55 = vsel %vm6878_vm7, %v6863_v63, %v12683_v8  ;;  %v12685_v31 = vld [vmem:[#allocation219_spill] sm:$0xff]  ;;  %6727 = vrot.lane.b32.xlu0 %v12687_v59, %s7216_s3  ;;  %v12694_v49 = vld [vmem:[#allocation238_spill] sm:$0xff]  ;;  %v12695_v58 = vld [vmem:[#allocation232_spill] sm:$0xff]  ;;  %v12702_v59 = vcombine.high %v12576_v19, %v12577_v22 }
 0x42c   :  { %v12686_v15 = vcombine.low %v12684_v26, %v12685_v31  ;;  %v12688_v44 = vld [vmem:[#allocation171_spill] sm:$0xff]  ;;  %v6831_v27 = vsel %vm6827_vm4, %v6814_v53, %v12692_v13  ;;  %v6897_v47 = vsel %vm6895_vm8, %v6880_v55, %v10529_v42  ;;  %v6520_v36 = vpop.permute.xlu0 %6519  ;;  %v12698_v53 = vld [vmem:[#allocation100_spill] sm:$0xff]  ;;  %v12699_v8 = vld [vmem:[#allocation257_spill] sm:$0xff] }
 0x42d   :  { %v12690_v24 = vld [vmem:[#allocation127_spill] sm:$0xff]  ;;  %v6848_v21 = vsel %vm6844_vm5, %v6831_v27, %v12694_v49  ;;  %v6914_v38 = vsel %vm6912_vm9, %v6897_v47, %v10689_v56  ;;  %v10983_v42 = vsel %vm6946_vm11, %v10698_v28, %v6520_v36  ;;  %v12700_v55 = vld [vmem:[#allocation258_spill] sm:$0xff]  ;;  %v12711_v36 = vld [vmem:[#allocation16_spill] sm:$0xff] }
 0x42e   :  { %6665 = vrot.lane.b32.xlu1 %v12686_v15, %s7215_s2  ;;  %v12691_v48 = vcombine.low %v12689_v34, %v12690_v24  ;;  %v12693_v23 = vld [vmem:[#allocation103_spill] sm:$0xff]  ;;  %v6865_v62 = vsel %vm6861_vm6, %v6848_v21, %v12696_v5  ;;  %v10979_v7 = vsel %vm6929_vm10, %v6914_v38, %v6458_v16  ;;  %v12701_v15 = vcombine.low %v12699_v8, %v12700_v55  ;;  %v12704_v34 = vld [vmem:[#allocation168_spill] sm:$0xff]  ;;  %v12705_v28 = vld [vmem:[#allocation170_spill] sm:$0xff]  ;;  %v6462_v22 = vpop.permute.xlu1 %6461 }
 0x42f   :  { %v12697_v63 = vld [vmem:[#allocation123_spill] sm:$0xff]  ;;  %v6882_v56 = vsel %vm6878_vm7, %v6865_v62, %v12698_v53  ;;  %6731 = vrot.lane.b32.xlu0 %v12702_v59, %s7216_s3  ;;  %v12706_v24 = vcombine.low %v12704_v34, %v12705_v28  ;;  %v12708_v47 = vld [vmem:[#allocation102_spill] sm:$0xff]  ;;  %v12712_v5 = vld [vmem:[#allocation117_spill] sm:$0xff] }
 0x430   :  { %v6765_v61 = vsel %vm6759_vm0, %v12691_v48, %v12688_v44  ;;  %v12703_v44 = vld [vmem:[#allocation172_spill] sm:$0xff]  ;;  %v6899_v27 = vsel %vm6895_vm8, %v6882_v56, %v10541_v9  ;;  %v6524_v21 = vpop.permute.xlu0 %6523  ;;  %v12710_v38 = vld [vmem:[#allocation231_spill] sm:$0xff]  ;;  %v12718_v59 = vld [vmem:[#allocation217_spill] sm:$0xff] }
 0x431   :  { %v6782_v52 = vsel %vm6776_vm1, %v6765_v61, %v12693_v23  ;;  %v6767_v48 = vsel %vm6759_vm0, %v12706_v24, %v12703_v44  ;;  %v12707_v61 = vld [vmem:[#allocation245_spill] sm:$0xff]  ;;  %v6916_v19 = vsel %vm6912_vm9, %v6899_v27, %v10724_v25  ;;  %v11021_v9 = vsel %vm6946_vm11, %v10733_v17, %v6524_v21  ;;  %v12715_v53 = vld [vmem:[#allocation287_spill] sm:$0xff]  ;;  %v12719_v44 = vld [vmem:[#allocation212_spill] sm:$0xff] }
 0x432   :  { %v6799_v39 = vsel %vm6793_vm2, %v6782_v52, %v12695_v58  ;;  %6669 = vrot.lane.b32.xlu1 %v12701_v15, %s7215_s2  ;;  %v6784_v23 = vsel %vm6776_vm1, %v6767_v48, %v12708_v47  ;;  %v12709_v52 = vld [vmem:[#allocation304_spill] sm:$0xff]  ;;  %v12717_v15 = vcombine.high %v12591_v43, %v12592_v45  ;;  %v12724_v47 = vld [vmem:[#allocation47_spill] sm:$0xff]  ;;  %v6466_v45 = vpop.permute.xlu1 %6465 }
 0x433   :  { %v6816_v37 = vsel %vm6810_vm3, %v6799_v39, %v12697_v63  ;;  %v6801_v16 = vsel %vm6793_vm2, %v6784_v23, %v12710_v38  ;;  %v11017_v39 = vsel %vm6929_vm10, %v6916_v19, %v6462_v22  ;;  %v12713_v63 = vld [vmem:[#allocation136_spill] sm:$0xff]  ;;  %v12726_v22 = vld [vmem:[#allocation10_spill] sm:$0xff] }
 0x434   :  { %v6833_v13 = vsel %vm6827_vm4, %v6816_v37, %v12707_v61  ;;  %v6818_v62 = vsel %vm6810_vm3, %v6801_v16, %v12712_v5  ;;  %v12714_v37 = vld [vmem:[#allocation284_spill] sm:$0xff]  ;;  %6735 = vrot.lane.b32.xlu0 %v12717_v15, %s7216_s3  ;;  %v12727_v16 = vld [vmem:[#allocation166_spill] sm:$0xff]  ;;  %v12729_v5 = vld [vmem:[#allocation309_spill] sm:$0xff] }
 0x435   :  { %v6850_v49 = vsel %vm6844_vm5, %v6833_v13, %v12709_v52  ;;  %v12716_v56 = vcombine.low %v12714_v37, %v12715_v53  ;;  %v12720_v17 = vld [vmem:[#allocation216_spill] sm:$0xff]  ;;  %v6528_v52 = vpop.permute.xlu0 %6527 }
 0x436   :  { %v6867_v58 = vsel %vm6861_vm6, %v6850_v49, %v12711_v36  ;;  %v12721_v34 = vcombine.low %v12719_v44, %v12720_v17  ;;  %v12722_v24 = vld [vmem:[#allocation24_spill] sm:$0xff]  ;;  %v12725_v49 = vld [vmem:[#allocation225_spill] sm:$0xff]  ;;  %v12737_v17 = vld [vmem:[#allocation66_spill] sm:$0xff] }
 0x437   :  { %v6884_v25 = vsel %vm6878_vm7, %v6867_v58, %v12713_v63  ;;  %6673 = vrot.lane.b32.xlu1 %v12716_v56, %s7215_s2  ;;  %v6835_v48 = vsel %vm6827_vm4, %v6818_v62, %v12722_v24  ;;  %v12723_v13 = vld [vmem:[#allocation96_spill] sm:$0xff]  ;;  %v12728_v58 = vld [vmem:[#allocation142_spill] sm:$0xff]  ;;  %v12733_v56 = vld [vmem:[#allocation19_spill] sm:$0xff] }
 0x438   :  { %v6769_v28 = vsel %vm6759_vm0, %v12721_v34, %v12718_v59  ;;  %v6901_v61 = vsel %vm6895_vm8, %v6884_v25, %v10557_v6  ;;  %v6852_v23 = vsel %vm6844_vm5, %v6835_v48, %v12724_v47  ;;  %v11059_v6 = vsel %vm6946_vm11, %v10768_v4, %v6528_v52  ;;  %v12730_v62 = vld [vmem:[#allocation310_spill] sm:$0xff]  ;;  %v12734_v15 = vld [vmem:[#allocation252_spill] sm:$0xff]  ;;  %v12740_v47 = vld [vmem:[#allocation39_spill] sm:$0xff] }
 0x439   :  { %v6786_v27 = vsel %vm6776_vm1, %v6769_v28, %v12723_v13  ;;  %v6918_v43 = vsel %vm6912_vm9, %v6901_v61, %v10759_v0  ;;  %v6869_v21 = vsel %vm6861_vm6, %v6852_v23, %v12726_v22  ;;  %v12731_v63 = vcombine.low %v12729_v5, %v12730_v62  ;;  %v12735_v4 = vld [vmem:[#allocation254_spill] sm:$0xff]  ;;  %v12738_v24 = vld [vmem:[#allocation144_spill] sm:$0xff]  ;;  %v12739_v61 = vld [vmem:[#allocation89_spill] sm:$0xff] }
 0x43a   :  { %v6803_v19 = vsel %vm6793_vm2, %v6786_v27, %v12725_v49  ;;  %v11055_v38 = vsel %vm6929_vm10, %v6918_v43, %v6466_v45  ;;  %v6886_v0 = vsel %vm6878_vm7, %v6869_v21, %v12728_v58  ;;  %v12732_v25 = vcombine.high %v12606_v20, %v12607_v2  ;;  %v6470_v2 = vpop.permute.xlu1 %6469  ;;  %v6532_v27 = vpop.permute.xlu0 %6531  ;;  %v12741_v43 = vld [vmem:[#allocation288_spill] sm:$0xff]  ;;  %v12743_v22 = vld [vmem:[#allocation179_spill] sm:$0xff]  ;;  %v12747_v58 = vld [vmem:[#allocation285_spill] sm:$0xff] }
 0x43b   :  { %v6820_v36 = vsel %vm6810_vm3, %v6803_v19, %v12727_v16  ;;  %6677 = vrot.lane.b32.xlu1 %v12731_v63, %s7215_s2  ;;  %v12736_v59 = vcombine.low %v12734_v15, %v12735_v4  ;;  %v6903_v28 = vsel %vm6895_vm8, %v6886_v0, %v10567_v50  ;;  %v11095_v50 = vsel %vm6946_vm11, %v10801_v32, %v6532_v27  ;;  %v12742_v49 = vld [vmem:[#allocation160_spill] sm:$0xff]  ;;  %v12745_v16 = vld [vmem:[#allocation13_spill] sm:$0xff]  ;;  %v12751_v4 = vld [vmem:[#allocation138_spill] sm:$0xff] }
 0x43c   :  { %6739 = vrot.lane.b32.xlu0 %v12732_v25, %s7216_s3  ;;  %v6837_v34 = vsel %vm6827_vm4, %v6820_v36, %v12737_v17  ;;  %v6920_v20 = vsel %vm6912_vm9, %v6903_v28, %v10794_v51  ;;  %v12744_v21 = vcombine.high %v12621_v41, %v12622_v14  ;;  %v12746_v36 = vld [vmem:[#allocation282_spill] sm:$0xff]  ;;  %v12749_v25 = vld [vmem:[#allocation108_spill] sm:$0xff]  ;;  %v12753_v28 = vld [vmem:[#allocation33_spill] sm:$0xff] }
 0x43d   :  { %v6771_v44 = vsel %vm6759_vm0, %v12736_v59, %v12733_v56  ;;  %v6854_v13 = vsel %vm6844_vm5, %v6837_v34, %v12739_v61  ;;  %v6937_v52 = vsel %vm6929_vm10, %v6920_v20, %v6470_v2  ;;  %v12748_v0 = vcombine.low %v12746_v36, %v12747_v58  ;;  %v12750_v56 = vld [vmem:[#allocation227_spill] sm:$0xff]  ;;  %v12755_v2 = vld [vmem:[#allocation210_spill] sm:$0xff] }
 0x43e   :  { %v6788_v48 = vsel %vm6776_vm1, %v6771_v44, %v12738_v24  ;;  %v6871_v45 = vsel %vm6861_vm6, %v6854_v13, %v12741_v43  ;;  %v12752_v44 = vld [vmem:[#allocation131_spill] sm:$0xff]  ;;  %v6474_v14 = vpop.permute.xlu1 %6473  ;;  %v6536_v34 = vpop.permute.xlu0 %6535  ;;  %v12761_v36 = vld [vmem:[#allocation58_spill] sm:$0xff] }
 0x43f   :  { %v6805_v23 = vsel %vm6793_vm2, %v6788_v48, %v12740_v47  ;;  %v6888_v51 = vsel %vm6878_vm7, %v6871_v45, %v12743_v22  ;;  %6713 = vrot.lane.b32.xlu1 %v12744_v21, %s7216_s3  ;;  %v6773_v63 = vsel %vm6759_vm0, %v12748_v0, %v12745_v16  ;;  %v12754_v48 = vld [vmem:[#allocation52_spill] sm:$0xff]  ;;  %v11127_v20 = vsel %vm6946_vm11, %v10837_v40, %v6536_v34  ;;  %v12756_v47 = vld [vmem:[#allocation185_spill] sm:$0xff]  ;;  %v12758_v43 = vld [vmem:[#allocation151_spill] sm:$0xff] }
 0x440   :  { %v6822_v19 = vsel %vm6810_vm3, %v6805_v23, %v12742_v49  ;;  %v6905_v15 = vsel %vm6895_vm8, %v6888_v51, %v12750_v56  ;;  %v6790_v59 = vsel %vm6776_vm1, %v6773_v63, %v12751_v4  ;;  %v12757_v23 = vcombine.high %v12637_v3, %v12638_v11  ;;  %v12759_v49 = vld [vmem:[#allocation261_spill] sm:$0xff]  ;;  %v12760_v22 = vld [vmem:[#allocation174_spill] sm:$0xff]  ;;  %v12762_v0 = vld [vmem:[#allocation223_spill] sm:$0xff] }
 0x441   :  { %v6839_v32 = vsel %vm6827_vm4, %v6822_v19, %v12749_v25  ;;  %v6922_v41 = vsel %vm6912_vm9, %v6905_v15, %v10830_v29  ;;  %v6807_v24 = vsel %vm6793_vm2, %v6790_v59, %v12753_v28  ;;  %v12763_v25 = vcombine.high %v12652_v46, %v12653_v54 }
 0x442   :  { %v6856_v17 = vsel %vm6844_vm5, %v6839_v32, %v12752_v44  ;;  %v6939_v13 = vsel %vm6929_vm10, %v6922_v41, %v6474_v14  ;;  %v6824_v27 = vsel %vm6810_vm3, %v6807_v24, %v12755_v2  ;;  %v6478_v21 = vpop.permute.xlu1 %6477  ;;  %v6540_v16 = vpop.permute.xlu0 %6539  ;;  %v12764_v59 = vcombine.high %v12668_v12, %v12669_v57 }
 0x443   :  { %v6873_v61 = vsel %vm6861_vm6, %v6856_v17, %v12754_v48  ;;  %6717 = vrot.lane.b32.xlu1 %v12757_v23, %s7216_s3  ;;  %v6841_v45 = vsel %vm6827_vm4, %v6824_v27, %v12758_v43  ;;  %v11150_v11 = vsel %vm6946_vm11, %v10871_v60, %v6540_v16  ;;  %v12765_v44 = vcombine.high %v12684_v26, %v12685_v31 }
 0x444   :  { %v6890_v29 = vsel %vm6878_vm7, %v6873_v61, %v12756_v47  ;;  %v6858_v40 = vsel %vm6844_vm5, %v6841_v45, %v12760_v22  ;;  %v12766_v57 = vcombine.high %v12699_v8, %v12700_v55  ;;  %v12767_v26 = vcombine.high %v12714_v37, %v12715_v53 }
 0x445   :  { %v6907_v19 = vsel %vm6895_vm8, %v6890_v29, %v12759_v49  ;;  %v6875_v58 = vsel %vm6861_vm6, %v6858_v40, %v12761_v36  ;;  %v12768_v8 = vcombine.high %v12729_v5, %v12730_v62  ;;  %vm7095_vm0 = vcmask 523520  }
 0x446   :  { %v6924_v51 = vsel %vm6912_vm9, %v6907_v19, %v10864_v18  ;;  %v6892_v63 = vsel %vm6878_vm7, %v6875_v58, %v12762_v0  ;;  %v6482_v56 = vpop.permute.xlu1 %6481  ;;  %v6544_v15 = vpop.permute.xlu0 %6543 }
 0x447   :  { %v6941_v3 = vsel %vm6929_vm10, %v6924_v51, %v6478_v21  ;;  %6721 = vrot.lane.b32.xlu1 %v12763_v25, %s7216_s3  ;;  %v6909_v18 = vsel %vm6895_vm8, %v6892_v63, %v10620_v30  ;;  %v11165_v60 = vsel %vm6946_vm11, %v10907_v33, %v6544_v15 }
 0x448   :  { %v6926_v32 = vsel %vm6912_vm9, %v6909_v18, %v10900_v10 }
 0x449   :  { %v6943_v4 = vsel %vm6929_vm10, %v6926_v32, %v6482_v56 }
 0x44a   :  { %v6486_v46 = vpop.permute.xlu1 %6485  ;;  %v6548_v54 = vpop.permute.xlu0 %6547 }
 0x44b   :  { %6725 = vrot.lane.b32.xlu1 %v12764_v59, %s7216_s3  ;;  %v6945_v30 = vsel %vm6929_vm10, %v10941_v1, %v6486_v46  ;;  %v11175_v10 = vsel %vm6946_vm11, %v10945_v35, %v6548_v54 }
 0x44e   :  { %v6522_v33 = vpop.permute.xlu1 %6521  ;;  %v6584_v17 = vpop.permute.xlu0 %6583 }
 0x44f   :  { %6729 = vrot.lane.b32.xlu1 %v12765_v44, %s7216_s3  ;;  %v11183_v12 = vsel %vm6946_vm11, %v10979_v7, %v6522_v33  ;;  %v6964_v0 = vsel %vm6963_vm12, %v10983_v42, %v6584_v17 }
 0x452   :  { %v6526_v1 = vpop.permute.xlu1 %6525  ;;  %v6588_v41 = vpop.permute.xlu0 %6587 }
 0x453   :  { %6733 = vrot.lane.b32.xlu1 %v12766_v57, %s7216_s3  ;;  %v11191_v35 = vsel %vm6946_vm11, %v11017_v39, %v6526_v1  ;;  %v6966_v56 = vsel %vm6963_vm12, %v11021_v9, %v6588_v41 }
 0x456   :  { %v6530_v31 = vpop.permute.xlu1 %6529  ;;  %v6592_v14 = vpop.permute.xlu0 %6591 }
 0x457   :  { %6737 = vrot.lane.b32.xlu1 %v12767_v26, %s7216_s3  ;;  %v11199_v7 = vsel %vm6946_vm11, %v11055_v38, %v6530_v31  ;;  %v6968_v46 = vsel %vm6963_vm12, %v11059_v6, %v6592_v14 }
 0x45a   :  { %v6534_v55 = vpop.permute.xlu1 %6533  ;;  %v6596_v34 = vpop.permute.xlu0 %6595 }
 0x45b   :  { %6741 = vrot.lane.b32.xlu1 %v12768_v8, %s7216_s3  ;;  %v11206_v39 = vsel %vm6946_vm11, %v6937_v52, %v6534_v55  ;;  %v6970_v9 = vsel %vm6963_vm12, %v11095_v50, %v6596_v34 }
 0x45e   :  { %v6538_v28 = vpop.permute.xlu1 %6537  ;;  %v6600_v24 = vpop.permute.xlu0 %6599 }
 0x45f   :  { %v11209_v37 = vsel %vm6946_vm11, %v6939_v13, %v6538_v28  ;;  %v6972_v6 = vsel %vm6963_vm12, %v11127_v20, %v6600_v24 }
 0x462   :  { %v6542_v53 = vpop.permute.xlu1 %6541  ;;  %v11211_v48 = vpop.permute.xlu0 %6603 }
 0x463   :  { %v11214_v38 = vsel %vm6946_vm11, %v6941_v3, %v6542_v53  ;;  %v6974_v50 = vsel %vm6963_vm12, %v11150_v11, %v11211_v48 }
 0x466   :  { %v6546_v61 = vpop.permute.xlu1 %6545  ;;  %v11216_v2 = vpop.permute.xlu0 %6607 }
 0x467   :  { %v11219_v5 = vsel %vm6946_vm11, %v6943_v4, %v6546_v61  ;;  %v6976_v24 = vsel %vm6963_vm12, %v11165_v60, %v11216_v2 }
 0x46a   :  { %v6550_v62 = vpop.permute.xlu1 %6549  ;;  %v11221_v52 = vpop.permute.xlu0 %6611 }
 0x46b   :  { %v11224_v27 = vsel %vm6946_vm11, %v6945_v30, %v6550_v62  ;;  %v6978_v48 = vsel %vm6963_vm12, %v11175_v10, %v11221_v52 }
 0x46e   :  { %v11226_v13 = vpop.permute.xlu1 %6585  ;;  %v6648_v47 = vpop.permute.xlu0 %6647 }
 0x46f   :  { %v6981_v63 = vsel %vm6980_vm13, %v6964_v0, %v6648_v47  ;;  %v6965_v2 = vsel %vm6963_vm12, %v11183_v12, %v11226_v13 }
 0x472   :  { %v11228_v29 = vpop.permute.xlu1 %6589  ;;  %v6652_v23 = vpop.permute.xlu0 %6651 }
 0x473   :  { %v6983_v15 = vsel %vm6980_vm13, %v6966_v56, %v6652_v23  ;;  %v6967_v10 = vsel %vm6963_vm12, %v11191_v35, %v11228_v29 }
 0x476   :  { %v11230_v43 = vpop.permute.xlu1 %6593  ;;  %v6656_v45 = vpop.permute.xlu0 %6655 }
 0x477   :  { %v6985_v54 = vsel %vm6980_vm13, %v6968_v46, %v6656_v45  ;;  %v6969_v12 = vsel %vm6963_vm12, %v11199_v7, %v11230_v43 }
 0x47a   :  { %v11232_v49 = vpop.permute.xlu1 %6597  ;;  %v6660_v19 = vpop.permute.xlu0 %6659 }
 0x47b   :  { %v6987_v17 = vsel %vm6980_vm13, %v6970_v9, %v6660_v19  ;;  %v6971_v35 = vsel %vm6963_vm12, %v11206_v39, %v11232_v49 }
 0x47e   :  { %v11234_v22 = vpop.permute.xlu1 %6601  ;;  %v6664_v40 = vpop.permute.xlu0 %6663 }
 0x47f   :  { %v6989_v26 = vsel %vm6980_vm13, %v6972_v6, %v6664_v40  ;;  %v6973_v7 = vsel %vm6963_vm12, %v11209_v37, %v11234_v22 }
 0x482   :  { %v11236_v51 = vpop.permute.xlu1 %6605  ;;  %v6668_v21 = vpop.permute.xlu0 %6667 }
 0x483   :  { %v6991_v55 = vsel %vm6980_vm13, %v6974_v50, %v6668_v21  ;;  %v6975_v39 = vsel %vm6963_vm12, %v11214_v38, %v11236_v51 }
 0x486   :  { %v11238_v16 = vpop.permute.xlu1 %6609  ;;  %v6672_v36 = vpop.permute.xlu0 %6671 }
 0x487   :  { %v6993_v53 = vsel %vm6980_vm13, %v6976_v24, %v6672_v36  ;;  %v6977_v37 = vsel %vm6963_vm12, %v11219_v5, %v11238_v16 }
 0x48a   :  { %v11240_v58 = vpop.permute.xlu1 %6613  ;;  %v6676_v3 = vpop.permute.xlu0 %6675 }
 0x48b   :  { %v6995_v47 = vsel %vm6980_vm13, %v6978_v48, %v6676_v3  ;;  %v6979_v38 = vsel %vm6963_vm12, %v11224_v27, %v11240_v58 }
 0x48e   :  { %v6650_v25 = vpop.permute.xlu1 %6649  ;;  %v6712_v18 = vpop.permute.xlu0 %6711 }
 0x48f   :  { %v6998_v32 = vsel %vm6997_vm14, %v6981_v63, %v6712_v18  ;;  %v6982_v19 = vsel %vm6980_vm13, %v6965_v2, %v6650_v25 }
 0x490   :  { %7015 = vst.msk [vmem:[#allocation5] sm:$0xff] %vm7014_vm15, %v6998_v32  ;;  %7047 = vrot.lane.b32.xlu0 %v6998_v32, %s7217_s4 }
 0x492   :  { %v6716_v59 = vpop.permute.xlu0 %6715 }
 0x493   :  { %v6654_v4 = vpop.permute.xlu1 %6653  ;;  %v7000_v42 = vsel %vm6997_vm14, %v6983_v15, %v6716_v59 }
 0x494   :  { %7017 = vst.msk [vmem:[#allocation5 + $0x10] sm:$0xff] %vm7014_vm15, %v7000_v42  ;;  %7051 = vrot.lane.b32.xlu0 %v7000_v42, %s7217_s4  ;;  %v6984_v52 = vsel %vm6980_vm13, %v6967_v10, %v6654_v4 }
 0x496   :  { %v6720_v44 = vpop.permute.xlu0 %6719 }
 0x497   :  { %v7002_v33 = vsel %vm6997_vm14, %v6985_v54, %v6720_v44 }
 0x498   :  { %v6658_v30 = vpop.permute.xlu1 %6657  ;;  %7019 = vst.msk [vmem:[#allocation5 + $0x20] sm:$0xff] %vm7014_vm15, %v7002_v33  ;;  %7055 = vrot.lane.b32.xlu0 %v7002_v33, %s7217_s4 }
 0x499   :  { %v6986_v13 = vsel %vm6980_vm13, %v6969_v12, %v6658_v30 }
 0x49a   :  { %v6724_v1 = vpop.permute.xlu0 %6723 }
 0x49b   :  { %v7004_v41 = vsel %vm6997_vm14, %v6987_v17, %v6724_v1 }
 0x49c   :  { %v6662_v57 = vpop.permute.xlu1 %6661  ;;  %7021 = vst.msk [vmem:[#allocation5 + $0x30] sm:$0xff] %vm7014_vm15, %v7004_v41  ;;  %7059 = vrot.lane.b32.xlu0 %v7004_v41, %s7217_s4 }
 0x49d   :  { %v6988_v29 = vsel %vm6980_vm13, %v6971_v35, %v6662_v57 }
 0x49e   :  { %v6728_v14 = vpop.permute.xlu0 %6727 }
 0x49f   :  { %v7006_v8 = vsel %vm6997_vm14, %v6989_v26, %v6728_v14 }
 0x4a0   :  { %v6666_v31 = vpop.permute.xlu1 %6665  ;;  %7023 = vst.msk [vmem:[#allocation5 + $0x40] sm:$0xff] %vm7014_vm15, %v7006_v8  ;;  %7063 = vrot.lane.b32.xlu0 %v7006_v8, %s7217_s4 }
 0x4a1   :  { %v6990_v43 = vsel %vm6980_vm13, %v6973_v7, %v6666_v31 }
 0x4a2   :  { %v6732_v28 = vpop.permute.xlu0 %6731 }
 0x4a3   :  { %v7008_v20 = vsel %vm6997_vm14, %v6991_v55, %v6732_v28 }
 0x4a4   :  { %v6670_v34 = vpop.permute.xlu1 %6669  ;;  %7025 = vst.msk [vmem:[#allocation5 + $0x50] sm:$0xff] %vm7014_vm15, %v7008_v20  ;;  %7067 = vrot.lane.b32.xlu0 %v7008_v20, %s7217_s4 }
 0x4a5   :  { %v6992_v49 = vsel %vm6980_vm13, %v6975_v39, %v6670_v34 }
 0x4a6   :  { %v6736_v62 = vpop.permute.xlu0 %6735 }
 0x4a7   :  { %v7010_v11 = vsel %vm6997_vm14, %v6993_v53, %v6736_v62 }
 0x4a8   :  { %7027 = vst.msk [vmem:[#allocation5 + $0x60] sm:$0xff] %vm7014_vm15, %v7010_v11  ;;  %7071 = vrot.lane.b32.xlu0 %v7010_v11, %s7217_s4 }
 0x4a9   :  { %v6674_v61 = vpop.permute.xlu1 %6673 }
 0x4aa   :  { %v6994_v22 = vsel %vm6980_vm13, %v6977_v37, %v6674_v61 }
 0x4ad   :  { %v6678_v23 = vpop.permute.xlu1 %6677 }
 0x4ae   :  { %v6740_v45 = vpop.permute.xlu0 %6739  ;;  %v6996_v51 = vsel %vm6980_vm13, %v6979_v38, %v6678_v23 }
 0x4af   :  { %v7012_v60 = vsel %vm6997_vm14, %v6995_v47, %v6740_v45 }
 0x4b0   :  { %7029 = vst.msk [vmem:[#allocation5 + $0x70] sm:$0xff] %vm7014_vm15, %v7012_v60  ;;  %7075 = vrot.lane.b32.xlu0 %v7012_v60, %s7217_s4 }
 0x4b1   :  { %v6714_v40 = vpop.permute.xlu1 %6713 }
 0x4b2   :  { %v6999_v21 = vsel %vm6997_vm14, %v6982_v19, %v6714_v40 }
 0x4b3   :  { %7016 = vst.msk [vmem:[#allocation5 + $0x8] sm:$0xff] %vm7014_vm15, %v6999_v21  ;;  %7049 = vrot.lane.b32.xlu1 %v6999_v21, %s7217_s4 }
 0x4b5   :  { %v6718_v36 = vpop.permute.xlu1 %6717 }
 0x4b6   :  { %v7001_v3 = vsel %vm6997_vm14, %v6984_v52, %v6718_v36 }
 0x4b7   :  { %7018 = vst.msk [vmem:[#allocation5 + $0x18] sm:$0xff] %vm7014_vm15, %v7001_v3  ;;  %7053 = vrot.lane.b32.xlu1 %v7001_v3, %s7217_s4 }
 0x4b9   :  { %v6722_v0 = vpop.permute.xlu1 %6721 }
 0x4ba   :  { %v7003_v63 = vsel %vm6997_vm14, %v6986_v13, %v6722_v0 }
 0x4bb   :  { %7020 = vst.msk [vmem:[#allocation5 + $0x28] sm:$0xff] %vm7014_vm15, %v7003_v63  ;;  %7057 = vrot.lane.b32.xlu1 %v7003_v63, %s7217_s4 }
 0x4bd   :  { %v6726_v25 = vpop.permute.xlu1 %6725 }
 0x4be   :  { %v7005_v18 = vsel %vm6997_vm14, %v6988_v29, %v6726_v25 }
 0x4bf   :  { %7022 = vst.msk [vmem:[#allocation5 + $0x38] sm:$0xff] %vm7014_vm15, %v7005_v18  ;;  %7061 = vrot.lane.b32.xlu1 %v7005_v18, %s7217_s4 }
 0x4c1   :  { %v6730_v32 = vpop.permute.xlu1 %6729 }
 0x4c2   :  { %v7007_v56 = vsel %vm6997_vm14, %v6990_v43, %v6730_v32 }
 0x4c3   :  { %7024 = vst.msk [vmem:[#allocation5 + $0x48] sm:$0xff] %vm7014_vm15, %v7007_v56  ;;  %7065 = vrot.lane.b32.xlu1 %v7007_v56, %s7217_s4 }
 0x4c5   :  { %v6734_v15 = vpop.permute.xlu1 %6733 }
 0x4c6   :  { %v7009_v4 = vsel %vm6997_vm14, %v6992_v49, %v6734_v15 }
 0x4c7   :  { %7026 = vst.msk [vmem:[#allocation5 + $0x58] sm:$0xff] %vm7014_vm15, %v7009_v4  ;;  %7069 = vrot.lane.b32.xlu1 %v7009_v4, %s7217_s4 }
 0x4c9   :  { %v6738_v59 = vpop.permute.xlu1 %6737 }
 0x4ca   :  { %v7011_v42 = vsel %vm6997_vm14, %v6994_v22, %v6738_v59 }
 0x4cb   :  { %7028 = vst.msk [vmem:[#allocation5 + $0x68] sm:$0xff] %vm7014_vm15, %v7011_v42  ;;  %7073 = vrot.lane.b32.xlu1 %v7011_v42, %s7217_s4 }
 0x4cd   :  { %v6742_v46 = vpop.permute.xlu1 %6741 }
 0x4ce   :  { %v7013_v54 = vsel %vm6997_vm14, %v6996_v51, %v6742_v46 }
 0x4cf   :  { %7030 = vst.msk [vmem:[#allocation5 + $0x78] sm:$0xff] %vm7014_vm15, %v7013_v54  ;;  %7077 = vrot.lane.b32.xlu1 %v7013_v54, %s7217_s4 }
 0x502   :  { %v7048_v5 = vpop.permute.xlu0 %7047 }
 0x503   :  { %7096 = vst.msk [vmem:[#allocation5] sm:$0xff] %vm7095_vm0, %v7048_v5 }
 0x506   :  { %v7052_v16 = vpop.permute.xlu0 %7051 }
 0x507   :  { %7098 = vst.msk [vmem:[#allocation5 + $0x10] sm:$0xff] %vm7095_vm0, %v7052_v16 }
 0x50a   :  { %v7056_v30 = vpop.permute.xlu0 %7055 }
 0x50b   :  { %7100 = vst.msk [vmem:[#allocation5 + $0x20] sm:$0xff] %vm7095_vm0, %v7056_v30 }
 0x50e   :  { %v7060_v27 = vpop.permute.xlu0 %7059 }
 0x50f   :  { %7102 = vst.msk [vmem:[#allocation5 + $0x30] sm:$0xff] %vm7095_vm0, %v7060_v27 }
 0x512   :  { %v7064_v58 = vpop.permute.xlu0 %7063 }
 0x513   :  { %7104 = vst.msk [vmem:[#allocation5 + $0x40] sm:$0xff] %vm7095_vm0, %v7064_v58 }
 0x516   :  { %v7068_v44 = vpop.permute.xlu0 %7067 }
 0x517   :  { %7106 = vst.msk [vmem:[#allocation5 + $0x50] sm:$0xff] %vm7095_vm0, %v7068_v44 }
 0x51a   :  { %v7072_v33 = vpop.permute.xlu0 %7071 }
 0x51b   :  { %7108 = vst.msk [vmem:[#allocation5 + $0x60] sm:$0xff] %vm7095_vm0, %v7072_v33 }
 0x522   :  { %v7076_v9 = vpop.permute.xlu0 %7075 }
 0x523   :  { %7110 = vst.msk [vmem:[#allocation5 + $0x70] sm:$0xff] %vm7095_vm0, %v7076_v9 }
 0x525   :  { %v7050_v17 = vpop.permute.xlu1 %7049 }
 0x526   :  { %7097 = vst.msk [vmem:[#allocation5 + $0x8] sm:$0xff] %vm7095_vm0, %v7050_v17 }
 0x529   :  { %v7054_v57 = vpop.permute.xlu1 %7053 }
 0x52a   :  { %7099 = vst.msk [vmem:[#allocation5 + $0x18] sm:$0xff] %vm7095_vm0, %v7054_v57 }
 0x52d   :  { %v7058_v1 = vpop.permute.xlu1 %7057 }
 0x52e   :  { %7101 = vst.msk [vmem:[#allocation5 + $0x28] sm:$0xff] %vm7095_vm0, %v7058_v1 }
 0x531   :  { %v7062_v41 = vpop.permute.xlu1 %7061 }
 0x532   :  { %7103 = vst.msk [vmem:[#allocation5 + $0x38] sm:$0xff] %vm7095_vm0, %v7062_v41 }
 0x535   :  { %v7066_v6 = vpop.permute.xlu1 %7065 }
 0x536   :  { %7105 = vst.msk [vmem:[#allocation5 + $0x48] sm:$0xff] %vm7095_vm0, %v7066_v6 }
 0x539   :  { %v7070_v26 = vpop.permute.xlu1 %7069 }
 0x53a   :  { %7107 = vst.msk [vmem:[#allocation5 + $0x58] sm:$0xff] %vm7095_vm0, %v7070_v26 }
 0x53d   :  { %v7074_v31 = vpop.permute.xlu1 %7073 }
 0x53e   :  { %7109 = vst.msk [vmem:[#allocation5 + $0x68] sm:$0xff] %vm7095_vm0, %v7074_v31 }
 0x541   :  { %v7078_v14 = vpop.permute.xlu1 %7077 }
 0x542   :  { %7111 = vst.msk [vmem:[#allocation5 + $0x78] sm:$0xff] %vm7095_vm0, %v7078_v14 }
 0x543   :  { %7183 = shalt.err (!%p7180_p12)
}
 0x544   :  { %s7184_s10 = scalar_lea.hbm %s11381_s1, 2048 }
 0x545   :  { %p7185_p13 = scmp.ne.s32.totalorder %s11381_s1, %s7184_s10  ;;  %p7188_p0 = scmp.lt.u32.totalorder %s7184_s10, %s11381_s1 }
 0x547   :  { %p7190_p1 = pnand %p7188_p0, %p7185_p13 }
 0x549   :  { %7193 = shalt.err (!%p7190_p1)
}
 0x54a   :  { %7123 = dma.vmem_to_hbm [thread:$0]  %s7118_s6, 2048, %s11381_s1, [#allocation4], %s7199_s16, %s7199_s16, %s7200_s17  }
 0x54b   :  { %7196 = dma.done.wait [#allocation4], 2048  }
 0x54c   :  { %7197 = vsyncadd [#allocation4], 4294965248 }
 0x54d   :  { %7127 = vsyncpa [#allocation3], 1 }
 0x54e   :  { %7128 = vsyncpa [#allocation4], 1 }

</bundles_post_ra>
